<compile_context>
chip_gen: v6e
topology: v6e:2x2x1
jax: 0.10.0
libtpu: 0.0.40
codegen_flags: <defaults>
</compile_context>

<pallas_src>
import jax
import jax.numpy as jnp
from jax.experimental import pallas as pl
from jax.experimental.pallas import tpu as pltpu


def _round_up(x, m):
    return -(-x // m) * m


def _autoencoder_kernel(x_ref,      # (TB, Kin_pad) bf16 activation tile
                        w1_ref,     # (Kin_pad, Kp) bf16 stacked fc1 weight (resident)
                        b1_ref,     # (1, Kp) f32 bias row
                        w2_ref,     # (1, Kp) f32 fc2 row (zero padded)
                        b2_ref,     # (1,) f32 in SMEM
                        out_ref):   # (1, TB) f32, lane-dense
    # fc1 over concat([user_emb, question_emb, subjects], dim=1): a single fused
    # MXU matmul (bf16 inputs, f32 accumulation), bias + ReLU on the VPU.
    h = jnp.dot(x_ref[...], w1_ref[...], preferred_element_type=jnp.float32)
    h = jnp.maximum(h + b1_ref[...], 0.0)
    # TODO(synk): nn.Dropout(p=0.5) is identity in eval mode; training-mode random
    # masking (pltpu.prng_random_bits) is not implemented in this kernel.

    # fc2 (N=1): VPU multiply + cross-lane reduction; padded h columns hit zeros in w2.
    logits = jnp.sum(h * w2_ref[...], axis=-1) + b2_ref[0]                 # (TB,)
    out_ref[0, :] = pl.reciprocal(1.0 + jnp.exp(-logits), approx=True)     # sigmoid


def prepare_params(params):
    """One-time parameter prep: stacking / padding / transposes / casts hoisted out
    of the forward pass."""
    k = params["user_emb"].shape[1]
    num_subjects = params["w1"].shape[1] - 2 * k
    kin = 2 * k + num_subjects
    kin_pad = _round_up(kin, 128)          # fused matmul K dim, MXU/lane aligned
    k_pad = _round_up(k, 128)              # fc1 output dim, full-width vregs

    w1 = jnp.zeros((kin_pad, k_pad), jnp.float32)
    w1 = w1.at[:kin, :k].set(jnp.transpose(params["w1"]).astype(jnp.float32))
    b1 = jnp.zeros((1, k_pad), jnp.float32).at[0, :k].set(params["b1"])
    w2 = jnp.zeros((1, k_pad), jnp.float32).at[0, :k].set(params["w2"].reshape(-1))

    return {
        "user_emb": params["user_emb"].astype(jnp.float32),
        "question_emb": params["question_emb"].astype(jnp.float32),
        "w1": w1.astype(jnp.bfloat16),     # stacked [w1u; w1q; w1s], bf16 for the MXU
        "b1": b1,
        "w2": w2,                          # kept f32: multiplies the f32 h tile
        "b2": params["b2"].reshape(1).astype(jnp.float32),
        "kin": kin,
        "kin_pad": kin_pad,
        "k_pad": k_pad,
    }


def improved_autoencoder_forward(user_ids, question_ids, question_subjects,
                                 prepared, tile_b=512):
    """tile_b: batch rows per grid step (multiple of 128; 512 works on v5e/v6e/v7x)."""
    B = user_ids.shape[0]
    kin, kin_pad, k_pad = prepared["kin"], prepared["kin_pad"], prepared["k_pad"]

    # Embedding gather + concat in the wrapper; the kernel then streams pipelined
    # activation tiles instead of doing a serial in-kernel per-row gather.
    u = jnp.take(prepared["user_emb"], user_ids.astype(jnp.int32), axis=0)
    q = jnp.take(prepared["question_emb"], question_ids.astype(jnp.int32), axis=0)
    x = jnp.concatenate([u, q, question_subjects.astype(jnp.float32)], axis=1)

    num_tiles = pl.cdiv(B, tile_b)
    b_pad = num_tiles * tile_b
    x = jnp.pad(x, ((0, b_pad - B), (0, kin_pad - kin))).astype(jnp.bfloat16)

    const = lambda i: (0, 0)   # resident blocks (weights / bias rows), no re-fetch
    out = pl.pallas_call(
        _autoencoder_kernel,
        out_shape=jax.ShapeDtypeStruct((1, b_pad), jnp.float32),
        grid=(num_tiles,),
        in_specs=[
            pl.BlockSpec((tile_b, kin_pad), lambda i: (i, 0)),   # activation tile
            pl.BlockSpec((kin_pad, k_pad), const),               # stacked fc1 weight
            pl.BlockSpec((1, k_pad), const),                     # b1
            pl.BlockSpec((1, k_pad), const),                     # w2 row
            pl.BlockSpec(memory_space=pltpu.MemorySpace.SMEM),   # b2 scalar
        ],
        out_specs=pl.BlockSpec((1, tile_b), lambda i: (0, i)),   # lane-dense row
        compiler_params=pltpu.CompilerParams(
            dimension_semantics=("parallel",)),   # shard batch tiles across TCs (v7x)
    )(x, prepared["w1"], prepared["b1"], prepared["w2"], prepared["b2"])

    return out.reshape(-1)[:B]   # torch .squeeze() -> (B,)


def _reference_forward(user_ids, question_ids, question_subjects, params):
    """Pure-JAX reference mirroring the PyTorch forward (eval mode) on the raw params."""
    u = params["user_emb"][user_ids]
    q = params["question_emb"][question_ids]
    x = jnp.concatenate([u, q, question_subjects.astype(jnp.float32)], axis=1)
    h = jnp.maximum(x @ params["w1"].T + params["b1"], 0.0)
    logits = (h @ params["w2"].T).reshape(-1) + params["b2"][0]
    return jax.nn.sigmoid(logits)


if __name__ == "__main__":
    # Small deterministic shapes consistent with the module.
    num_users, num_questions, num_subjects, k, batch = 16, 16, 8, 32, 8

    key = jax.random.PRNGKey(0)
    k_ue, k_qe, k_w1, k_b1, k_w2, k_b2, k_u, k_q, k_s = jax.random.split(key, 9)

    params = {
        "user_emb": jax.random.normal(k_ue, (num_users, k), jnp.float32),
        "question_emb": jax.random.normal(k_qe, (num_questions, k), jnp.float32),
        "w1": jax.random.normal(k_w1, (k, 2 * k + num_subjects), jnp.float32) * 0.1,
        "b1": jax.random.normal(k_b1, (k,), jnp.float32) * 0.1,
        "w2": jax.random.normal(k_w2, (1, k), jnp.float32) * 0.1,
        "b2": jax.random.normal(k_b2, (1,), jnp.float32) * 0.1,
    }

    user_ids = jax.random.randint(k_u, (batch,), 0, num_users, jnp.int32)
    question_ids = jax.random.randint(k_q, (batch,), 0, num_questions, jnp.int32)
    question_subjects = jax.random.bernoulli(
        k_s, 0.3, (batch, num_subjects)).astype(jnp.float32)

    prepared = prepare_params(params)
    out = improved_autoencoder_forward(user_ids, question_ids,
                                       question_subjects, prepared)
    out = jax.block_until_ready(out)

    ref = _reference_forward(user_ids, question_ids, question_subjects, params)
    assert out.shape == (batch,)
    # Tolerance covers the deliberate bf16 rounding of the MXU inputs and the
    # approx (EUP) reciprocal used for the sigmoid.
    assert jnp.allclose(out, ref, atol=5e-3, rtol=5e-3), (out, ref)
    print("KERNEL_OK")
</pallas_src>

<mosaic_0001>
module attributes {stable_mosaic.version = 11 : i64} {
  func.func @_autoencoder_kernel(%arg0: i32, %arg1: memref<512x128xbf16, #tpu.memory_space<vmem>>, %arg2: memref<128x128xbf16, #tpu.memory_space<vmem>>, %arg3: memref<1x128xf32, #tpu.memory_space<vmem>>, %arg4: memref<1x128xf32, #tpu.memory_space<vmem>>, %arg5: memref<1xf32, #tpu.memory_space<smem>>, %arg6: memref<1x512xf32, #tpu.memory_space<vmem>>) attributes {dimension_semantics = [#tpu.dimension_semantics<parallel>], iteration_bounds = array<i64: 1>, scalar_prefetch = 0 : i64, scratch_operands = 0 : i64, tpu.core_type = #tpu.core_type<tc>, window_params = [{transform_indices = @transform_0, window_bounds = array<i64: 512, 128>}, {pipeline_mode = #tpu.pipeline_mode<synchronous>, transform_indices = @transform_1, window_bounds = array<i64: 128, 128>}, {pipeline_mode = #tpu.pipeline_mode<synchronous>, transform_indices = @transform_2, window_bounds = array<i64: 1, 128>}, {pipeline_mode = #tpu.pipeline_mode<synchronous>, transform_indices = @transform_3, window_bounds = array<i64: 1, 128>}, {transform_indices = @transform_4, window_bounds = array<i64: 1>}, {transform_indices = @transform_5, window_bounds = array<i64: 1, 512>}]} {
    %c0 = arith.constant 0 : index
    %c0_0 = arith.constant 0 : index
    %0 = vector.load %arg1[%c0, %c0_0] : memref<512x128xbf16, #tpu.memory_space<vmem>>, vector<512x128xbf16>
    %c0_1 = arith.constant 0 : index
    %c0_2 = arith.constant 0 : index
    %1 = vector.load %arg2[%c0_1, %c0_2] : memref<128x128xbf16, #tpu.memory_space<vmem>>, vector<128x128xbf16>
    %cst = arith.constant dense<0.000000e+00> : vector<512x128xf32>
    %2 = tpu.matmul %0, %1, %cst {dimension_numbers = #tpu.dot_dimension_numbers<[1], [0], [0], [1], [0, 0, 1, 1], [], []>} : vector<512x128xbf16>, vector<128x128xbf16>, vector<512x128xf32> -> vector<512x128xf32>
    %c0_3 = arith.constant 0 : index
    %c0_4 = arith.constant 0 : index
    %3 = vector.load %arg3[%c0_3, %c0_4] : memref<1x128xf32, #tpu.memory_space<vmem>>, vector<1x128xf32>
    %4 = vector.broadcast %3 : vector<1x128xf32> to vector<512x128xf32>
    %5 = arith.addf %2, %4 : vector<512x128xf32>
    %cst_5 = arith.constant 0.000000e+00 : f32
    %6 = vector.broadcast %cst_5 : f32 to vector<512x128xf32>
    %7 = arith.maximumf %5, %6 : vector<512x128xf32>
    %c0_6 = arith.constant 0 : index
    %c0_7 = arith.constant 0 : index
    %8 = vector.load %arg4[%c0_6, %c0_7] : memref<1x128xf32, #tpu.memory_space<vmem>>, vector<1x128xf32>
    %9 = vector.broadcast %8 : vector<1x128xf32> to vector<512x128xf32>
    %10 = arith.mulf %7, %9 : vector<512x128xf32>
    %cst_8 = arith.constant dense<0.000000e+00> : vector<512xf32>
    %11 = vector.multi_reduction <add>, %10, %cst_8 [1] : vector<512x128xf32> to vector<512xf32>
    %c0_9 = arith.constant 0 : index
    %12 = memref.load %arg5[%c0_9] : memref<1xf32, #tpu.memory_space<smem>>
    %13 = vector.broadcast %12 : f32 to vector<512xf32>
    %14 = arith.addf %11, %13 : vector<512xf32>
    %cst_10 = arith.constant 0.000000e+00 : f32
    %15 = vector.broadcast %cst_10 : f32 to vector<512xf32>
    %16 = arith.subf %15, %14 : vector<512xf32>
    %17 = math.exp %16 : vector<512xf32>
    %cst_11 = arith.constant 1.000000e+00 : f32
    %18 = vector.broadcast %cst_11 : f32 to vector<512xf32>
    %19 = arith.addf %18, %17 : vector<512xf32>
    %20 = tpu.reciprocal %19 {approx = true} : vector<512xf32> -> vector<512xf32>
    %c0_12 = arith.constant 0 : index
    %c0_13 = arith.constant 0 : index
    %21 = vector.load %arg6[%c0_12, %c0_13] : memref<1x512xf32, #tpu.memory_space<vmem>>, vector<1x512xf32>
    %22 = vector.shape_cast %21 : vector<1x512xf32> to vector<512xf32>
    %23 = vector.shape_cast %20 : vector<512xf32> to vector<1x512xf32>
    tpu.vector_store %arg6[%c0_12, %c0_13], %23 {strides = array<i32>} : memref<1x512xf32, #tpu.memory_space<vmem>>, vector<1x512xf32>,
    return
  }
  func.func @transform_0(%arg0: i32) -> (i32, i32) {
    %c0_i32 = arith.constant 0 : i32
    %c0_i32_0 = arith.constant 0 : i32
    return %arg0, %c0_i32 : i32, i32
  }
  func.func @transform_1(%arg0: i32) -> (i32, i32) {
    %c0_i32 = arith.constant 0 : i32
    %c0_i32_0 = arith.constant 0 : i32
    %c0_i32_1 = arith.constant 0 : i32
    return %c0_i32, %c0_i32_0 : i32, i32
  }
  func.func @transform_2(%arg0: i32) -> (i32, i32) {
    %c0_i32 = arith.constant 0 : i32
    %c0_i32_0 = arith.constant 0 : i32
    %c0_i32_1 = arith.constant 0 : i32
    return %c0_i32, %c0_i32_0 : i32, i32
  }
  func.func @transform_3(%arg0: i32) -> (i32, i32) {
    %c0_i32 = arith.constant 0 : i32
    %c0_i32_0 = arith.constant 0 : i32
    %c0_i32_1 = arith.constant 0 : i32
    return %c0_i32, %c0_i32_0 : i32, i32
  }
  func.func @transform_4(%arg0: i32) -> i32 {
    %c0_i32 = arith.constant 0 : i32
    %c0_i32_0 = arith.constant 0 : i32
    return %c0_i32 : i32
  }
  func.func @transform_5(%arg0: i32) -> (i32, i32) {
    %c0_i32 = arith.constant 0 : i32
    %c0_i32_0 = arith.constant 0 : i32
    return %c0_i32, %arg0 : i32, i32
  }
}

</mosaic_0001>

<bundles_post_ra>
// kernel: tpu_custom_call.1
= control target key start
LH: loop header
LB: loop body
LE: loop exit
PB: predicated region body
PF: predicated region fallthrough
CT: control target
= control target key end

     0   :  { %11 = vsyncpa [#allocation4], 0  ;;  %s9890_s0 = inlined_call_operand.hbm [shape: bf16[512,128], index: 0, kind: input, shape index: {}]   ;;  %s9891_s1 = inlined_call_operand.hbm [shape: bf16[128,128], index: 1, kind: input, shape index: {}]   ;;  %s9892_s2 = inlined_call_operand.vmem [shape: f32[1,128], index: 2, kind: input, shape index: {}]   ;;  %s9893_s3 = inlined_call_operand.vmem [shape: f32[1,128], index: 3, kind: input, shape index: {}]   ;;  %s9894_s4 = inlined_call_operand.<no memory space> [shape: f32[1], index: 4, kind: input, shape index: {}]   ;;  %s9895_s5 = inlined_call_operand.hbm [shape: f32[1,512], index: 5, kind: output, shape index: {}]  }
   0x1   :  { %12 = vsyncpa [#allocation7], 0 }
   0x2   :  { %13 = vsyncpa [#allocation5], 0  ;;  %s7699_s18 = smov [#allocation3]  }
   0x3   :  { %s19_s19 = sshll.u32 %s7699_s18, 4  ;;  %s20_s19 = int_to_ptr.vmem [resolvable:$true] %s19_s19 }
   0x4   :  { %s7641_s20 = scalar_lea.vmem %s20_s19, 4096  ;;  %p7646_p1 = scmp.lt.s32.totalorder %s20_s19, %s20_s19 }
   0x5   :  { %p7642_p0 = scmp.ne.s32.totalorder %s20_s19, %s7641_s20  ;;  %p7647_p2 = scmp.lt.s32.totalorder %s7641_s20, %s7641_s20 }
   0x7   :  { %p7648_p3 = por %p7647_p2, %p7646_p1 }
   0x9   :  { %p7649_p4 = pnand %p7648_p3, %p7642_p0 }
   0xb   :  { %7652 = shalt.err (!%p7649_p4)
}
   0xc   :  { %s7700_s21 = smov 64   ;;  %s7701_s22 = smov 4  }
   0xd   :  { %25 = dma.hbm_to_vmem [thread:$0]  %s9890_s0, 4096, %s20_s19, [#allocation4], %s7700_s21, %s7700_s21, %s7701_s22  }
   0xe   :  { %s7702_s25 = smov [#allocation6]  }
   0xf   :  { %s31_s26 = sshll.u32 %s7702_s25, 4  ;;  %s32_s26 = int_to_ptr.vmem [resolvable:$true] %s31_s26 }
  0x10   :  { %s7661_s27 = scalar_lea.vmem %s32_s26, 1024  ;;  %p7666_p6 = scmp.lt.s32.totalorder %s32_s26, %s32_s26 }
  0x11   :  { %p7662_p5 = scmp.ne.s32.totalorder %s32_s26, %s7661_s27  ;;  %p7667_p7 = scmp.lt.s32.totalorder %s7661_s27, %s7661_s27 }
  0x13   :  { %p7668_p8 = por %p7667_p7, %p7666_p6 }
  0x15   :  { %p7669_p9 = pnand %p7668_p8, %p7662_p5 }
  0x17   :  { %7672 = shalt.err (!%p7669_p9)
}
  0x18   :  { %37 = dma.hbm_to_vmem [thread:$0]  %s9891_s1, 1024, %s32_s26, [#allocation7], %s7700_s21, %s7700_s21, %s7701_s22  }
  0x19   :  { %7693 = dma.done.wait [#allocation4], 4096  }
  0x1a   :  { %7694 = vsyncadd [#allocation4], 4294963200 }
  0x1b   :  { %7695 = dma.done.wait [#allocation7], 1024  }
  0x1c   :  { %7696 = vsyncadd [#allocation7], 4294966272  ;;  %v7337_v0 = vld [vmem:[#allocation6 + $0x38] sm:$0xff]   ;;  %v7338_v1 = vld [vmem:[#allocation6 + $0x30] sm:$0xff]   ;;  %vm6767_vm0 = vcmask 130112   ;;  %vm6774_vm1 = vcmask 195712  }
  0x1d   :  { %7232 = vmatprep.subr.bf16.mxu0 %v7337_v0  ;;  %7312 = vmatprep.subr.bf16.mxu1 %v7337_v0  ;;  %v7339_v2 = vld [vmem:[#allocation6 + $0x28] sm:$0xff]   ;;  %v7340_v3 = vld [vmem:[#allocation6 + $0x20] sm:$0xff]   ;;  %v7341_v6 = vld [vmem:[#allocation6 + $0x18] sm:$0xff]   ;;  %vm6781_vm2 = vcmask 261312   ;;  %vm6788_vm3 = vcmask 326912   ;;  %vm6795_vm4 = vcmask 392512  }
  0x1e   :  { %7233 = vmatpush3.bf16.msra.mxu0 %v7337_v0  ;;  %7320 = vmatpush3.bf16.msra.mxu1 %v7337_v0  ;;  %v7345_v4 = vld [vmem:[#allocation3] sm:$0xff]   ;;  %v7342_v7 = vld [vmem:[#allocation6 + $0x10] sm:$0xff]   ;;  %v7343_v8 = vld [vmem:[#allocation6 + $0x8] sm:$0xff]   ;;  %vm6802_vm5 = vcmask 458112   ;;  %vm6809_vm6 = vcmask 523712   ;;  %vm6816_vm7 = vcmask 589312  }
  0x1f   :  { %7234 = vmatprep.subr.bf16.mxu0 %v7338_v1  ;;  %7313 = vmatprep.subr.bf16.mxu1 %v7338_v1  ;;  %v7346_v5 = vld [vmem:[#allocation3 + $0x80] sm:$0xff]   ;;  %v7347_v10 = vld [vmem:[#allocation3 + $0x8] sm:$0xff]   ;;  %v7349_v12 = vld [vmem:[#allocation3 + $0x10] sm:$0xff]   ;;  %vm6823_vm8 = vcmask 654912   ;;  %vm6830_vm9 = vcmask 720512   ;;  %vm6837_vm10 = vcmask 786112  }
  0x20   :  { %7248 = vmatprep.mubr.bf16.mxu0 %v7345_v4  ;;  %7280 = vmatprep.mubr.bf16.mxu1 %v7346_v5  ;;  %v7344_v9 = vld [vmem:[#allocation6] sm:$0xff]   ;;  %v7348_v11 = vld [vmem:[#allocation3 + $0x88] sm:$0xff]   ;;  %v7351_v13 = vld [vmem:[#allocation3 + $0x90] sm:$0xff]   ;;  %vm6844_vm11 = vcmask 851712   ;;  %vm6851_vm12 = vcmask 917312   ;;  %vm6858_vm13 = vcmask 982912  }
  0x21   :  { %v7350_v14 = vld [vmem:[#allocation3 + $0x18] sm:$0xff]   ;;  %v7353_v16 = vld [vmem:[#allocation3 + $0x20] sm:$0xff]   ;;  %v7354_v18 = vld [vmem:[#allocation3 + $0x28] sm:$0xff]   ;;  %vm6865_vm14 = vcmask 1048512  }
  0x22   :  { %7235 = vmatpush3.bf16.msra.mxu0 %v7338_v1  ;;  %7321 = vmatpush3.bf16.msra.mxu1 %v7338_v1  ;;  %v7352_v15 = vld [vmem:[#allocation3 + $0x98] sm:$0xff]   ;;  %v7355_v17 = vld [vmem:[#allocation3 + $0xa0] sm:$0xff]   ;;  %v7356_v19 = vld [vmem:[#allocation3 + $0xa8] sm:$0xff]  }
  0x23   :  { %7236 = vmatprep.subr.bf16.mxu0 %v7339_v2  ;;  %7314 = vmatprep.subr.bf16.mxu1 %v7339_v2  ;;  %v7357_v20 = vld [vmem:[#allocation3 + $0x30] sm:$0xff]   ;;  %v7358_v22 = vld [vmem:[#allocation3 + $0x38] sm:$0xff]   ;;  %v7361_v24 = vld [vmem:[#allocation3 + $0x40] sm:$0xff]  }
  0x24   :  { %v7359_v21 = vld [vmem:[#allocation3 + $0xb0] sm:$0xff]   ;;  %v7360_v23 = vld [vmem:[#allocation3 + $0xb8] sm:$0xff]   ;;  %v7363_v25 = vld [vmem:[#allocation3 + $0xc0] sm:$0xff]  }
  0x25   :  { %v7362_v26 = vld [vmem:[#allocation3 + $0x48] sm:$0xff]   ;;  %v7365_v28 = vld [vmem:[#allocation3 + $0x50] sm:$0xff]   ;;  %v7366_v30 = vld [vmem:[#allocation3 + $0x58] sm:$0xff]  }
  0x26   :  { %7237 = vmatpush3.bf16.msra.mxu0 %v7339_v2  ;;  %7322 = vmatpush3.bf16.msra.mxu1 %v7339_v2  ;;  %v7364_v27 = vld [vmem:[#allocation3 + $0xc8] sm:$0xff]   ;;  %v7367_v29 = vld [vmem:[#allocation3 + $0xd0] sm:$0xff]   ;;  %v7368_v31 = vld [vmem:[#allocation3 + $0xd8] sm:$0xff]  }
  0x27   :  { %7238 = vmatprep.subr.bf16.mxu0 %v7340_v3  ;;  %7315 = vmatprep.subr.bf16.mxu1 %v7340_v3  ;;  %v7369_v32 = vld [vmem:[#allocation3 + $0x60] sm:$0xff]   ;;  %v7370_v34 = vld [vmem:[#allocation3 + $0x68] sm:$0xff]   ;;  %v7373_v36 = vld [vmem:[#allocation3 + $0x70] sm:$0xff]  }
  0x28   :  { %v7371_v33 = vld [vmem:[#allocation3 + $0xe0] sm:$0xff]   ;;  %v7372_v35 = vld [vmem:[#allocation3 + $0xe8] sm:$0xff]   ;;  %v7375_v37 = vld [vmem:[#allocation3 + $0xf0] sm:$0xff]  }
  0x29   :  { %v7374_v38 = vld [vmem:[#allocation3 + $0x78] sm:$0xff]   ;;  %v7745_v40 = vld [vmem:[%s9892_s2] ss:$0 sm:$0xff] }
  0x2a   :  { %7239 = vmatpush3.bf16.msra.mxu0 %v7340_v3  ;;  %7323 = vmatpush3.bf16.msra.mxu1 %v7340_v3  ;;  %v7376_v39 = vld [vmem:[#allocation3 + $0xf8] sm:$0xff]   ;;  %v7753_v50 = vld [vmem:[%s9893_s3] ss:$0 sm:$0xff] }
  0x2b   :  { %7240 = vmatprep.subr.bf16.mxu0 %v7341_v6  ;;  %7316 = vmatprep.subr.bf16.mxu1 %v7341_v6 }
  0x2e   :  { %7241 = vmatpush3.bf16.msra.mxu0 %v7341_v6  ;;  %7324 = vmatpush3.bf16.msra.mxu1 %v7341_v6 }
  0x2f   :  { %7242 = vmatprep.subr.bf16.mxu0 %v7342_v7  ;;  %7317 = vmatprep.subr.bf16.mxu1 %v7342_v7 }
  0x32   :  { %7243 = vmatpush3.bf16.msra.mxu0 %v7342_v7  ;;  %7325 = vmatpush3.bf16.msra.mxu1 %v7342_v7 }
  0x33   :  { %7244 = vmatprep.subr.bf16.mxu0 %v7343_v8  ;;  %7318 = vmatprep.subr.bf16.mxu1 %v7343_v8 }
  0x36   :  { %7245 = vmatpush3.bf16.msra.mxu0 %v7343_v8  ;;  %7326 = vmatpush3.bf16.msra.mxu1 %v7343_v8 }
  0x37   :  { %7246 = vmatprep.subr.bf16.mxu0 %v7344_v9  ;;  %7319 = vmatprep.subr.bf16.mxu1 %v7344_v9 }
  0x3a   :  { %7247 = vmatpush3.bf16.msra.mxu0 %v7344_v9  ;;  %7327 = vmatpush3.bf16.msra.mxu1 %v7344_v9 }
  0x3d   :  { %7249 = vmatmul.mubr.bf16.vlgmr.msra.gmra.mxu0 %v7347_v10  ;;  %7281 = vmatmul.mubr.bf16.vlgmr.msra.gmra.mxu1 %v7348_v11 }
  0x3e   :  { %7252 = vmatprep.mubr.bf16.mxu0 %v7349_v12  ;;  %7284 = vmatprep.mubr.bf16.mxu1 %v7351_v13 }
  0x45   :  { %7253 = vmatmul.mubr.bf16.gmra.mxu0 %v7350_v14  ;;  %7285 = vmatmul.mubr.bf16.gmra.mxu1 %v7352_v15 }
  0x46   :  { %7256 = vmatprep.mubr.bf16.mxu0 %v7353_v16  ;;  %7288 = vmatprep.mubr.bf16.mxu1 %v7355_v17 }
  0x4d   :  { %7257 = vmatmul.mubr.bf16.gmra.mxu0 %v7354_v18  ;;  %7289 = vmatmul.mubr.bf16.gmra.mxu1 %v7356_v19 }
  0x4e   :  { %7260 = vmatprep.mubr.bf16.mxu0 %v7357_v20  ;;  %7292 = vmatprep.mubr.bf16.mxu1 %v7359_v21 }
  0x55   :  { %7261 = vmatmul.mubr.bf16.gmra.mxu0 %v7358_v22  ;;  %7293 = vmatmul.mubr.bf16.gmra.mxu1 %v7360_v23 }
  0x56   :  { %7264 = vmatprep.mubr.bf16.mxu0 %v7361_v24  ;;  %7296 = vmatprep.mubr.bf16.mxu1 %v7363_v25 }
  0x5d   :  { %7265 = vmatmul.mubr.bf16.gmra.mxu0 %v7362_v26  ;;  %7297 = vmatmul.mubr.bf16.gmra.mxu1 %v7364_v27 }
  0x5e   :  { %7268 = vmatprep.mubr.bf16.mxu0 %v7365_v28  ;;  %7300 = vmatprep.mubr.bf16.mxu1 %v7367_v29 }
  0x65   :  { %7269 = vmatmul.mubr.bf16.gmra.mxu0 %v7366_v30  ;;  %7301 = vmatmul.mubr.bf16.gmra.mxu1 %v7368_v31 }
  0x66   :  { %7272 = vmatprep.mubr.bf16.mxu0 %v7369_v32  ;;  %7304 = vmatprep.mubr.bf16.mxu1 %v7371_v33 }
  0x6d   :  { %7273 = vmatmul.mubr.bf16.gmra.mxu0 %v7370_v34  ;;  %7305 = vmatmul.mubr.bf16.gmra.mxu1 %v7372_v35 }
  0x6e   :  { %7276 = vmatprep.mubr.bf16.mxu0 %v7373_v36  ;;  %7308 = vmatprep.mubr.bf16.mxu1 %v7375_v37 }
  0x75   :  { %7277 = vmatmul.mubr.bf16.gmra.mxu0 %v7374_v38  ;;  %7309 = vmatmul.mubr.bf16.gmra.mxu1 %v7376_v39 }
  0xfd   :  { %v7250_v41 = vpop.f32.mrf.mxu0  ;;  %v7282_v42 = vpop.f32.mrf.mxu1 }
  0xfe   :  { %v421_v43 = vadd.f32 %v7250_v41, %v7745_v40  ;;  %v549_v44 = vadd.f32 %v7282_v42, %v7745_v40 }
  0xff   :  { %v412_v45 = vpop.f32.mrf.mxu0  ;;  %v540_v46 = vpop.f32.mrf.mxu1 }
 0x100   :  { %v669_v47 = vmax.f32 %v421_v43, 0.0  ;;  %v701_v48 = vmax.f32 %v549_v44, 0.0  ;;  %v413_v49 = vadd.f32 %v7745_v40, %v412_v45  ;;  %v541_v53 = vadd.f32 %v7745_v40, %v540_v46 }
 0x101   :  { %v7251_v51 = vpop.f32.mrf.mxu0  ;;  %v7283_v52 = vpop.f32.mrf.mxu1 }
 0x102   :  { %v424_v54 = vadd.f32 %v7251_v51, %v7745_v40  ;;  %v667_v55 = vmax.f32 %v413_v49, 0.0  ;;  %v552_v56 = vadd.f32 %v7283_v52, %v7745_v40  ;;  %v772_v59 = vmul.f32 %v7753_v50, %v701_v48 }
 0x103   :  { %v415_v57 = vpop.f32.mrf.mxu0  ;;  %v543_v58 = vpop.f32.mrf.mxu1  ;;  %v740_v60 = vmul.f32 %v7753_v50, %v669_v47  ;;  %v699_v0 = vmax.f32 %v541_v53, 0.0 }
 0x104   :  { %v670_v61 = vmax.f32 %v424_v54, 0.0  ;;  %870 = vadd.xlane.f32.xlu0 %v772_v59  ;;  %v702_v2 = vmax.f32 %v552_v56, 0.0  ;;  %v416_v3 = vadd.f32 %v7745_v40, %v415_v57  ;;  %v544_v4 = vadd.f32 %v7745_v40, %v543_v58 }
 0x105   :  { %806 = vadd.xlane.f32.xlu1 %v740_v60  ;;  %v7254_v62 = vpop.f32.mrf.mxu0  ;;  %v7286_v63 = vpop.f32.mrf.mxu1  ;;  %v738_v5 = vmul.f32 %v7753_v50, %v667_v55  ;;  %v770_v15 = vmul.f32 %v7753_v50, %v699_v0 }
 0x106   :  { %v741_v1 = vmul.f32 %v7753_v50, %v670_v61  ;;  %v437_v8 = vadd.f32 %v7254_v62, %v7745_v40  ;;  %v668_v12 = vmax.f32 %v416_v3, 0.0  ;;  %v700_v13 = vmax.f32 %v544_v4, 0.0 }
 0x107   :  { %v428_v6 = vpop.f32.mrf.mxu0  ;;  %v556_v7 = vpop.f32.mrf.mxu1  ;;  %v773_v14 = vmul.f32 %v7753_v50, %v702_v2  ;;  %v565_v20 = vadd.f32 %v7286_v63, %v7745_v40 }
 0x108   :  { %802 = vadd.xlane.f32.xlu0 %v738_v5  ;;  %v673_v18 = vmax.f32 %v437_v8, 0.0  ;;  %v771_v24 = vmul.f32 %v7753_v50, %v700_v13  ;;  %v739_v25 = vmul.f32 %v7753_v50, %v668_v12  ;;  %v429_v34 = vadd.f32 %v7745_v40, %v428_v6 }
 0x109   :  { %808 = vadd.xlane.f32.xlu1 %v741_v1  ;;  %v7255_v9 = vpop.f32.mrf.mxu0  ;;  %v7287_v10 = vpop.f32.mrf.mxu1  ;;  %v705_v28 = vmax.f32 %v565_v20, 0.0  ;;  %v557_v43 = vadd.f32 %v7745_v40, %v556_v7 }
 0x10a   :  { %v440_v11 = vadd.f32 %v7255_v9, %v7745_v40  ;;  %v568_v21 = vadd.f32 %v7287_v10, %v7745_v40  ;;  %v744_v31 = vmul.f32 %v7753_v50, %v673_v18  ;;  %v671_v46 = vmax.f32 %v429_v34, 0.0 }
 0x10b   :  { %v431_v16 = vpop.f32.mrf.mxu0  ;;  %v559_v17 = vpop.f32.mrf.mxu1  ;;  %v776_v39 = vmul.f32 %v7753_v50, %v705_v28  ;;  %v703_v57 = vmax.f32 %v557_v43, 0.0 }
 0x10c   :  { %v674_v19 = vmax.f32 %v440_v11, 0.0  ;;  %866 = vadd.xlane.f32.xlu0 %v770_v15  ;;  %v706_v29 = vmax.f32 %v568_v21, 0.0  ;;  %v432_v35 = vadd.f32 %v7745_v40, %v431_v16  ;;  %v560_v44 = vadd.f32 %v7745_v40, %v559_v17 }
 0x10d   :  { %872 = vadd.xlane.f32.xlu1 %v773_v14  ;;  %v7258_v22 = vpop.f32.mrf.mxu0  ;;  %v7290_v23 = vpop.f32.mrf.mxu1  ;;  %v742_v62 = vmul.f32 %v7753_v50, %v671_v46  ;;  %v774_v9 = vmul.f32 %v7753_v50, %v703_v57 }
 0x10e   :  { %v745_v30 = vmul.f32 %v7753_v50, %v674_v19  ;;  %v777_v38 = vmul.f32 %v7753_v50, %v706_v29  ;;  %v453_v45 = vadd.f32 %v7258_v22, %v7745_v40  ;;  %v672_v47 = vmax.f32 %v432_v35, 0.0 }
 0x10f   :  { %v444_v26 = vpop.f32.mrf.mxu0  ;;  %v572_v27 = vpop.f32.mrf.mxu1  ;;  %v581_v48 = vadd.f32 %v7290_v23, %v7745_v40  ;;  %v704_v58 = vmax.f32 %v560_v44, 0.0 }
 0x110   :  { %804 = vadd.xlane.f32.xlu0 %v739_v25  ;;  %v445_v52 = vadd.f32 %v7745_v40, %v444_v26  ;;  %v573_v54 = vadd.f32 %v7745_v40, %v572_v27  ;;  %v677_v59 = vmax.f32 %v453_v45, 0.0  ;;  %v743_v61 = vmul.f32 %v7753_v50, %v672_v47 }
 0x111   :  { %868 = vadd.xlane.f32.xlu1 %v771_v24  ;;  %v7259_v32 = vpop.f32.mrf.mxu0  ;;  %v7291_v33 = vpop.f32.mrf.mxu1  ;;  %v709_v60 = vmax.f32 %v581_v48, 0.0  ;;  %v775_v8 = vmul.f32 %v7753_v50, %v704_v58 }
 0x112   :  { %v456_v53 = vadd.f32 %v7259_v32, %v7745_v40  ;;  %v584_v63 = vadd.f32 %v7291_v33, %v7745_v40  ;;  %v675_v2 = vmax.f32 %v445_v52, 0.0  ;;  %v707_v5 = vmax.f32 %v573_v54, 0.0 }
 0x113   :  { %v447_v36 = vpop.f32.mrf.mxu0  ;;  %v575_v37 = vpop.f32.mrf.mxu1  ;;  %v748_v10 = vmul.f32 %v7753_v50, %v677_v59  ;;  %v780_v14 = vmul.f32 %v7753_v50, %v709_v60 }
 0x114   :  { %814 = vadd.xlane.f32.xlu0 %v744_v31  ;;  %v678_v3 = vmax.f32 %v456_v53, 0.0  ;;  %v7803_v4 = vadd.f32 %v7745_v40, %v447_v36  ;;  %v710_v12 = vmax.f32 %v584_v63, 0.0  ;;  %v7810_v13 = vadd.f32 %v7745_v40, %v575_v37 }
 0x115   :  { %816 = vadd.xlane.f32.xlu1 %v745_v30  ;;  %v7262_v41 = vpop.f32.mrf.mxu0  ;;  %v7778_v42 = vpop.f32.mrf.mxu1  ;;  %v7815_v18 = vmul.f32 %v7753_v50, %v675_v2  ;;  %v7822_v24 = vmul.f32 %v7753_v50, %v707_v5 }
 0x116   :  { %v676_v22 = vmax.f32 %v7803_v4, 0.0  ;;  %v749_v23 = vmul.f32 %v7753_v50, %v678_v3  ;;  %v7827_v32 = vadd.f32 %v7262_v41, %v7745_v40  ;;  %v781_v33 = vmul.f32 %v7753_v50, %v710_v12 }
 0x117   :  { %v7784_v49 = vpop.f32.mrf.mxu0  ;;  %v7786_v51 = vpop.f32.mrf.mxu1  ;;  %v708_v45 = vmax.f32 %v7810_v13, 0.0  ;;  %v7841_v41 = vadd.f32 %v7778_v42, %v7745_v40 }
 0x118   :  { %878 = vadd.xlane.f32.xlu0 %v776_v39  ;;  %v681_v59 = vmax.f32 %v7827_v32, 0.0  ;;  %v7856_v42 = vadd.f32 %v7745_v40, %v7784_v49 }
 0x119   :  { %880 = vadd.xlane.f32.xlu1 %v777_v38  ;;  %v7791_v55 = vpop.f32.mrf.mxu0  ;;  %v7793_v56 = vpop.f32.mrf.mxu1 }
 0x11a   :  { %v472_v49 = vadd.f32 %v7791_v55, %v7745_v40 }
 0x11b   :  { %v7798_v0 = vpop.f32.mrf.mxu0  ;;  %v7800_v1 = vpop.f32.mrf.mxu1 }
 0x11c   :  { %810 = vadd.xlane.f32.xlu0 %v742_v62 }
 0x11d   :  { %812 = vadd.xlane.f32.xlu1 %v743_v61  ;;  %v7266_v6 = vpop.f32.mrf.mxu0  ;;  %v7298_v7 = vpop.f32.mrf.mxu1 }
 0x11e   :  { %v485_v11 = vadd.f32 %v7266_v6, %v7745_v40  ;;  %v613_v16 = vadd.f32 %v7298_v7, %v7745_v40  ;;  %v747_v6 = vmul.f32 %v7753_v50, %v676_v22 }
 0x11f   :  { %v476_v15 = vpop.f32.mrf.mxu0  ;;  %v604_v17 = vpop.f32.mrf.mxu1 }
 0x120   :  { %v685_v19 = vmax.f32 %v485_v11, 0.0  ;;  %v477_v20 = vadd.f32 %v7745_v40, %v476_v15  ;;  %v605_v21 = vadd.f32 %v7745_v40, %v604_v17  ;;  %874 = vadd.xlane.f32.xlu0 %v774_v9  ;;  %v717_v26 = vmax.f32 %v613_v16, 0.0 }
 0x121   :  { %876 = vadd.xlane.f32.xlu1 %v775_v8  ;;  %v7267_v25 = vpop.f32.mrf.mxu0  ;;  %v7299_v27 = vpop.f32.mrf.mxu1  ;;  %v713_v16 = vmax.f32 %v7841_v41, 0.0 }
 0x122   :  { %v683_v28 = vmax.f32 %v477_v20, 0.0  ;;  %v488_v29 = vadd.f32 %v7267_v25, %v7745_v40  ;;  %v715_v30 = vmax.f32 %v605_v21, 0.0  ;;  %v616_v31 = vadd.f32 %v7299_v27, %v7745_v40 }
 0x123   :  { %v479_v34 = vpop.f32.mrf.mxu0  ;;  %v607_v35 = vpop.f32.mrf.mxu1  ;;  %v7831_v36 = vmul.f32 %v7753_v50, %v685_v19  ;;  %v7834_v37 = vmul.f32 %v7753_v50, %v717_v26  ;;  %v682_v26 = vmax.f32 %v472_v49, 0.0  ;;  %v784_v49 = vmul.f32 %v7753_v50, %v713_v16 }
 0x124   :  { %v686_v38 = vmax.f32 %v488_v29, 0.0  ;;  %v480_v39 = vadd.f32 %v7745_v40, %v479_v34  ;;  %v718_v43 = vmax.f32 %v616_v31, 0.0  ;;  %v608_v44 = vadd.f32 %v7745_v40, %v607_v35  ;;  %822 = vadd.xlane.f32.xlu0 %v748_v10 }
 0x125   :  { %824 = vadd.xlane.f32.xlu1 %v749_v23  ;;  %v7270_v46 = vpop.f32.mrf.mxu0  ;;  %v7302_v47 = vpop.f32.mrf.mxu1  ;;  %v7844_v48 = vmul.f32 %v7753_v50, %v683_v28  ;;  %v7847_v52 = vmul.f32 %v7753_v50, %v715_v30  ;;  %v752_v35 = vmul.f32 %v7753_v50, %v681_v59 }
 0x126   :  { %v684_v53 = vmax.f32 %v480_v39, 0.0  ;;  %v716_v54 = vmax.f32 %v608_v44, 0.0  ;;  %v7850_v57 = vmul.f32 %v7753_v50, %v686_v38  ;;  %v501_v58 = vadd.f32 %v7270_v46, %v7745_v40 }
 0x127   :  { %v7859_v60 = vmul.f32 %v7753_v50, %v718_v43  ;;  %v492_v61 = vpop.f32.mrf.mxu0  ;;  %v629_v62 = vadd.f32 %v7302_v47, %v7745_v40  ;;  %v620_v63 = vpop.f32.mrf.mxu1 }
 0x128   :  { %v689_v2 = vmax.f32 %v501_v58, 0.0  ;;  %v493_v3 = vadd.f32 %v7745_v40, %v492_v61  ;;  %v7864_v4 = vmul.f32 %v7753_v50, %v684_v53  ;;  %v621_v5 = vadd.f32 %v7745_v40, %v620_v63  ;;  %886 = vadd.xlane.f32.xlu0 %v780_v14 }
 0x129   :  { %888 = vadd.xlane.f32.xlu1 %v781_v33  ;;  %v7271_v7 = vpop.f32.mrf.mxu0  ;;  %v721_v8 = vmax.f32 %v629_v62, 0.0  ;;  %v7303_v9 = vpop.f32.mrf.mxu1  ;;  %v7871_v10 = vmul.f32 %v7753_v50, %v716_v54  ;;  %v7878_v14 = vadd.f32 %v7745_v40, %v7786_v51  ;;  %v600_v51 = vadd.f32 %v7793_v56, %v7745_v40 }
 0x12a   :  { %v687_v11 = vmax.f32 %v493_v3, 0.0  ;;  %v504_v12 = vadd.f32 %v7271_v7, %v7745_v40  ;;  %v719_v13 = vmax.f32 %v621_v5, 0.0  ;;  %v632_v15 = vadd.f32 %v7303_v9, %v7745_v40 }
 0x12b   :  { %v495_v55 = vpop.f32.mrf.mxu0  ;;  %v623_v17 = vpop.f32.mrf.mxu1  ;;  %v7881_v19 = vmul.f32 %v7753_v50, %v689_v2  ;;  %v7884_v20 = vmul.f32 %v7753_v50, %v721_v8  ;;  %v714_v53 = vmax.f32 %v600_v51, 0.0  ;;  %v464_v5 = vadd.f32 %v7745_v40, %v7798_v0 }
 0x12c   :  { %v690_v21 = vmax.f32 %v504_v12, 0.0  ;;  %v496_v22 = vadd.f32 %v7745_v40, %v495_v55  ;;  %v722_v23 = vmax.f32 %v632_v15, 0.0  ;;  %v624_v25 = vadd.f32 %v7745_v40, %v623_v17  ;;  %818 = vadd.xlane.f32.xlu0 %v7815_v18 }
 0x12d   :  { %820 = vadd.xlane.f32.xlu1 %v747_v6  ;;  %v7274_v27 = vpop.f32.mrf.mxu0  ;;  %v7306_v28 = vpop.f32.mrf.mxu1  ;;  %v7892_v29 = vmul.f32 %v7753_v50, %v687_v11  ;;  %v7895_v30 = vmul.f32 %v7753_v50, %v719_v13  ;;  %v779_v18 = vmul.f32 %v7753_v50, %v708_v45  ;;  %v753_v45 = vmul.f32 %v7753_v50, %v682_v26 }
 0x12e   :  { %v688_v31 = vmax.f32 %v496_v22, 0.0  ;;  %v720_v32 = vmax.f32 %v624_v25, 0.0  ;;  %v7898_v33 = vmul.f32 %v7753_v50, %v690_v21  ;;  %v517_v34 = vadd.f32 %v7274_v27, %v7745_v40 }
 0x12f   :  { %v7904_v56 = vmul.f32 %v7753_v50, %v722_v23  ;;  %v508_v38 = vpop.f32.mrf.mxu0  ;;  %v645_v39 = vadd.f32 %v7306_v28, %v7745_v40  ;;  %v636_v43 = vpop.f32.mrf.mxu1  ;;  %v679_v15 = vmax.f32 %v7856_v42, 0.0  ;;  %v785_v0 = vmul.f32 %v7753_v50, %v714_v53 }
 0x130   :  { %v693_v44 = vmax.f32 %v517_v34, 0.0  ;;  %v509_v41 = vadd.f32 %v7745_v40, %v508_v38  ;;  %v7909_v46 = vmul.f32 %v7753_v50, %v688_v31  ;;  %v637_v47 = vadd.f32 %v7745_v40, %v636_v43  ;;  %882 = vadd.xlane.f32.xlu0 %v7822_v24 }
 0x131   :  { %884 = vadd.xlane.f32.xlu1 %v779_v18  ;;  %v7275_v54 = vpop.f32.mrf.mxu0  ;;  %v725_v58 = vmax.f32 %v645_v39, 0.0  ;;  %v7307_v59 = vpop.f32.mrf.mxu1  ;;  %v7915_v61 = vmul.f32 %v7753_v50, %v720_v32  ;;  %v680_v42 = vmax.f32 %v464_v5, 0.0  ;;  %v592_v51 = vadd.f32 %v7745_v40, %v7800_v1 }
 0x132   :  { %v691_v62 = vmax.f32 %v509_v41, 0.0  ;;  %v520_v63 = vadd.f32 %v7275_v54, %v7745_v40  ;;  %v723_v2 = vmax.f32 %v637_v47, 0.0  ;;  %v648_v3 = vadd.f32 %v7307_v59, %v7745_v40 }
 0x133   :  { %v511_v24 = vpop.f32.mrf.mxu0  ;;  %v639_v6 = vpop.f32.mrf.mxu1  ;;  %v7923_v7 = vmul.f32 %v7753_v50, %v693_v44  ;;  %v7926_v8 = vmul.f32 %v7753_v50, %v725_v58  ;;  %v711_v39 = vmax.f32 %v7878_v14, 0.0  ;;  %v750_v1 = vmul.f32 %v7753_v50, %v679_v15 }
 0x134   :  { %v694_v9 = vmax.f32 %v520_v63, 0.0  ;;  %v512_v11 = vadd.f32 %v7745_v40, %v511_v24  ;;  %v726_v12 = vmax.f32 %v648_v3, 0.0  ;;  %v640_v13 = vadd.f32 %v7745_v40, %v639_v6  ;;  %830 = vadd.xlane.f32.xlu0 %v752_v35 }
 0x135   :  { %832 = vadd.xlane.f32.xlu1 %v753_v45  ;;  %v7278_v16 = vpop.f32.mrf.mxu0  ;;  %v7310_v55 = vpop.f32.mrf.mxu1  ;;  %v7933_v17 = vmul.f32 %v7753_v50, %v691_v62  ;;  %v7936_v21 = vmul.f32 %v7753_v50, %v723_v2  ;;  %v712_v59 = vmax.f32 %v592_v51, 0.0  ;;  %v751_v62 = vmul.f32 %v7753_v50, %v680_v42 }
 0x136   :  { %v692_v22 = vmax.f32 %v512_v11, 0.0  ;;  %v724_v23 = vmax.f32 %v640_v13, 0.0  ;;  %v7939_v25 = vmul.f32 %v7753_v50, %v694_v9  ;;  %v533_v26 = vadd.f32 %v7278_v16, %v7745_v40 }
 0x137   :  { %v7945_v27 = vmul.f32 %v7753_v50, %v726_v12  ;;  %v524_v28 = vpop.f32.mrf.mxu0  ;;  %v661_v31 = vadd.f32 %v7310_v55, %v7745_v40  ;;  %v652_v32 = vpop.f32.mrf.mxu1  ;;  %v783_v16 = vmul.f32 %v7753_v50, %v712_v59  ;;  %v782_v55 = vmul.f32 %v7753_v50, %v711_v39 }
 0x138   :  { %v697_v34 = vmax.f32 %v533_v26, 0.0  ;;  %v525_v18 = vadd.f32 %v7745_v40, %v524_v28  ;;  %v763_v35 = vmul.f32 %v7753_v50, %v692_v22  ;;  %v653_v38 = vadd.f32 %v7745_v40, %v652_v32  ;;  %894 = vadd.xlane.f32.xlu0 %v784_v49 }
 0x139   :  { %896 = vadd.xlane.f32.xlu1 %v785_v0  ;;  %v7279_v43 = vpop.f32.mrf.mxu0  ;;  %v729_v44 = vmax.f32 %v661_v31, 0.0  ;;  %v7311_v41 = vpop.f32.mrf.mxu1  ;;  %v795_v47 = vmul.f32 %v7753_v50, %v724_v23  ;;  %v7703_v23 = vmov 0  }
 0x13a   :  { %v695_v53 = vmax.f32 %v525_v18, 0.0  ;;  %v536_v45 = vadd.f32 %v7279_v43, %v7745_v40  ;;  %v727_v54 = vmax.f32 %v653_v38, 0.0  ;;  %v664_v58 = vadd.f32 %v7311_v41, %v7745_v40  ;;  %7335 = vset.pattern.permute.xlu1 %v7703_v23  ;;  %7336 = vset.pattern.permute.xlu0 %v7703_v23 }
 0x13b   :  { %v527_v63 = vpop.f32.mrf.mxu0  ;;  %v655_v14 = vpop.f32.mrf.mxu1  ;;  %v768_v2 = vmul.f32 %v7753_v50, %v697_v34  ;;  %v800_v3 = vmul.f32 %v7753_v50, %v729_v44 }
 0x13c   :  { %v698_v5 = vmax.f32 %v536_v45, 0.0  ;;  %v528_v49 = vadd.f32 %v7745_v40, %v527_v63  ;;  %v730_v24 = vmax.f32 %v664_v58, 0.0  ;;  %v656_v6 = vadd.f32 %v7745_v40, %v655_v14  ;;  %826 = vadd.xlane.f32.xlu0 %v750_v1 }
 0x13d   :  { %828 = vadd.xlane.f32.xlu1 %v751_v62  ;;  %v766_v9 = vmul.f32 %v7753_v50, %v695_v53  ;;  %v798_v11 = vmul.f32 %v7753_v50, %v727_v54  ;;  %v9896_v53 = vlaneseq }
 0x13e   :  { %v696_v12 = vmax.f32 %v528_v49, 0.0  ;;  %v728_v13 = vmax.f32 %v656_v6, 0.0  ;;  %v769_v15 = vmul.f32 %v7753_v50, %v698_v5  ;;  %v801_v0 = vmul.f32 %v7753_v50, %v730_v24 }
 0x13f   :  { %v8009_v24 = vshrl.u32 %v9896_v53, 7 }
 0x140   :  { %v767_v22 = vmul.f32 %v7753_v50, %v696_v12  ;;  %v799_v40 = vmul.f32 %v7753_v50, %v728_v13  ;;  %890 = vadd.xlane.f32.xlu0 %v782_v55  ;;  %v7994_v50 = vstv %s9894_s4  ;;  %s7705_s4 = smov [#allocation8]  }
 0x141   :  { %892 = vadd.xlane.f32.xlu1 %v783_v16  ;;  %s7140_s7 = sshll.u32 %s7705_s4, 4  ;;  %s7141_s7 = int_to_ptr.vmem [resolvable:$true] %s7140_s7 }
 0x142   :  { %s7673_s8 = scalar_lea.vmem %s7141_s7, 64  ;;  %p7678_p11 = scmp.lt.s32.totalorder %s7141_s7, %s7141_s7 }
 0x143   :  { %p7674_p10 = scmp.ne.s32.totalorder %s7141_s7, %s7673_s8  ;;  %p7679_p12 = scmp.lt.s32.totalorder %s7673_s8, %s7673_s8 }
 0x144   :  { %838 = vadd.xlane.f32.xlu0 %v7831_v36 }
 0x145   :  { %840 = vadd.xlane.f32.xlu1 %v7850_v57  ;;  %p7680_p13 = por %p7679_p12, %p7678_p11 }
 0x147   :  { %p7681_p0 = pnand %p7680_p13, %p7674_p10 }
 0x148   :  { %902 = vadd.xlane.f32.xlu0 %v7834_v37 }
 0x149   :  { %904 = vadd.xlane.f32.xlu1 %v7859_v60 }
 0x14c   :  { %834 = vadd.xlane.f32.xlu0 %v7844_v48 }
 0x14d   :  { %836 = vadd.xlane.f32.xlu1 %v7864_v4 }
 0x150   :  { %898 = vadd.xlane.f32.xlu0 %v7847_v52 }
 0x151   :  { %900 = vadd.xlane.f32.xlu1 %v7871_v10 }
 0x154   :  { %846 = vadd.xlane.f32.xlu0 %v7881_v19 }
 0x155   :  { %848 = vadd.xlane.f32.xlu1 %v7898_v33 }
 0x158   :  { %910 = vadd.xlane.f32.xlu0 %v7884_v20 }
 0x159   :  { %912 = vadd.xlane.f32.xlu1 %v7904_v56 }
 0x15c   :  { %842 = vadd.xlane.f32.xlu0 %v7892_v29 }
 0x15d   :  { %844 = vadd.xlane.f32.xlu1 %v7909_v46 }
 0x160   :  { %906 = vadd.xlane.f32.xlu0 %v7895_v30 }
 0x161   :  { %908 = vadd.xlane.f32.xlu1 %v7915_v61 }
 0x164   :  { %854 = vadd.xlane.f32.xlu0 %v7923_v7 }
 0x165   :  { %856 = vadd.xlane.f32.xlu1 %v7939_v25 }
 0x168   :  { %918 = vadd.xlane.f32.xlu0 %v7926_v8 }
 0x169   :  { %920 = vadd.xlane.f32.xlu1 %v7945_v27 }
 0x16c   :  { %850 = vadd.xlane.f32.xlu0 %v7933_v17 }
 0x16d   :  { %852 = vadd.xlane.f32.xlu1 %v763_v35 }
 0x170   :  { %914 = vadd.xlane.f32.xlu0 %v7936_v21 }
 0x171   :  { %916 = vadd.xlane.f32.xlu1 %v795_v47 }
 0x174   :  { %862 = vadd.xlane.f32.xlu0 %v768_v2 }
 0x175   :  { %864 = vadd.xlane.f32.xlu1 %v769_v15 }
 0x178   :  { %926 = vadd.xlane.f32.xlu0 %v800_v3 }
 0x179   :  { %928 = vadd.xlane.f32.xlu1 %v801_v0 }
 0x17c   :  { %858 = vadd.xlane.f32.xlu0 %v766_v9 }
 0x17d   :  { %860 = vadd.xlane.f32.xlu1 %v767_v22 }
 0x180   :  { %922 = vadd.xlane.f32.xlu0 %v798_v11 }
 0x181   :  { %924 = vadd.xlane.f32.xlu1 %v799_v40 }
 0x18d   :  { %v871_v36 = vpop.xlane.xlu0 %870 }
 0x18e   :  { %v807_v37 = vpop.xlane.xlu1 %806  ;;  %v966_v48 = vadd.f32 %v7994_v50, %v871_v36  ;;  %v8014_v36 = vsub.s32 0, %v8009_v24 }
 0x18f   :  { %v934_v52 = vadd.f32 %v7994_v50, %v807_v37 }
 0x190   :  { %v1030_v57 = vsub.f32 0.0, %v966_v48 }
 0x191   :  { %v998_v60 = vsub.f32 0.0, %v934_v52  ;;  %v803_v10 = vpop.xlane.xlu0 %802 }
 0x192   :  { %v809_v4 = vpop.xlane.xlu1 %808  ;;  %v1128_v19 = vmul.f32 1.442695, %v1030_v57  ;;  %v932_v30 = vadd.f32 %v7994_v50, %v803_v10 }
 0x193   :  { %v1064_v20 = vmul.f32 1.442695, %v998_v60  ;;  %v935_v29 = vadd.f32 %v7994_v50, %v809_v4  ;;  %v8017_v60 = vsub.s32 1, %v8009_v24  ;;  %v7704_v4 = vmov 1966171168  }
 0x194   :  { %7377 = vpow2.f32 %v1128_v19  ;;  %v996_v56 = vsub.f32 0.0, %v932_v30  ;;  %v3433_v10 = vunpack.c.l.s4 %v7704_v4 }
 0x195   :  { %v999_v33 = vsub.f32 0.0, %v935_v29  ;;  %7379 = vpow2.f32 %v1064_v20  ;;  %v867_v61 = vpop.xlane.xlu0 %866 }
 0x196   :  { %v873_v46 = vpop.xlane.xlu1 %872  ;;  %v1060_v8 = vmul.f32 1.442695, %v996_v56  ;;  %v964_v21 = vadd.f32 %v7994_v50, %v867_v61 }
 0x197   :  { %v1066_v7 = vmul.f32 1.442695, %v999_v33  ;;  %v967_v17 = vadd.f32 %v7994_v50, %v873_v46 }
 0x198   :  { %v1028_v26 = vsub.f32 0.0, %v964_v21 }
 0x199   :  { %7381 = vpow2.f32 %v1066_v7  ;;  %v1031_v25 = vsub.f32 0.0, %v967_v17  ;;  %v805_v51 = vpop.xlane.xlu0 %804  ;;  %v8022_v7 = vsub.s32 2, %v8009_v24 }
 0x19a   :  { %7383 = vpow2.f32 %v1060_v8  ;;  %v869_v42 = vpop.xlane.xlu1 %868  ;;  %v1124_v28 = vmul.f32 1.442695, %v1028_v26  ;;  %v933_v32 = vadd.f32 %v7994_v50, %v805_v51  ;;  %v8025_v8 = vsub.s32 3, %v8009_v24 }
 0x19b   :  { %v1130_v27 = vmul.f32 1.442695, %v1031_v25  ;;  %v965_v31 = vadd.f32 %v7994_v50, %v869_v42  ;;  %v8028_v42 = vsub.s32 4, %v8009_v24  ;;  %v3434_v51 = vunpack.c.0.s8 %v3433_v10 }
 0x19c   :  { %v997_v18 = vsub.f32 0.0, %v933_v32 }
 0x19d   :  { %7385 = vpow2.f32 %v1130_v27  ;;  %v1029_v34 = vsub.f32 0.0, %v965_v31  ;;  %v815_v38 = vpop.xlane.xlu0 %814 }
 0x19e   :  { %7387 = vpow2.f32 %v1124_v28  ;;  %v817_v35 = vpop.xlane.xlu1 %816  ;;  %v1062_v1 = vmul.f32 1.442695, %v997_v18  ;;  %v938_v44 = vadd.f32 %v7994_v50, %v815_v38 }
 0x19f   :  { %v1126_v39 = vmul.f32 1.442695, %v1029_v34  ;;  %v939_v43 = vadd.f32 %v7994_v50, %v817_v35 }
 0x1a0   :  { %v1002_v47 = vsub.f32 0.0, %v938_v44 }
 0x1a1   :  { %7389 = vpow2.f32 %v1126_v39  ;;  %v1003_v41 = vsub.f32 0.0, %v939_v43  ;;  %v7378_v45 = vpop.eup %7377  ;;  %v879_v58 = vpop.xlane.xlu0 %878  ;;  %v8033_v39 = vsub.s32 5, %v8009_v24 }
 0x1a2   :  { %7391 = vpow2.f32 %v1062_v1  ;;  %v881_v54 = vpop.xlane.xlu1 %880  ;;  %v7380_v59 = vpop.eup %7379  ;;  %v1222_v62 = vadd.f32 1.0, %v7378_v45  ;;  %v1072_v3 = vmul.f32 1.442695, %v1002_v47  ;;  %v970_v5 = vadd.f32 %v7994_v50, %v879_v58 }
 0x1a3   :  { %v1074_v63 = vmul.f32 1.442695, %v1003_v41  ;;  %v971_v14 = vadd.f32 %v7994_v50, %v881_v54  ;;  %v1190_v2 = vadd.f32 1.0, %v7380_v59  ;;  %v8036_v1 = vsub.s32 6, %v8009_v24 }
 0x1a4   :  { %7393 = vrcp.f32 %v1222_v62  ;;  %v1034_v9 = vsub.f32 0.0, %v970_v5  ;;  %v8041_v45 = vsub.s32 7, %v8009_v24  ;;  %v8044_v54 = vsub.s32 %v3434_v51, %v8009_v24 }
 0x1a5   :  { %v1035_v49 = vsub.f32 0.0, %v971_v14  ;;  %7395 = vrcp.f32 %v1190_v2  ;;  %v811_v12 = vpop.xlane.xlu0 %810 }
 0x1a6   :  { %v7382_v6 = vpop.eup %7381  ;;  %v813_v11 = vpop.xlane.xlu1 %812  ;;  %7397 = vpow2.f32 %v1074_v63  ;;  %v1136_v22 = vmul.f32 1.442695, %v1034_v9  ;;  %v936_v40 = vadd.f32 %v7994_v50, %v811_v12  ;;  %9899 = vst [vmem:[#allocation12_spill] sm:$0xff] %v8044_v54 }
 0x1a7   :  { %v7384_v13 = vpop.eup %7383  ;;  %v1191_v15 = vadd.f32 1.0, %v7382_v6  ;;  %v1138_v0 = vmul.f32 1.442695, %v1035_v49  ;;  %v937_v16 = vadd.f32 %v7994_v50, %v813_v11  ;;  %7399 = vpow2.f32 %v1072_v3 }
 0x1a8   :  { %v1188_v55 = vadd.f32 1.0, %v7384_v13  ;;  %v1000_v48 = vsub.f32 0.0, %v936_v40 }
 0x1a9   :  { %7401 = vrcp.f32 %v1191_v15  ;;  %v1001_v23 = vsub.f32 0.0, %v937_v16  ;;  %v875_v57 = vpop.xlane.xlu0 %874 }
 0x1aa   :  { %v7386_v37 = vpop.eup %7385  ;;  %7403 = vrcp.f32 %v1188_v55  ;;  %v877_v52 = vpop.xlane.xlu1 %876  ;;  %v1068_v56 = vmul.f32 1.442695, %v1000_v48  ;;  %v968_v46 = vadd.f32 %v7994_v50, %v875_v57 }
 0x1ab   :  { %v7388_v19 = vpop.eup %7387  ;;  %v1223_v20 = vadd.f32 1.0, %v7386_v37  ;;  %7405 = vpow2.f32 %v1138_v0  ;;  %v1070_v29 = vmul.f32 1.442695, %v1001_v23  ;;  %v969_v30 = vadd.f32 %v7994_v50, %v877_v52 }
 0x1ac   :  { %v1220_v33 = vadd.f32 1.0, %v7388_v19  ;;  %7407 = vpow2.f32 %v1136_v22  ;;  %v1032_v21 = vsub.f32 0.0, %v968_v46 }
 0x1ad   :  { %7409 = vrcp.f32 %v1223_v20  ;;  %v1033_v61 = vsub.f32 0.0, %v969_v30  ;;  %v823_v26 = vpop.xlane.xlu0 %822 }
 0x1ae   :  { %v7390_v17 = vpop.eup %7389  ;;  %7411 = vrcp.f32 %v1220_v33  ;;  %v825_v25 = vpop.xlane.xlu1 %824  ;;  %v1132_v18 = vmul.f32 1.442695, %v1032_v21  ;;  %v942_v35 = vadd.f32 %v7994_v50, %v823_v26 }
 0x1af   :  { %v7392_v27 = vpop.eup %7391  ;;  %v1221_v28 = vadd.f32 1.0, %v7390_v17  ;;  %7413 = vpow2.f32 %v1070_v29  ;;  %v1134_v31 = vmul.f32 1.442695, %v1033_v61  ;;  %v943_v32 = vadd.f32 %v7994_v50, %v825_v25 }
 0x1b0   :  { %v1189_v34 = vadd.f32 1.0, %v7392_v27  ;;  %7415 = vpow2.f32 %v1068_v56  ;;  %v1006_v44 = vsub.f32 0.0, %v942_v35 }
 0x1b1   :  { %7417 = vrcp.f32 %v1221_v28  ;;  %v1007_v38 = vsub.f32 0.0, %v943_v32  ;;  %v8038_v43 = vpop.eup %7393  ;;  %v887_v47 = vpop.xlane.xlu0 %886 }
 0x1b2   :  { %7419 = vrcp.f32 %v1189_v34  ;;  %v889_v41 = vpop.xlane.xlu1 %888  ;;  %v8046_v58 = vpop.eup %7395  ;;  %v974_v63 = vadd.f32 %v7994_v50, %v887_v47  ;;  %v1080_v2 = vmul.f32 1.442695, %v1006_v44 }
 0x1b3   :  { %7421 = vpow2.f32 %v1134_v31  ;;  %v1082_v59 = vmul.f32 1.442695, %v1007_v38  ;;  %v975_v62 = vadd.f32 %v7994_v50, %v889_v41  ;;  %v7398_v14 = vpop.eup %7397  ;;  %v1447_v3 = vrot.slane %v8046_v58, %v8014_v36 }
 0x1b4   :  { %7423 = vpow2.f32 %v1132_v18  ;;  %v1451_v5 = vrot.slane %v8046_v58, %v8017_v60  ;;  %v7400_v49 = vpop.eup %7399  ;;  %v1195_v6 = vadd.f32 1.0, %v7398_v14  ;;  %v1038_v11 = vsub.f32 0.0, %v974_v63 }
 0x1b5   :  { %7425 = vpow2.f32 %v1082_v59  ;;  %v1039_v9 = vsub.f32 0.0, %v975_v62  ;;  %v1194_v13 = vadd.f32 1.0, %v7400_v49  ;;  %v819_v0 = vpop.xlane.xlu0 %818  ;;  %v1455_v16 = vrot.slane %v8046_v58, %v8022_v7 }
 0x1b6   :  { %v8054_v12 = vpop.eup %7401  ;;  %7427 = vpow2.f32 %v1080_v2  ;;  %v821_v15 = vpop.xlane.xlu1 %820  ;;  %v1459_v55 = vrot.slane %v8046_v58, %v8025_v8  ;;  %v1144_v23 = vmul.f32 1.442695, %v1038_v11  ;;  %v940_v52 = vadd.f32 %v7994_v50, %v819_v0 }
 0x1b7   :  { %v8060_v22 = vpop.eup %7403  ;;  %7429 = vrcp.f32 %v1195_v6  ;;  %v1146_v40 = vmul.f32 1.442695, %v1039_v9  ;;  %v941_v37 = vadd.f32 %v7994_v50, %v821_v15  ;;  %v1463_v57 = vrot.slane %v8046_v58, %v8028_v42 }
 0x1b8   :  { %v7406_v48 = vpop.eup %7405  ;;  %7431 = vrcp.f32 %v1194_v13  ;;  %v1467_v4 = vrot.slane %v8046_v58, %v8033_v39  ;;  %v1471_v29 = vrot.slane %v8046_v58, %v8036_v1  ;;  %v1004_v56 = vsub.f32 0.0, %v940_v52 }
 0x1b9   :  { %v7408_v10 = vpop.eup %7407  ;;  %v1227_v19 = vadd.f32 1.0, %v7406_v48  ;;  %7433 = vpow2.f32 %v1146_v40  ;;  %v1005_v20 = vsub.f32 0.0, %v941_v37  ;;  %v883_v61 = vpop.xlane.xlu0 %882  ;;  %v1475_v17 = vrot.slane %v8046_v58, %v8041_v45 }
 0x1ba   :  { %v8070_v30 = vpop.eup %7409  ;;  %v1226_v33 = vadd.f32 1.0, %v7408_v10  ;;  %7435 = vpow2.f32 %v1144_v23  ;;  %v885_v46 = vpop.xlane.xlu1 %884  ;;  %v972_v51 = vadd.f32 %v7994_v50, %v883_v61  ;;  %v1076_v28 = vmul.f32 1.442695, %v1004_v56 }
 0x1bb   :  { %v8074_v21 = vpop.eup %7411  ;;  %7437 = vrcp.f32 %v1227_v19  ;;  %v1078_v25 = vmul.f32 1.442695, %v1005_v20  ;;  %v973_v26 = vadd.f32 %v7994_v50, %v885_v46  ;;  %v3526_v31 = vcombine.low %v1447_v3, %v1451_v5 }
 0x1bc   :  { %v7414_v27 = vpop.eup %7413  ;;  %7439 = vrcp.f32 %v1226_v33  ;;  %v3527_v32 = vcombine.low %v1455_v16, %v1459_v55  ;;  %v1036_v38 = vsub.f32 0.0, %v972_v51  ;;  %v3528_v59 = vcombine.low %v1463_v57, %v1467_v4 }
 0x1bd   :  { %v7416_v34 = vpop.eup %7415  ;;  %v1193_v18 = vadd.f32 1.0, %v7414_v27  ;;  %7441 = vpow2.f32 %v1078_v25  ;;  %v1037_v35 = vsub.f32 0.0, %v973_v26  ;;  %v831_v58 = vpop.xlane.xlu0 %830  ;;  %v3529_v62 = vcombine.low %v1471_v29, %v1475_v17 }
 0x1be   :  { %v8078_v44 = vpop.eup %7417  ;;  %v1192_v41 = vadd.f32 1.0, %v7416_v34  ;;  %7443 = vpow2.f32 %v1076_v28  ;;  %v833_v47 = vpop.xlane.xlu1 %832  ;;  %v1140_v2 = vmul.f32 1.442695, %v1036_v38  ;;  %v946_v49 = vadd.f32 %v7994_v50, %v831_v58 }
 0x1bf   :  { %v8080_v63 = vpop.eup %7419  ;;  %7445 = vrcp.f32 %v1193_v18  ;;  %v1142_v14 = vmul.f32 1.442695, %v1037_v35  ;;  %v947_v3 = vadd.f32 %v7994_v50, %v833_v47  ;;  %v3536_v6 = vrot.slane %v3526_v31, %v8044_v54 }
 0x1c0   :  { %v7422_v5 = vpop.eup %7421  ;;  %7447 = vrcp.f32 %v1192_v41  ;;  %v3543_v9 = vrot.slane %v3527_v32, %v8044_v54  ;;  %v3550_v0 = vrot.slane %v3528_v59, %v8044_v54  ;;  %v1010_v40 = vsub.f32 0.0, %v946_v49 }
 0x1c1   :  { %v7424_v11 = vpop.eup %7423  ;;  %v1225_v13 = vadd.f32 1.0, %v7422_v5  ;;  %7449 = vpow2.f32 %v1142_v14  ;;  %v1011_v15 = vsub.f32 0.0, %v947_v3  ;;  %v3557_v23 = vrot.slane %v3529_v62, %v8044_v54  ;;  %v895_v48 = vpop.xlane.xlu0 %894 }
 0x1c2   :  { %v7426_v16 = vpop.eup %7425  ;;  %v1224_v55 = vadd.f32 1.0, %v7424_v11  ;;  %7451 = vpow2.f32 %v1140_v2  ;;  %v897_v37 = vpop.xlane.xlu1 %896  ;;  %v3558_v10 = vcombine.low %v3536_v6, %v3543_v9  ;;  %v1088_v20 = vmul.f32 1.442695, %v1010_v40 }
 0x1c3   :  { %v7428_v52 = vpop.eup %7427  ;;  %7453 = vrcp.f32 %v1225_v13  ;;  %v1199_v57 = vadd.f32 1.0, %v7426_v16  ;;  %v1090_v4 = vmul.f32 1.442695, %v1011_v15  ;;  %v3559_v29 = vcombine.low %v3550_v0, %v3557_v23 }
 0x1c4   :  { %v8088_v19 = vpop.eup %7429  ;;  %7455 = vrcp.f32 %v1224_v55  ;;  %v1198_v56 = vadd.f32 1.0, %v7428_v52  ;;  %v3566_v46 = vrot.slane %v3558_v10, %v8044_v54  ;;  %v979_v61 = vadd.f32 %v7994_v50, %v897_v37 }
 0x1c5   :  { %v8090_v33 = vpop.eup %7431  ;;  %v978_v17 = vadd.f32 %v7994_v50, %v895_v48  ;;  %7457 = vrcp.f32 %v1199_v57  ;;  %v3573_v26 = vrot.slane %v3559_v29, %v8044_v54  ;;  %v2471_v51 = vrot.slane %v8038_v43, %v8014_v36 }
 0x1c6   :  { %v7434_v25 = vpop.eup %7433  ;;  %v2475_v27 = vrot.slane %v8038_v43, %v8017_v60  ;;  %7459 = vpow2.f32 %v1090_v4  ;;  %v1043_v32 = vsub.f32 0.0, %v979_v61  ;;  %v2479_v41 = vrot.slane %v8038_v43, %v8022_v7 }
 0x1c7   :  { %v7436_v28 = vpop.eup %7435  ;;  %v1231_v31 = vadd.f32 1.0, %v7434_v25  ;;  %v1042_v34 = vsub.f32 0.0, %v978_v17  ;;  %7461 = vpow2.f32 %v1088_v20  ;;  %v3574_v38 = vcombine.low %v3566_v46, %v3573_v26  ;;  %v829_v26 = vpop.xlane.xlu1 %828 }
 0x1c8   :  { %v8100_v18 = vpop.eup %7437  ;;  %v1230_v35 = vadd.f32 1.0, %v7436_v28  ;;  %7463 = vrcp.f32 %v1198_v56  ;;  %v1154_v58 = vmul.f32 1.442695, %v1043_v32  ;;  %v2483_v62 = vrot.slane %v8038_v43, %v8025_v8  ;;  %v827_v32 = vpop.xlane.xlu0 %826 }
 0x1c9   :  { %v8104_v47 = vpop.eup %7439  ;;  %v1152_v59 = vmul.f32 1.442695, %v1042_v34  ;;  %7465 = vrcp.f32 %v1231_v31  ;;  %6571 = vperm.xlu1 %7335, %v3574_v38   ;;  %v2487_v2 = vrot.slane %v8038_v43, %v8028_v42  ;;  %v2491_v3 = vrot.slane %v8038_v43, %v8033_v39 }
 0x1ca   :  { %v7442_v14 = vpop.eup %7441  ;;  %v2495_v5 = vrot.slane %v8038_v43, %v8036_v1  ;;  %7467 = vrcp.f32 %v1230_v35  ;;  %v2499_v9 = vrot.slane %v8038_v43, %v8041_v45  ;;  %v5094_v11 = vcombine.low %v2471_v51, %v2475_v27 }
 0x1cb   :  { %v7444_v49 = vpop.eup %7443  ;;  %v1197_v6 = vadd.f32 1.0, %v7442_v14  ;;  %7469 = vpow2.f32 %v1152_v59  ;;  %v5095_v15 = vcombine.low %v2479_v41, %v2483_v62  ;;  %v5096_v0 = vcombine.low %v2487_v2, %v2491_v3 }
 0x1cc   :  { %v8116_v13 = vpop.eup %7445  ;;  %v1196_v55 = vadd.f32 1.0, %v7444_v49  ;;  %7471 = vpow2.f32 %v1154_v58  ;;  %v5097_v40 = vcombine.low %v2495_v5, %v2499_v9  ;;  %v5104_v23 = vrot.slane %v5094_v11, %v8044_v54 }
 0x1cd   :  { %v8118_v16 = vpop.eup %7447  ;;  %v5111_v48 = vrot.slane %v5095_v15, %v8044_v54  ;;  %v5118_v52 = vrot.slane %v5096_v0, %v8044_v54  ;;  %v1383_v43 = vrot.slane %v8060_v22, %v8014_v36  ;;  %v1387_v57 = vrot.slane %v8060_v22, %v8017_v60 }
 0x1ce   :  { %v7450_v37 = vpop.eup %7449  ;;  %7473 = vrcp.f32 %v1197_v6  ;;  %v5125_v10 = vrot.slane %v5097_v40, %v8044_v54  ;;  %v1391_v20 = vrot.slane %v8060_v22, %v8022_v7  ;;  %v1395_v29 = vrot.slane %v8060_v22, %v8025_v8 }
 0x1cf   :  { %v7452_v4 = vpop.eup %7451  ;;  %v1229_v46 = vadd.f32 1.0, %v7450_v37  ;;  %v5126_v61 = vcombine.low %v5104_v23, %v5111_v48  ;;  %v1399_v17 = vrot.slane %v8060_v22, %v8028_v42  ;;  %v1403_v25 = vrot.slane %v8060_v22, %v8033_v39 }
 0x1d0   :  { %v8132_v56 = vpop.eup %7453  ;;  %7475 = vrcp.f32 %v1196_v55  ;;  %v5127_v27 = vcombine.low %v5118_v52, %v5125_v10  ;;  %v1407_v28 = vrot.slane %v8060_v22, %v8036_v1  ;;  %v1411_v31 = vrot.slane %v8060_v22, %v8041_v45 }
 0x1d1   :  { %v8138_v51 = vpop.eup %7455  ;;  %v1228_v34 = vadd.f32 1.0, %v7452_v4  ;;  %v5134_v35 = vrot.slane %v5126_v61, %v8044_v54  ;;  %v3428_v38 = vcombine.low %v1383_v43, %v1387_v57  ;;  %v3429_v41 = vcombine.low %v1391_v20, %v1395_v29 }
 0x1d2   :  { %v8145_v58 = vpop.eup %7457  ;;  %v5141_v59 = vrot.slane %v5127_v27, %v8044_v54  ;;  %v3430_v62 = vcombine.low %v1399_v17, %v1403_v25  ;;  %v3431_v14 = vcombine.low %v1407_v28, %v1411_v31  ;;  %v945_v2 = vadd.f32 %v7994_v50, %v829_v26 }
 0x1d3   :  { %v7460_v3 = vpop.eup %7459  ;;  %7477 = vrcp.f32 %v1229_v46  ;;  %v3438_v5 = vrot.slane %v3428_v38, %v8044_v54  ;;  %v3445_v22 = vrot.slane %v3429_v41, %v8044_v54  ;;  %v944_v49 = vadd.f32 %v7994_v50, %v827_v32 }
 0x1d4   :  { %v7462_v6 = vpop.eup %7461  ;;  %v1203_v9 = vadd.f32 1.0, %v7460_v3  ;;  %v5142_v11 = vcombine.low %v5134_v35, %v5141_v59  ;;  %v3452_v15 = vrot.slane %v3430_v62, %v8044_v54  ;;  %v3459_v0 = vrot.slane %v3431_v14, %v8044_v54 }
 0x1d5   :  { %v8154_v55 = vpop.eup %7463  ;;  %7479 = vrcp.f32 %v1228_v34  ;;  %v3460_v40 = vcombine.low %v3438_v5, %v3445_v22  ;;  %v1009_v23 = vsub.f32 0.0, %v945_v2  ;;  %v1008_v37 = vsub.f32 0.0, %v944_v49 }
 0x1d6   :  { %v8156_v48 = vpop.eup %7465  ;;  %v1202_v52 = vadd.f32 1.0, %v7462_v6  ;;  %6667 = vperm.xlu1 %7335, %v5142_v11   ;;  %v3461_v43 = vcombine.low %v3452_v15, %v3459_v0  ;;  %v2503_v57 = vrot.slane %v8070_v30, %v8014_v36  ;;  %v2507_v4 = vrot.slane %v8070_v30, %v8017_v60  ;;  %v893_v15 = vpop.xlane.xlu1 %892 }
 0x1d7   :  { %v8162_v10 = vpop.eup %7467  ;;  %7481 = vrcp.f32 %v1203_v9  ;;  %v3468_v20 = vrot.slane %v3460_v40, %v8044_v54  ;;  %v1086_v29 = vmul.f32 1.442695, %v1009_v23  ;;  %v2511_v46 = vrot.slane %v8070_v30, %v8022_v7  ;;  %v891_v0 = vpop.xlane.xlu0 %890 }
 0x1d8   :  { %v7470_v61 = vpop.eup %7469  ;;  %v3475_v17 = vrot.slane %v3461_v43, %v8044_v54  ;;  %v1084_v25 = vmul.f32 1.442695, %v1008_v37  ;;  %v2515_v26 = vrot.slane %v8070_v30, %v8025_v8  ;;  %v2519_v27 = vrot.slane %v8070_v30, %v8028_v42 }
 0x1d9   :  { %v8172_v28 = vpop.eup %7471  ;;  %v1234_v31 = vadd.f32 1.0, %v7470_v61  ;;  %7483 = vpow2.f32 %v1086_v29  ;;  %v2523_v32 = vrot.slane %v8070_v30, %v8033_v39  ;;  %v2527_v34 = vrot.slane %v8070_v30, %v8036_v1 }
 0x1da   :  { %7485 = vrcp.f32 %v1202_v52  ;;  %v3476_v35 = vcombine.low %v3468_v20, %v3475_v17  ;;  %v2531_v38 = vrot.slane %v8070_v30, %v8041_v45  ;;  %v5143_v41 = vcombine.low %v2503_v57, %v2507_v4 }
 0x1db   :  { %v8180_v59 = vpop.eup %7473  ;;  %7487 = vrcp.f32 %v1234_v31  ;;  %v5144_v62 = vcombine.low %v2511_v46, %v2515_v26  ;;  %v5145_v14 = vcombine.low %v2519_v27, %v2523_v32  ;;  %v2407_v2 = vrot.slane %v8074_v21, %v8014_v36 }
 0x1dc   :  { %6565 = vperm.xlu0 %7336, %v3476_v35   ;;  %7489 = vpow2.f32 %v1084_v25  ;;  %v5146_v3 = vcombine.low %v2527_v34, %v2531_v38  ;;  %v5153_v5 = vrot.slane %v5143_v41, %v8044_v54  ;;  %v2411_v22 = vrot.slane %v8074_v21, %v8017_v60 }
 0x1dd   :  { %v8187_v49 = vpop.eup %7475  ;;  %v5160_v30 = vrot.slane %v5144_v62, %v8044_v54  ;;  %v5167_v6 = vrot.slane %v5145_v14, %v8044_v54  ;;  %v2415_v9 = vrot.slane %v8074_v21, %v8022_v7  ;;  %v2419_v11 = vrot.slane %v8074_v21, %v8025_v8 }
 0x1de   :  { %v5174_v40 = vrot.slane %v5146_v3, %v8044_v54  ;;  %v2423_v23 = vrot.slane %v8074_v21, %v8028_v42  ;;  %v2427_v37 = vrot.slane %v8074_v21, %v8033_v39  ;;  %v2431_v52 = vrot.slane %v8074_v21, %v8036_v1 }
 0x1df   :  { %v5175_v43 = vcombine.low %v5153_v5, %v5160_v30  ;;  %v2435_v57 = vrot.slane %v8074_v21, %v8041_v45  ;;  %v4996_v4 = vcombine.low %v2407_v2, %v2411_v22  ;;  %v4997_v20 = vcombine.low %v2415_v9, %v2419_v11 }
 0x1e0   :  { %v8204_v29 = vpop.eup %7477  ;;  %v5176_v46 = vcombine.low %v5167_v6, %v5174_v40  ;;  %v4998_v61 = vcombine.low %v2423_v23, %v2427_v37  ;;  %v977_v17 = vadd.f32 %v7994_v50, %v893_v15  ;;  %v976_v25 = vadd.f32 %v7994_v50, %v891_v0 }
 0x1e1   :  { %v5183_v26 = vrot.slane %v5175_v43, %v8044_v54  ;;  %v4999_v27 = vcombine.low %v2431_v52, %v2435_v57  ;;  %v5006_v31 = vrot.slane %v4996_v4, %v8044_v54  ;;  %v5013_v32 = vrot.slane %v4997_v20, %v8044_v54 }
 0x1e2   :  { %v8211_v34 = vpop.eup %7479  ;;  %v5190_v21 = vrot.slane %v5176_v46, %v8044_v54  ;;  %v5020_v35 = vrot.slane %v4998_v61, %v8044_v54  ;;  %v1041_v38 = vsub.f32 0.0, %v977_v17  ;;  %v1040_v41 = vsub.f32 0.0, %v976_v25 }
 0x1e3   :  { %v5027_v62 = vrot.slane %v4999_v27, %v8044_v54  ;;  %v5028_v14 = vcombine.low %v5006_v31, %v5013_v32  ;;  %v2439_v2 = vrot.slane %v8078_v44, %v8014_v36  ;;  %v2443_v3 = vrot.slane %v8078_v44, %v8017_v60 }
 0x1e4   :  { %v8220_v5 = vpop.eup %7481  ;;  %v5191_v22 = vcombine.low %v5183_v26, %v5190_v21  ;;  %v1150_v30 = vmul.f32 1.442695, %v1041_v38  ;;  %v1148_v6 = vmul.f32 1.442695, %v1040_v41  ;;  %v2447_v9 = vrot.slane %v8078_v44, %v8022_v7 }
 0x1e5   :  { %v5029_v11 = vcombine.low %v5020_v35, %v5027_v62  ;;  %v5036_v15 = vrot.slane %v5028_v14, %v8044_v54  ;;  %v2451_v0 = vrot.slane %v8078_v44, %v8025_v8  ;;  %v2455_v40 = vrot.slane %v8078_v44, %v8028_v42 }
 0x1e6   :  { %v7484_v23 = vpop.eup %7483  ;;  %6670 = vperm.xlu0 %7336, %v5191_v22   ;;  %7491 = vpow2.f32 %v1150_v30  ;;  %v2459_v37 = vrot.slane %v8078_v44, %v8033_v39  ;;  %v2463_v52 = vrot.slane %v8078_v44, %v8036_v1  ;;  %v2467_v43 = vrot.slane %v8078_v44, %v8041_v45  ;;  %v841_v30 = vpop.xlane.xlu1 %840 }
 0x1e7   :  { %v8235_v57 = vpop.eup %7485  ;;  %v1201_v4 = vadd.f32 1.0, %v7484_v23  ;;  %v5043_v20 = vrot.slane %v5029_v11, %v8044_v54  ;;  %7493 = vpow2.f32 %v1148_v6  ;;  %v5045_v46 = vcombine.low %v2439_v2, %v2443_v3  ;;  %v839_v6 = vpop.xlane.xlu0 %838 }
 0x1e8   :  { %v8238_v61 = vpop.eup %7487  ;;  %v5046_v17 = vcombine.low %v2447_v9, %v2451_v0  ;;  %v5047_v25 = vcombine.low %v2455_v40, %v2459_v37  ;;  %v5048_v26 = vcombine.low %v2463_v52, %v2467_v43  ;;  %v1479_v27 = vrot.slane %v8054_v12, %v8014_v36 }
 0x1e9   :  { %v7490_v31 = vpop.eup %7489  ;;  %7495 = vrcp.f32 %v1201_v4  ;;  %v5044_v32 = vcombine.low %v5036_v15, %v5043_v20  ;;  %v5055_v44 = vrot.slane %v5045_v46, %v8044_v54  ;;  %v1483_v21 = vrot.slane %v8054_v12, %v8017_v60 }
 0x1ea   :  { %v1200_v35 = vadd.f32 1.0, %v7490_v31  ;;  %v5062_v38 = vrot.slane %v5046_v17, %v8044_v54  ;;  %v5069_v41 = vrot.slane %v5047_v25, %v8044_v54  ;;  %v5076_v62 = vrot.slane %v5048_v26, %v8044_v54 }
 0x1eb   :  { %6661 = vperm.xlu1 %7335, %v5044_v32   ;;  %v1487_v14 = vrot.slane %v8054_v12, %v8022_v7  ;;  %v1491_v2 = vrot.slane %v8054_v12, %v8025_v8  ;;  %v1495_v3 = vrot.slane %v8054_v12, %v8028_v42  ;;  %v1499_v22 = vrot.slane %v8054_v12, %v8033_v39 }
 0x1ec   :  { %7497 = vrcp.f32 %v1200_v35  ;;  %v5077_v9 = vcombine.low %v5055_v44, %v5062_v38  ;;  %v5078_v11 = vcombine.low %v5069_v41, %v5076_v62  ;;  %v1503_v15 = vrot.slane %v8054_v12, %v8036_v1 }
 0x1ed   :  { %v1507_v0 = vrot.slane %v8054_v12, %v8041_v45  ;;  %v3575_v40 = vcombine.low %v1479_v27, %v1483_v21  ;;  %v3576_v23 = vcombine.low %v1487_v14, %v1491_v2  ;;  %v3577_v37 = vcombine.low %v1495_v3, %v1499_v22 }
 0x1ee   :  { %v5085_v52 = vrot.slane %v5077_v9, %v8044_v54  ;;  %v5092_v43 = vrot.slane %v5078_v11, %v8044_v54  ;;  %v951_v4 = vadd.f32 %v7994_v50, %v841_v30  ;;  %v950_v20 = vadd.f32 %v7994_v50, %v839_v6 }
 0x1ef   :  { %v3578_v46 = vcombine.low %v1503_v15, %v1507_v0  ;;  %v3585_v17 = vrot.slane %v3575_v40, %v8044_v54  ;;  %v3592_v25 = vrot.slane %v3576_v23, %v8044_v54  ;;  %v3599_v26 = vrot.slane %v3577_v37, %v8044_v54  ;;  %v905_v23 = vpop.xlane.xlu1 %904 }
 0x1f0   :  { %v5093_v31 = vcombine.low %v5085_v52, %v5092_v43  ;;  %v1015_v12 = vsub.f32 0.0, %v951_v4  ;;  %v1014_v27 = vsub.f32 0.0, %v950_v20  ;;  %v1415_v32 = vrot.slane %v8080_v63, %v8014_v36  ;;  %v903_v4 = vpop.xlane.xlu0 %902 }
 0x1f1   :  { %v3606_v44 = vrot.slane %v3578_v46, %v8044_v54  ;;  %v3607_v21 = vcombine.low %v3585_v17, %v3592_v25  ;;  %v1419_v35 = vrot.slane %v8080_v63, %v8017_v60  ;;  %v1423_v38 = vrot.slane %v8080_v63, %v8022_v7 }
 0x1f2   :  { %6664 = vperm.xlu0 %7336, %v5093_v31   ;;  %v1098_v41 = vmul.f32 1.442695, %v1015_v12  ;;  %v1096_v62 = vmul.f32 1.442695, %v1014_v27  ;;  %v1427_v14 = vrot.slane %v8080_v63, %v8025_v8  ;;  %v1431_v2 = vrot.slane %v8080_v63, %v8028_v42 }
 0x1f3   :  { %v7492_v3 = vpop.eup %7491  ;;  %v3608_v22 = vcombine.low %v3599_v26, %v3606_v44  ;;  %v3615_v30 = vrot.slane %v3607_v21, %v8044_v54  ;;  %v1435_v6 = vrot.slane %v8080_v63, %v8033_v39  ;;  %v1439_v9 = vrot.slane %v8080_v63, %v8036_v1 }
 0x1f4   :  { %v7494_v11 = vpop.eup %7493  ;;  %v1233_v15 = vadd.f32 1.0, %v7492_v3  ;;  %7499 = vpow2.f32 %v1098_v41  ;;  %v1443_v0 = vrot.slane %v8080_v63, %v8041_v45  ;;  %v3477_v40 = vcombine.low %v1415_v32, %v1419_v35 }
 0x1f5   :  { %v1232_v37 = vadd.f32 1.0, %v7494_v11  ;;  %v3622_v52 = vrot.slane %v3608_v22, %v8044_v54  ;;  %7501 = vpow2.f32 %v1096_v62  ;;  %v3478_v43 = vcombine.low %v1423_v38, %v1427_v14 }
 0x1f6   :  { %v8286_v20 = vpop.eup %7495  ;;  %7503 = vrcp.f32 %v1233_v15  ;;  %v3479_v46 = vcombine.low %v1431_v2, %v1435_v6  ;;  %v3480_v17 = vcombine.low %v1439_v9, %v1443_v0  ;;  %v3487_v25 = vrot.slane %v3477_v40, %v8044_v54 }
 0x1f7   :  { %7505 = vrcp.f32 %v1232_v37  ;;  %v3623_v26 = vcombine.low %v3615_v30, %v3622_v52  ;;  %v3494_v31 = vrot.slane %v3478_v43, %v8044_v54  ;;  %v983_v63 = vadd.f32 %v7994_v50, %v905_v23 }
 0x1f8   :  { %v3501_v12 = vrot.slane %v3479_v46, %v8044_v54  ;;  %v3508_v27 = vrot.slane %v3480_v17, %v8044_v54  ;;  %v982_v32 = vadd.f32 %v7994_v50, %v903_v4  ;;  %v2631_v44 = vrot.slane %v8100_v18, %v8014_v36 }
 0x1f9   :  { %v8296_v21 = vpop.eup %7497  ;;  %6574 = vperm.xlu1 %7335, %v3623_v26   ;;  %v3509_v35 = vcombine.low %v3487_v25, %v3494_v31  ;;  %v1047_v38 = vsub.f32 0.0, %v983_v63  ;;  %v2635_v41 = vrot.slane %v8100_v18, %v8017_v60  ;;  %v2639_v62 = vrot.slane %v8100_v18, %v8022_v7 }
 0x1fa   :  { %v3510_v14 = vcombine.low %v3501_v12, %v3508_v27  ;;  %v1046_v2 = vsub.f32 0.0, %v982_v32  ;;  %v2643_v3 = vrot.slane %v8100_v18, %v8025_v8  ;;  %v2647_v22 = vrot.slane %v8100_v18, %v8028_v42 }
 0x1fb   :  { %v3517_v30 = vrot.slane %v3509_v35, %v8044_v54  ;;  %v1162_v6 = vmul.f32 1.442695, %v1047_v38  ;;  %v2651_v9 = vrot.slane %v8100_v18, %v8033_v39  ;;  %v2655_v11 = vrot.slane %v8100_v18, %v8036_v1 }
 0x1fc   :  { %v3524_v15 = vrot.slane %v3510_v14, %v8044_v54  ;;  %v1160_v0 = vmul.f32 1.442695, %v1046_v2  ;;  %v2659_v40 = vrot.slane %v8100_v18, %v8041_v45  ;;  %v5339_v23 = vcombine.low %v2631_v44, %v2635_v41 }
 0x1fd   :  { %7507 = vpow2.f32 %v1162_v6  ;;  %v5340_v37 = vcombine.low %v2639_v62, %v2643_v3  ;;  %v5341_v52 = vcombine.low %v2647_v22, %v2651_v9  ;;  %v1575_v43 = vrot.slane %v8090_v33, %v8014_v36  ;;  %v837_v6 = vpop.xlane.xlu1 %836  ;;  %v835_v9 = vpop.xlane.xlu0 %834 }
 0x1fe   :  { %v3525_v4 = vcombine.low %v3517_v30, %v3524_v15  ;;  %7509 = vpow2.f32 %v1160_v0  ;;  %v5342_v46 = vcombine.low %v2655_v11, %v2659_v40  ;;  %v5349_v17 = vrot.slane %v5339_v23, %v8044_v54 }
 0x1ff   :  { %v5356_v25 = vrot.slane %v5340_v37, %v8044_v54  ;;  %v5363_v26 = vrot.slane %v5341_v52, %v8044_v54  ;;  %v1579_v31 = vrot.slane %v8090_v33, %v8017_v60  ;;  %v1583_v18 = vrot.slane %v8090_v33, %v8022_v7 }
 0x200   :  { %6568 = vperm.xlu1 %7335, %v3525_v4   ;;  %v5370_v63 = vrot.slane %v5342_v46, %v8044_v54  ;;  %v1587_v12 = vrot.slane %v8090_v33, %v8025_v8  ;;  %v1591_v27 = vrot.slane %v8090_v33, %v8028_v42  ;;  %v1595_v32 = vrot.slane %v8090_v33, %v8033_v39 }
 0x201   :  { %v7500_v44 = vpop.eup %7499  ;;  %v5371_v35 = vcombine.low %v5349_v17, %v5356_v25  ;;  %v1599_v38 = vrot.slane %v8090_v33, %v8036_v1  ;;  %v1603_v41 = vrot.slane %v8090_v33, %v8041_v45  ;;  %v3722_v62 = vcombine.low %v1575_v43, %v1579_v31 }
 0x202   :  { %v7502_v14 = vpop.eup %7501  ;;  %v1207_v2 = vadd.f32 1.0, %v7500_v44  ;;  %v5372_v3 = vcombine.low %v5363_v26, %v5370_v63  ;;  %v3723_v22 = vcombine.low %v1583_v18, %v1587_v12  ;;  %v3724_v30 = vcombine.low %v1591_v27, %v1595_v32 }
 0x203   :  { %v8334_v11 = vpop.eup %7503  ;;  %v1206_v15 = vadd.f32 1.0, %v7502_v14  ;;  %v5379_v0 = vrot.slane %v5371_v35, %v8044_v54  ;;  %v3725_v40 = vcombine.low %v1599_v38, %v1603_v41  ;;  %v3732_v23 = vrot.slane %v3722_v62, %v8044_v54  ;;  %v901_v62 = vpop.xlane.xlu1 %900 }
 0x204   :  { %v8338_v37 = vpop.eup %7505  ;;  %7511 = vrcp.f32 %v1207_v2  ;;  %v5386_v33 = vrot.slane %v5372_v3, %v8044_v54  ;;  %v3739_v52 = vrot.slane %v3723_v22, %v8044_v54  ;;  %v3746_v43 = vrot.slane %v3724_v30, %v8044_v54 }
 0x205   :  { %7513 = vrcp.f32 %v1206_v15  ;;  %v3753_v4 = vrot.slane %v3725_v40, %v8044_v54  ;;  %v949_v46 = vadd.f32 %v7994_v50, %v837_v6  ;;  %v948_v17 = vadd.f32 %v7994_v50, %v835_v9 }
 0x206   :  { %v5387_v25 = vcombine.low %v5379_v0, %v5386_v33  ;;  %v3754_v26 = vcombine.low %v3732_v23, %v3739_v52  ;;  %v2599_v31 = vrot.slane %v8104_v47, %v8014_v36  ;;  %v2603_v18 = vrot.slane %v8104_v47, %v8017_v60  ;;  %v899_v52 = vpop.xlane.xlu0 %898 }
 0x207   :  { %v3755_v63 = vcombine.low %v3746_v43, %v3753_v4  ;;  %v1013_v12 = vsub.f32 0.0, %v949_v46  ;;  %v1012_v27 = vsub.f32 0.0, %v948_v17  ;;  %v2607_v32 = vrot.slane %v8104_v47, %v8022_v7 }
 0x208   :  { %6682 = vperm.xlu0 %7336, %v5387_v25   ;;  %v3762_v44 = vrot.slane %v3754_v26, %v8044_v54  ;;  %v2611_v35 = vrot.slane %v8104_v47, %v8025_v8  ;;  %v2615_v38 = vrot.slane %v8104_v47, %v8028_v42  ;;  %v2619_v41 = vrot.slane %v8104_v47, %v8033_v39 }
 0x209   :  { %v3769_v14 = vrot.slane %v3755_v63, %v8044_v54  ;;  %v1094_v2 = vmul.f32 1.442695, %v1013_v12  ;;  %v1092_v3 = vmul.f32 1.442695, %v1012_v27  ;;  %v2623_v22 = vrot.slane %v8104_v47, %v8036_v1 }
 0x20a   :  { %v7508_v30 = vpop.eup %7507  ;;  %v2627_v6 = vrot.slane %v8104_v47, %v8041_v45  ;;  %v5290_v9 = vcombine.low %v2599_v31, %v2603_v18  ;;  %v5291_v15 = vcombine.low %v2607_v32, %v2611_v35  ;;  %v5292_v0 = vcombine.low %v2615_v38, %v2619_v41 }
 0x20b   :  { %v7510_v40 = vpop.eup %7509  ;;  %v3770_v23 = vcombine.low %v3762_v44, %v3769_v14  ;;  %7515 = vpow2.f32 %v1094_v2  ;;  %v981_v33 = vadd.f32 %v7994_v50, %v901_v62  ;;  %v1239_v46 = vadd.f32 1.0, %v7508_v30 }
 0x20c   :  { %7517 = vpow2.f32 %v1092_v3  ;;  %v5293_v43 = vcombine.low %v2623_v22, %v2627_v6  ;;  %v5300_v4 = vrot.slane %v5290_v9, %v8044_v54  ;;  %v5307_v17 = vrot.slane %v5291_v15, %v8044_v54 }
 0x20d   :  { %6583 = vperm.xlu1 %7335, %v3770_v23   ;;  %v5314_v25 = vrot.slane %v5292_v0, %v8044_v54  ;;  %v1045_v47 = vsub.f32 0.0, %v981_v33  ;;  %v1238_v26 = vadd.f32 1.0, %v7510_v40  ;;  %v980_v18 = vadd.f32 %v7994_v50, %v899_v52 }
 0x20e   :  { %v5321_v31 = vrot.slane %v5293_v43, %v8044_v54  ;;  %v2567_v63 = vrot.slane %v8132_v56, %v8014_v36  ;;  %v5322_v12 = vcombine.low %v5300_v4, %v5307_v17  ;;  %v2571_v32 = vrot.slane %v8132_v56, %v8017_v60 }
 0x20f   :  { %v1158_v27 = vmul.f32 1.442695, %v1045_v47  ;;  %v2575_v44 = vrot.slane %v8132_v56, %v8022_v7  ;;  %v1044_v38 = vsub.f32 0.0, %v980_v18  ;;  %v2579_v41 = vrot.slane %v8132_v56, %v8025_v8  ;;  %v847_v18 = vpop.xlane.xlu0 %846 }
 0x210   :  { %v5323_v35 = vcombine.low %v5314_v25, %v5321_v31  ;;  %v2583_v62 = vrot.slane %v8132_v56, %v8028_v42  ;;  %v5330_v2 = vrot.slane %v5322_v12, %v8044_v54  ;;  %v2587_v3 = vrot.slane %v8132_v56, %v8033_v39  ;;  %v849_v31 = vpop.xlane.xlu1 %848 }
 0x211   :  { %v8380_v14 = vpop.eup %7511  ;;  %7519 = vpow2.f32 %v1158_v27  ;;  %v2591_v22 = vrot.slane %v8132_v56, %v8036_v1  ;;  %v2595_v9 = vrot.slane %v8132_v56, %v8041_v45  ;;  %v5241_v15 = vcombine.low %v2567_v63, %v2571_v32 }
 0x212   :  { %v8387_v30 = vpop.eup %7513  ;;  %7521 = vrcp.f32 %v1239_v46  ;;  %v5337_v6 = vrot.slane %v5323_v35, %v8044_v54  ;;  %v5242_v0 = vcombine.low %v2575_v44, %v2579_v41  ;;  %v5243_v40 = vcombine.low %v2583_v62, %v2587_v3 }
 0x213   :  { %v1511_v23 = vrot.slane %v8118_v16, %v8014_v36  ;;  %v1515_v33 = vrot.slane %v8118_v16, %v8017_v60  ;;  %v1156_v43 = vmul.f32 1.442695, %v1044_v38  ;;  %v5244_v4 = vcombine.low %v2591_v22, %v2595_v9 }
 0x214   :  { %v5338_v52 = vcombine.low %v5330_v2, %v5337_v6  ;;  %v5251_v17 = vrot.slane %v5241_v15, %v8044_v54  ;;  %v5258_v46 = vrot.slane %v5242_v0, %v8044_v54  ;;  %v5265_v25 = vrot.slane %v5243_v40, %v8044_v54 }
 0x215   :  { %v1519_v56 = vrot.slane %v8118_v16, %v8022_v7  ;;  %v1523_v47 = vrot.slane %v8118_v16, %v8025_v8  ;;  %v5272_v63 = vrot.slane %v5244_v4, %v8044_v54  ;;  %v1527_v12 = vrot.slane %v8118_v16, %v8028_v42 }
 0x216   :  { %6679 = vperm.xlu1 %7335, %v5338_v52   ;;  %v1531_v27 = vrot.slane %v8118_v16, %v8033_v39  ;;  %v1535_v32 = vrot.slane %v8118_v16, %v8036_v1  ;;  %v5273_v44 = vcombine.low %v5251_v17, %v5258_v46  ;;  %v1539_v35 = vrot.slane %v8118_v16, %v8041_v45 }
 0x217   :  { %v3624_v38 = vcombine.low %v1511_v23, %v1515_v33  ;;  %v3625_v41 = vcombine.low %v1519_v56, %v1523_v47  ;;  %v5274_v2 = vcombine.low %v5265_v25, %v5272_v63  ;;  %v955_v22 = vadd.f32 %v7994_v50, %v849_v31 }
 0x218   :  { %v7516_v62 = vpop.eup %7515  ;;  %v3626_v3 = vcombine.low %v1527_v12, %v1531_v27  ;;  %v954_v6 = vadd.f32 %v7994_v50, %v847_v18  ;;  %v5281_v0 = vrot.slane %v5273_v44, %v8044_v54  ;;  %v3627_v40 = vcombine.low %v1535_v32, %v1539_v35 }
 0x219   :  { %v7518_v9 = vpop.eup %7517  ;;  %v1205_v15 = vadd.f32 1.0, %v7516_v62  ;;  %v3634_v52 = vrot.slane %v3624_v38, %v8044_v54  ;;  %7523 = vrcp.f32 %v1238_v26  ;;  %v5288_v4 = vrot.slane %v5274_v2, %v8044_v54 }
 0x21a   :  { %v3641_v16 = vrot.slane %v3625_v41, %v8044_v54  ;;  %v3648_v23 = vrot.slane %v3626_v3, %v8044_v54  ;;  %v1204_v33 = vadd.f32 1.0, %v7518_v9  ;;  %7525 = vpow2.f32 %v1156_v43 }
 0x21b   :  { %v3655_v17 = vrot.slane %v3627_v40, %v8044_v54  ;;  %v1019_v46 = vsub.f32 0.0, %v955_v22  ;;  %v5289_v25 = vcombine.low %v5281_v0, %v5288_v4  ;;  %v1018_v47 = vsub.f32 0.0, %v954_v6 }
 0x21c   :  { %v3656_v56 = vcombine.low %v3634_v52, %v3641_v16  ;;  %v1735_v31 = vrot.slane %v8145_v58, %v8014_v36  ;;  %7527 = vrcp.f32 %v1205_v15  ;;  %v1739_v63 = vrot.slane %v8145_v58, %v8017_v60 }
 0x21d   :  { %v3657_v18 = vcombine.low %v3648_v23, %v3655_v17  ;;  %v1106_v26 = vmul.f32 1.442695, %v1019_v46  ;;  %6676 = vperm.xlu0 %7336, %v5289_v25   ;;  %v1743_v43 = vrot.slane %v8145_v58, %v8022_v7  ;;  %v1747_v32 = vrot.slane %v8145_v58, %v8025_v8  ;;  %v913_v17 = vpop.xlane.xlu1 %912 }
 0x21e   :  { %v7520_v12 = vpop.eup %7519  ;;  %v3664_v27 = vrot.slane %v3656_v56, %v8044_v54  ;;  %v1751_v44 = vrot.slane %v8145_v58, %v8028_v42  ;;  %7529 = vrcp.f32 %v1204_v33  ;;  %v1755_v41 = vrot.slane %v8145_v58, %v8033_v39 }
 0x21f   :  { %v8431_v35 = vpop.eup %7521  ;;  %v3671_v38 = vrot.slane %v3657_v18, %v8044_v54  ;;  %v1104_v62 = vmul.f32 1.442695, %v1018_v47  ;;  %v1759_v2 = vrot.slane %v8145_v58, %v8036_v1  ;;  %v1763_v3 = vrot.slane %v8145_v58, %v8041_v45  ;;  %v911_v47 = vpop.xlane.xlu0 %910 }
 0x220   :  { %v3967_v22 = vcombine.low %v1735_v31, %v1739_v63  ;;  %v1237_v6 = vadd.f32 1.0, %v7520_v12  ;;  %v3968_v15 = vcombine.low %v1743_v43, %v1747_v32  ;;  %v3969_v0 = vcombine.low %v1751_v44, %v1755_v41 }
 0x221   :  { %v3672_v9 = vcombine.low %v3664_v27, %v3671_v38  ;;  %7531 = vpow2.f32 %v1106_v26  ;;  %v3970_v40 = vcombine.low %v1759_v2, %v1763_v3  ;;  %v2535_v4 = vrot.slane %v8138_v51, %v8014_v36 }
 0x222   :  { %v3977_v52 = vrot.slane %v3967_v22, %v8044_v54  ;;  %v3984_v16 = vrot.slane %v3968_v15, %v8044_v54  ;;  %v3991_v23 = vrot.slane %v3969_v0, %v8044_v54  ;;  %v2539_v58 = vrot.slane %v8138_v51, %v8017_v60 }
 0x223   :  { %6577 = vperm.xlu1 %7335, %v3672_v9   ;;  %v2543_v33 = vrot.slane %v8138_v51, %v8022_v7  ;;  %7533 = vpow2.f32 %v1104_v62  ;;  %v3998_v46 = vrot.slane %v3970_v40, %v8044_v54  ;;  %v2547_v25 = vrot.slane %v8138_v51, %v8025_v8 }
 0x224   :  { %v2551_v56 = vrot.slane %v8138_v51, %v8028_v42  ;;  %v3999_v31 = vcombine.low %v3977_v52, %v3984_v16  ;;  %v2555_v18 = vrot.slane %v8138_v51, %v8033_v39  ;;  %v2559_v26 = vrot.slane %v8138_v51, %v8036_v1 }
 0x225   :  { %v2563_v63 = vrot.slane %v8138_v51, %v8041_v45  ;;  %v4000_v12 = vcombine.low %v3991_v23, %v3998_v46  ;;  %v5192_v27 = vcombine.low %v2535_v4, %v2539_v58  ;;  %v5193_v43 = vcombine.low %v2543_v33, %v2547_v25 }
 0x226   :  { %v987_v32 = vadd.f32 %v7994_v50, %v913_v17  ;;  %v8461_v44 = vpop.eup %7523  ;;  %v4007_v38 = vrot.slane %v3999_v31, %v8044_v54  ;;  %v5194_v41 = vcombine.low %v2551_v56, %v2555_v18  ;;  %v986_v2 = vadd.f32 %v7994_v50, %v911_v47 }
 0x227   :  { %v5195_v62 = vcombine.low %v2559_v26, %v2563_v63  ;;  %v7526_v3 = vpop.eup %7525  ;;  %v4014_v22 = vrot.slane %v4000_v12, %v8044_v54  ;;  %v5202_v9 = vrot.slane %v5192_v27, %v8044_v54  ;;  %v5209_v51 = vrot.slane %v5193_v43, %v8044_v54  ;;  %v845_v27 = vpop.xlane.xlu1 %844 }
 0x228   :  { %v1051_v15 = vsub.f32 0.0, %v987_v32  ;;  %v5216_v0 = vrot.slane %v5194_v41, %v8044_v54  ;;  %v1050_v52 = vsub.f32 0.0, %v986_v2  ;;  %v1607_v4 = vrot.slane %v8088_v19, %v8014_v36  ;;  %v843_v2 = vpop.xlane.xlu0 %842 }
 0x229   :  { %v5223_v40 = vrot.slane %v5195_v62, %v8044_v54  ;;  %v8472_v16 = vpop.eup %7527  ;;  %v4015_v23 = vcombine.low %v4007_v38, %v4014_v22  ;;  %v5224_v58 = vcombine.low %v5202_v9, %v5209_v51  ;;  %v1611_v17 = vrot.slane %v8088_v19, %v8017_v60 }
 0x22a   :  { %v1170_v33 = vmul.f32 1.442695, %v1051_v15  ;;  %v1236_v46 = vadd.f32 1.0, %v7526_v3  ;;  %v1615_v56 = vrot.slane %v8088_v19, %v8022_v7  ;;  %v1619_v47 = vrot.slane %v8088_v19, %v8025_v8 }
 0x22b   :  { %v5225_v25 = vcombine.low %v5216_v0, %v5223_v40  ;;  %v8480_v31 = vpop.eup %7529  ;;  %6598 = vperm.xlu0 %7336, %v4015_v23   ;;  %v5232_v18 = vrot.slane %v5224_v58, %v8044_v54  ;;  %v1168_v26 = vmul.f32 1.442695, %v1050_v52  ;;  %v1623_v63 = vrot.slane %v8088_v19, %v8028_v42 }
 0x22c   :  { %v1627_v12 = vrot.slane %v8088_v19, %v8033_v39  ;;  %7535 = vpow2.f32 %v1170_v33  ;;  %v1631_v32 = vrot.slane %v8088_v19, %v8036_v1  ;;  %v1635_v38 = vrot.slane %v8088_v19, %v8041_v45 }
 0x22d   :  { %v5239_v43 = vrot.slane %v5225_v25, %v8044_v54  ;;  %7537 = vrcp.f32 %v1237_v6  ;;  %v3771_v41 = vcombine.low %v1607_v4, %v1611_v17  ;;  %v3772_v62 = vcombine.low %v1615_v56, %v1619_v47 }
 0x22e   :  { %v7532_v3 = vpop.eup %7531  ;;  %7539 = vrcp.f32 %v1236_v46  ;;  %v3773_v9 = vcombine.low %v1623_v63, %v1627_v12  ;;  %v953_v51 = vadd.f32 %v7994_v50, %v845_v27  ;;  %v3774_v15 = vcombine.low %v1631_v32, %v1635_v38 }
 0x22f   :  { %v5240_v22 = vcombine.low %v5232_v18, %v5239_v43  ;;  %7541 = vpow2.f32 %v1168_v26  ;;  %v3781_v0 = vrot.slane %v3771_v41, %v8044_v54  ;;  %v3788_v40 = vrot.slane %v3772_v62, %v8044_v54 }
 0x230   :  { %v7534_v52 = vpop.eup %7533  ;;  %v3795_v6 = vrot.slane %v3773_v9, %v8044_v54  ;;  %v1017_v19 = vsub.f32 0.0, %v953_v51  ;;  %v952_v4 = vadd.f32 %v7994_v50, %v843_v2  ;;  %v1671_v23 = vrot.slane %v8180_v59, %v8014_v36 }
 0x231   :  { %6673 = vperm.xlu1 %7335, %v5240_v22   ;;  %v3802_v58 = vrot.slane %v3774_v15, %v8044_v54  ;;  %v3803_v33 = vcombine.low %v3781_v0, %v3788_v40  ;;  %v1675_v17 = vrot.slane %v8180_v59, %v8017_v60  ;;  %v1679_v46 = vrot.slane %v8180_v59, %v8022_v7 }
 0x232   :  { %v1211_v25 = vadd.f32 1.0, %v7532_v3  ;;  %v1016_v56 = vsub.f32 0.0, %v952_v4  ;;  %v1683_v47 = vrot.slane %v8180_v59, %v8025_v8  ;;  %v1687_v18 = vrot.slane %v8180_v59, %v8028_v42 }
 0x233   :  { %v3804_v26 = vcombine.low %v3795_v6, %v3802_v58  ;;  %v3811_v63 = vrot.slane %v3803_v33, %v8044_v54  ;;  %v1691_v12 = vrot.slane %v8180_v59, %v8033_v39  ;;  %v1695_v27 = vrot.slane %v8180_v59, %v8036_v1 }
 0x234   :  { %v1210_v43 = vadd.f32 1.0, %v7534_v52  ;;  %v1102_v32 = vmul.f32 1.442695, %v1017_v19  ;;  %v1699_v38 = vrot.slane %v8180_v59, %v8041_v45  ;;  %v3869_v41 = vcombine.low %v1671_v23, %v1675_v17 }
 0x235   :  { %v3818_v62 = vrot.slane %v3804_v26, %v8044_v54  ;;  %v1100_v2 = vmul.f32 1.442695, %v1016_v56  ;;  %v3870_v3 = vcombine.low %v1679_v46, %v1683_v47  ;;  %v3871_v22 = vcombine.low %v1687_v18, %v1691_v12  ;;  %v909_v12 = vpop.xlane.xlu1 %908 }
 0x236   :  { %v3872_v9 = vcombine.low %v1695_v27, %v1699_v38  ;;  %v3879_v51 = vrot.slane %v3869_v41, %v8044_v54  ;;  %v1543_v15 = vrot.slane %v8116_v13, %v8014_v36  ;;  %v1547_v0 = vrot.slane %v8116_v13, %v8017_v60  ;;  %v907_v27 = vpop.xlane.xlu0 %906 }
 0x237   :  { %v3819_v40 = vcombine.low %v3811_v63, %v3818_v62  ;;  %v3886_v52 = vrot.slane %v3870_v3, %v8044_v54  ;;  %v3893_v59 = vrot.slane %v3871_v22, %v8044_v54  ;;  %v1551_v6 = vrot.slane %v8116_v13, %v8022_v7 }
 0x238   :  { %v3900_v19 = vrot.slane %v3872_v9, %v8044_v54  ;;  %v1555_v4 = vrot.slane %v8116_v13, %v8025_v8  ;;  %v1559_v23 = vrot.slane %v8116_v13, %v8028_v42  ;;  %v1563_v58 = vrot.slane %v8116_v13, %v8033_v39 }
 0x239   :  { %v7536_v33 = vpop.eup %7535  ;;  %6586 = vperm.xlu1 %7335, %v3819_v40   ;;  %7543 = vpow2.f32 %v1102_v32  ;;  %v3901_v17 = vcombine.low %v3879_v51, %v3886_v52  ;;  %v1567_v46 = vrot.slane %v8116_v13, %v8036_v1  ;;  %v1571_v56 = vrot.slane %v8116_v13, %v8041_v45 }
 0x23a   :  { %v8536_v47 = vpop.eup %7537  ;;  %7545 = vrcp.f32 %v1211_v25  ;;  %v3902_v18 = vcombine.low %v3893_v59, %v3900_v19  ;;  %v3673_v26 = vcombine.low %v1543_v15, %v1547_v0  ;;  %v3674_v63 = vcombine.low %v1551_v6, %v1555_v4 }
 0x23b   :  { %v8538_v38 = vpop.eup %7539  ;;  %7547 = vpow2.f32 %v1100_v2  ;;  %v3909_v32 = vrot.slane %v3901_v17, %v8044_v54  ;;  %v3675_v41 = vcombine.low %v1559_v23, %v1563_v58  ;;  %v3676_v62 = vcombine.low %v1567_v46, %v1571_v56 }
 0x23c   :  { %v7542_v3 = vpop.eup %7541  ;;  %v1243_v22 = vadd.f32 1.0, %v7536_v33  ;;  %v3916_v9 = vrot.slane %v3902_v18, %v8044_v54  ;;  %v3683_v13 = vrot.slane %v3673_v26, %v8044_v54  ;;  %v3690_v25 = vrot.slane %v3674_v63, %v8044_v54 }
 0x23d   :  { %v3697_v51 = vrot.slane %v3675_v41, %v8044_v54  ;;  %v3704_v15 = vrot.slane %v3676_v62, %v8044_v54  ;;  %v985_v0 = vadd.f32 %v7994_v50, %v909_v12  ;;  %v984_v2 = vadd.f32 %v7994_v50, %v907_v27 }
 0x23e   :  { %v3917_v40 = vcombine.low %v3909_v32, %v3916_v9  ;;  %v3705_v52 = vcombine.low %v3683_v13, %v3690_v25  ;;  %v2695_v59 = vrot.slane %v8204_v29, %v8014_v36  ;;  %v2699_v6 = vrot.slane %v8204_v29, %v8017_v60 }
 0x23f   :  { %v1242_v19 = vadd.f32 1.0, %v7542_v3  ;;  %v3706_v4 = vcombine.low %v3697_v51, %v3704_v15  ;;  %v1049_v23 = vsub.f32 0.0, %v985_v0  ;;  %v2703_v58 = vrot.slane %v8204_v29, %v8022_v7 }
 0x240   :  { %6592 = vperm.xlu0 %7336, %v3917_v40   ;;  %v3713_v33 = vrot.slane %v3705_v52, %v8044_v54  ;;  %v2707_v17 = vrot.slane %v8204_v29, %v8025_v8  ;;  %v2711_v46 = vrot.slane %v8204_v29, %v8028_v42  ;;  %v2715_v56 = vrot.slane %v8204_v29, %v8033_v39  ;;  %v857_v52 = vpop.xlane.xlu1 %856 }
 0x241   :  { %7549 = vrcp.f32 %v1210_v43  ;;  %v3720_v18 = vrot.slane %v3706_v4, %v8044_v54  ;;  %v1048_v26 = vsub.f32 0.0, %v984_v2  ;;  %v2719_v63 = vrot.slane %v8204_v29, %v8036_v1 }
 0x242   :  { %v1166_v12 = vmul.f32 1.442695, %v1049_v23  ;;  %v2723_v27 = vrot.slane %v8204_v29, %v8041_v45  ;;  %v5437_v32 = vcombine.low %v2695_v59, %v2699_v6  ;;  %v5438_v41 = vcombine.low %v2703_v58, %v2707_v17 }
 0x243   :  { %7551 = vrcp.f32 %v1243_v22  ;;  %v3721_v62 = vcombine.low %v3713_v33, %v3720_v18  ;;  %v5439_v3 = vcombine.low %v2711_v46, %v2715_v56  ;;  %v1703_v43 = vrot.slane %v8154_v55, %v8014_v36  ;;  %v855_v18 = vpop.xlane.xlu0 %854 }
 0x244   :  { %7553 = vrcp.f32 %v1242_v19  ;;  %v5440_v9 = vcombine.low %v2719_v63, %v2723_v27  ;;  %v5447_v13 = vrot.slane %v5437_v32, %v8044_v54  ;;  %v1164_v25 = vmul.f32 1.442695, %v1048_v26 }
 0x245   :  { %6580 = vperm.xlu1 %7335, %v3721_v62   ;;  %v5454_v51 = vrot.slane %v5438_v41, %v8044_v54  ;;  %v5461_v15 = vrot.slane %v5439_v3, %v8044_v54  ;;  %v1707_v29 = vrot.slane %v8154_v55, %v8017_v60  ;;  %7555 = vpow2.f32 %v1166_v12 }
 0x246   :  { %v7544_v0 = vpop.eup %7543  ;;  %v5468_v22 = vrot.slane %v5440_v9, %v8044_v54  ;;  %v1711_v2 = vrot.slane %v8154_v55, %v8022_v7  ;;  %v1715_v40 = vrot.slane %v8154_v55, %v8025_v8  ;;  %v1719_v19 = vrot.slane %v8154_v55, %v8028_v42 }
 0x247   :  { %v8578_v59 = vpop.eup %7545  ;;  %v5469_v6 = vcombine.low %v5447_v13, %v5454_v51  ;;  %v1723_v4 = vrot.slane %v8154_v55, %v8033_v39  ;;  %v1727_v23 = vrot.slane %v8154_v55, %v8036_v1  ;;  %v1731_v17 = vrot.slane %v8154_v55, %v8041_v45 }
 0x248   :  { %v7548_v58 = vpop.eup %7547  ;;  %v5470_v33 = vcombine.low %v5461_v15, %v5468_v22  ;;  %v3918_v46 = vcombine.low %v1703_v43, %v1707_v29  ;;  %v3919_v56 = vcombine.low %v1711_v2, %v1715_v40  ;;  %v1209_v26 = vadd.f32 1.0, %v7544_v0 }
 0x249   :  { %v5477_v63 = vrot.slane %v5469_v6, %v8044_v54  ;;  %v3920_v12 = vcombine.low %v1719_v19, %v1723_v4  ;;  %v959_v27 = vadd.f32 %v7994_v50, %v857_v52  ;;  %v3921_v41 = vcombine.low %v1727_v23, %v1731_v17 }
 0x24a   :  { %v5484_v32 = vrot.slane %v5470_v33, %v8044_v54  ;;  %v3928_v62 = vrot.slane %v3918_v46, %v8044_v54  ;;  %v3935_v3 = vrot.slane %v3919_v56, %v8044_v54  ;;  %v1208_v9 = vadd.f32 1.0, %v7548_v58 }
 0x24b   :  { %v3942_v13 = vrot.slane %v3920_v12, %v8044_v54  ;;  %v958_v55 = vadd.f32 %v7994_v50, %v855_v18  ;;  %v1863_v43 = vrot.slane %v8220_v5, %v8014_v36  ;;  %v3949_v15 = vrot.slane %v3921_v41, %v8044_v54 }
 0x24c   :  { %v5485_v51 = vcombine.low %v5477_v63, %v5484_v32  ;;  %v3950_v29 = vcombine.low %v3928_v62, %v3935_v3  ;;  %v1867_v0 = vrot.slane %v8220_v5, %v8017_v60  ;;  %7557 = vpow2.f32 %v1164_v25 }
 0x24d   :  { %v1023_v22 = vsub.f32 0.0, %v959_v27  ;;  %v1871_v2 = vrot.slane %v8220_v5, %v8022_v7  ;;  %v1875_v40 = vrot.slane %v8220_v5, %v8025_v8  ;;  %v3951_v6 = vcombine.low %v3942_v13, %v3949_v15 }
 0x24e   :  { %v8604_v52 = vpop.eup %7549  ;;  %6688 = vperm.xlu0 %7336, %v5485_v51   ;;  %v3958_v19 = vrot.slane %v3950_v29, %v8044_v54  ;;  %v1879_v4 = vrot.slane %v8220_v5, %v8028_v42  ;;  %v1883_v23 = vrot.slane %v8220_v5, %v8033_v39  ;;  %v1022_v25 = vsub.f32 0.0, %v958_v55 }
 0x24f   :  { %v1887_v58 = vrot.slane %v8220_v5, %v8036_v1  ;;  %v1891_v33 = vrot.slane %v8220_v5, %v8041_v45  ;;  %v4163_v17 = vcombine.low %v1863_v43, %v1867_v0  ;;  %7559 = vrcp.f32 %v1209_v26 }
 0x250   :  { %v8615_v46 = vpop.eup %7551  ;;  %v3965_v56 = vrot.slane %v3951_v6, %v8044_v54  ;;  %v4164_v18 = vcombine.low %v1871_v2, %v1875_v40  ;;  %v4165_v63 = vcombine.low %v1879_v4, %v1883_v23  ;;  %v1114_v27 = vmul.f32 1.442695, %v1023_v22  ;;  %v921_v40 = vpop.xlane.xlu1 %920 }
 0x251   :  { %v8618_v12 = vpop.eup %7553  ;;  %v4166_v32 = vcombine.low %v1887_v58, %v1891_v33  ;;  %v4173_v41 = vrot.slane %v4163_v17, %v8044_v54  ;;  %v2727_v62 = vrot.slane %v8162_v10, %v8014_v36  ;;  %v2731_v26 = vrot.slane %v8162_v10, %v8017_v60  ;;  %v919_v6 = vpop.xlane.xlu0 %918 }
 0x252   :  { %v3966_v3 = vcombine.low %v3958_v19, %v3965_v56  ;;  %v4180_v5 = vrot.slane %v4164_v18, %v8044_v54  ;;  %v4187_v13 = vrot.slane %v4165_v63, %v8044_v54  ;;  %v7556_v55 = vpop.eup %7555  ;;  %7561 = vrcp.f32 %v1208_v9 }
 0x253   :  { %v1112_v43 = vmul.f32 1.442695, %v1022_v25  ;;  %v4194_v51 = vrot.slane %v4166_v32, %v8044_v54  ;;  %v2735_v15 = vrot.slane %v8162_v10, %v8022_v7  ;;  %v2739_v0 = vrot.slane %v8162_v10, %v8025_v8 }
 0x254   :  { %6595 = vperm.xlu1 %7335, %v3966_v3   ;;  %v4195_v29 = vcombine.low %v4173_v41, %v4180_v5  ;;  %v2743_v22 = vrot.slane %v8162_v10, %v8028_v42  ;;  %v2747_v2 = vrot.slane %v8162_v10, %v8033_v39  ;;  %7563 = vpow2.f32 %v1114_v27 }
 0x255   :  { %v4196_v9 = vcombine.low %v4187_v13, %v4194_v51  ;;  %v2751_v19 = vrot.slane %v8162_v10, %v8036_v1  ;;  %v2755_v4 = vrot.slane %v8162_v10, %v8041_v45  ;;  %v5486_v25 = vcombine.low %v2727_v62, %v2731_v26 }
 0x256   :  { %v4203_v23 = vrot.slane %v4195_v29, %v8044_v54  ;;  %v5487_v58 = vcombine.low %v2735_v15, %v2739_v0  ;;  %v5488_v33 = vcombine.low %v2743_v22, %v2747_v2  ;;  %v991_v18 = vadd.f32 %v7994_v50, %v921_v40 }
 0x257   :  { %v4210_v17 = vrot.slane %v4196_v9, %v8044_v54  ;;  %v5489_v56 = vcombine.low %v2751_v19, %v2755_v4  ;;  %v990_v63 = vadd.f32 %v7994_v50, %v919_v6  ;;  %v1241_v27 = vadd.f32 1.0, %v7556_v55 }
 0x258   :  { %v5496_v32 = vrot.slane %v5486_v25, %v8044_v54  ;;  %v5503_v41 = vrot.slane %v5487_v58, %v8044_v54  ;;  %v5510_v3 = vrot.slane %v5488_v33, %v8044_v54  ;;  %v1055_v62 = vsub.f32 0.0, %v991_v18  ;;  %v853_v33 = vpop.xlane.xlu1 %852 }
 0x259   :  { %v4211_v10 = vcombine.low %v4203_v23, %v4210_v17  ;;  %v5517_v5 = vrot.slane %v5489_v56, %v8044_v54  ;;  %v1639_v13 = vrot.slane %v8187_v49, %v8014_v36  ;;  %v7558_v26 = vpop.eup %7557  ;;  %v1643_v15 = vrot.slane %v8187_v49, %v8017_v60 }
 0x25a   :  { %v5518_v51 = vcombine.low %v5496_v32, %v5503_v41  ;;  %v1647_v55 = vrot.slane %v8187_v49, %v8022_v7  ;;  %v1651_v29 = vrot.slane %v8187_v49, %v8025_v8  ;;  %v1178_v22 = vmul.f32 1.442695, %v1055_v62 }
 0x25b   :  { %6610 = vperm.xlu0 %7336, %v4211_v10   ;;  %v5519_v0 = vcombine.low %v5510_v3, %v5517_v5  ;;  %v1054_v2 = vsub.f32 0.0, %v990_v63  ;;  %v1655_v40 = vrot.slane %v8187_v49, %v8028_v42  ;;  %v1659_v9 = vrot.slane %v8187_v49, %v8033_v39  ;;  %v851_v63 = vpop.xlane.xlu0 %850 }
 0x25c   :  { %v5526_v6 = vrot.slane %v5518_v51, %v8044_v54  ;;  %v1663_v19 = vrot.slane %v8187_v49, %v8036_v1  ;;  %v1667_v4 = vrot.slane %v8187_v49, %v8041_v45  ;;  %v8665_v23 = vpop.eup %7559  ;;  %7565 = vpow2.f32 %v1112_v43 }
 0x25d   :  { %v5533_v25 = vrot.slane %v5519_v0, %v8044_v54  ;;  %v3820_v58 = vcombine.low %v1639_v13, %v1643_v15  ;;  %7567 = vrcp.f32 %v1241_v27  ;;  %v1240_v17 = vadd.f32 1.0, %v7558_v26 }
 0x25e   :  { %v3821_v56 = vcombine.low %v1647_v55, %v1651_v29  ;;  %v3822_v18 = vcombine.low %v1655_v40, %v1659_v9  ;;  %v1176_v41 = vmul.f32 1.442695, %v1054_v2  ;;  %v3823_v3 = vcombine.low %v1663_v19, %v1667_v4 }
 0x25f   :  { %v5534_v32 = vcombine.low %v5526_v6, %v5533_v25  ;;  %v3830_v10 = vrot.slane %v3820_v58, %v8044_v54  ;;  %v8669_v5 = vpop.eup %7561  ;;  %7569 = vpow2.f32 %v1178_v22  ;;  %v957_v62 = vadd.f32 %v7994_v50, %v853_v33 }
 0x260   :  { %v3837_v49 = vrot.slane %v3821_v56, %v8044_v54  ;;  %v3844_v43 = vrot.slane %v3822_v18, %v8044_v54  ;;  %v3851_v27 = vrot.slane %v3823_v3, %v8044_v54  ;;  %v956_v13 = vadd.f32 %v7994_v50, %v851_v63 }
 0x261   :  { %6691 = vperm.xlu1 %7335, %v5534_v32   ;;  %v1799_v26 = vrot.slane %v8286_v20, %v8014_v36  ;;  %v1803_v51 = vrot.slane %v8286_v20, %v8017_v60  ;;  %v7564_v15 = vpop.eup %7563  ;;  %v1021_v29 = vsub.f32 0.0, %v957_v62  ;;  %v1807_v0 = vrot.slane %v8286_v20, %v8022_v7 }
 0x262   :  { %v3852_v55 = vcombine.low %v3830_v10, %v3837_v49  ;;  %v1811_v22 = vrot.slane %v8286_v20, %v8025_v8  ;;  %v3853_v2 = vcombine.low %v3844_v43, %v3851_v27  ;;  %v1020_v40 = vsub.f32 0.0, %v956_v13 }
 0x263   :  { %v1815_v6 = vrot.slane %v8286_v20, %v8028_v42  ;;  %v1819_v9 = vrot.slane %v8286_v20, %v8033_v39  ;;  %v1110_v4 = vmul.f32 1.442695, %v1021_v29  ;;  %v1823_v25 = vrot.slane %v8286_v20, %v8036_v1 }
 0x264   :  { %v3860_v19 = vrot.slane %v3852_v55, %v8044_v54  ;;  %v1827_v58 = vrot.slane %v8286_v20, %v8041_v45  ;;  %7571 = vpow2.f32 %v1176_v41  ;;  %v3867_v33 = vrot.slane %v3853_v2, %v8044_v54 }
 0x265   :  { %v4065_v56 = vcombine.low %v1799_v26, %v1803_v51  ;;  %v4066_v18 = vcombine.low %v1807_v0, %v1811_v22  ;;  %v1108_v63 = vmul.f32 1.442695, %v1020_v40  ;;  %v4067_v32 = vcombine.low %v1815_v6, %v1819_v9  ;;  %v917_v9 = vpop.xlane.xlu1 %916 }
 0x266   :  { %v4068_v3 = vcombine.low %v1823_v25, %v1827_v58  ;;  %v2663_v10 = vrot.slane %v8211_v34, %v8014_v36  ;;  %v3868_v49 = vcombine.low %v3860_v19, %v3867_v33  ;;  %7573 = vpow2.f32 %v1110_v4  ;;  %v915_v33 = vpop.xlane.xlu0 %914 }
 0x267   :  { %v4075_v43 = vrot.slane %v4065_v56, %v8044_v54  ;;  %v4082_v62 = vrot.slane %v4066_v18, %v8044_v54  ;;  %v4089_v27 = vrot.slane %v4067_v32, %v8044_v54  ;;  %v2667_v41 = vrot.slane %v8211_v34, %v8017_v60 }
 0x268   :  { %v4096_v20 = vrot.slane %v4068_v3, %v8044_v54  ;;  %v2671_v13 = vrot.slane %v8211_v34, %v8022_v7  ;;  %6589 = vperm.xlu1 %7335, %v3868_v49   ;;  %v2675_v51 = vrot.slane %v8211_v34, %v8025_v8  ;;  %v2679_v55 = vrot.slane %v8211_v34, %v8028_v42 }
 0x269   :  { %v4097_v26 = vcombine.low %v4075_v43, %v4082_v62  ;;  %v2683_v29 = vrot.slane %v8211_v34, %v8033_v39  ;;  %v7566_v0 = vpop.eup %7565  ;;  %v2687_v2 = vrot.slane %v8211_v34, %v8036_v1  ;;  %v2691_v40 = vrot.slane %v8211_v34, %v8041_v45 }
 0x26a   :  { %v4098_v22 = vcombine.low %v4089_v27, %v4096_v20  ;;  %v5388_v6 = vcombine.low %v2663_v10, %v2667_v41  ;;  %v8714_v19 = vpop.eup %7567  ;;  %7575 = vrcp.f32 %v1240_v17  ;;  %v5389_v25 = vcombine.low %v2671_v13, %v2675_v51 }
 0x26b   :  { %v4105_v4 = vrot.slane %v4097_v26, %v8044_v54  ;;  %v5390_v58 = vcombine.low %v2679_v55, %v2683_v29  ;;  %v1215_v56 = vadd.f32 1.0, %v7564_v15  ;;  %v5391_v32 = vcombine.low %v2687_v2, %v2691_v40 }
 0x26c   :  { %v4112_v18 = vrot.slane %v4098_v22, %v8044_v54  ;;  %v5398_v3 = vrot.slane %v5388_v6, %v8044_v54  ;;  %v7570_v49 = vpop.eup %7569  ;;  %v1214_v43 = vadd.f32 1.0, %v7566_v0  ;;  %v5405_v34 = vrot.slane %v5389_v25, %v8044_v54 }
 0x26d   :  { %v5412_v10 = vrot.slane %v5390_v58, %v8044_v54  ;;  %v989_v62 = vadd.f32 %v7994_v50, %v917_v9  ;;  %7577 = vpow2.f32 %v1108_v63  ;;  %v5419_v27 = vrot.slane %v5391_v32, %v8044_v54 }
 0x26e   :  { %v4113_v17 = vcombine.low %v4105_v4, %v4112_v18  ;;  %v988_v20 = vadd.f32 %v7994_v50, %v915_v33  ;;  %v5420_v15 = vcombine.low %v5398_v3, %v5405_v34  ;;  %v2759_v13 = vrot.slane %v8156_v48, %v8014_v36  ;;  %v863_v3 = vpop.xlane.xlu0 %862 }
 0x26f   :  { %v1053_v41 = vsub.f32 0.0, %v989_v62  ;;  %v2763_v26 = vrot.slane %v8156_v48, %v8017_v60  ;;  %v5421_v51 = vcombine.low %v5412_v10, %v5419_v27  ;;  %v2767_v29 = vrot.slane %v8156_v48, %v8022_v7 }
 0x270   :  { %6604 = vperm.xlu0 %7336, %v4113_v17   ;;  %v1052_v55 = vsub.f32 0.0, %v988_v20  ;;  %v2771_v63 = vrot.slane %v8156_v48, %v8025_v8  ;;  %v5428_v0 = vrot.slane %v5420_v15, %v8044_v54  ;;  %v2775_v2 = vrot.slane %v8156_v48, %v8028_v42  ;;  %v865_v20 = vpop.xlane.xlu1 %864 }
 0x271   :  { %v1174_v22 = vmul.f32 1.442695, %v1053_v41  ;;  %v2779_v40 = vrot.slane %v8156_v48, %v8033_v39  ;;  %v7572_v6 = vpop.eup %7571  ;;  %7579 = vrcp.f32 %v1215_v56  ;;  %v5435_v9 = vrot.slane %v5421_v51, %v8044_v54 }
 0x272   :  { %v2783_v4 = vrot.slane %v8156_v48, %v8036_v1  ;;  %v2787_v25 = vrot.slane %v8156_v48, %v8041_v45  ;;  %v1172_v58 = vmul.f32 1.442695, %v1052_v55  ;;  %v5535_v33 = vcombine.low %v2759_v13, %v2763_v26 }
 0x273   :  { %v5536_v18 = vcombine.low %v2767_v29, %v2771_v63  ;;  %v5537_v32 = vcombine.low %v2775_v2, %v2779_v40  ;;  %v7574_v34 = vpop.eup %7573  ;;  %7581 = vrcp.f32 %v1214_v43  ;;  %v5436_v10 = vcombine.low %v5428_v0, %v5435_v9 }
 0x274   :  { %v5538_v62 = vcombine.low %v2783_v4, %v2787_v25  ;;  %7583 = vpow2.f32 %v1174_v22  ;;  %v5545_v56 = vrot.slane %v5535_v33, %v8044_v54  ;;  %v1247_v15 = vadd.f32 1.0, %v7570_v49 }
 0x275   :  { %v5552_v17 = vrot.slane %v5536_v18, %v8044_v54  ;;  %v5559_v27 = vrot.slane %v5537_v32, %v8044_v54  ;;  %v1246_v41 = vadd.f32 1.0, %v7572_v6  ;;  %6685 = vperm.xlu1 %7335, %v5436_v10   ;;  %v962_v13 = vadd.f32 %v7994_v50, %v863_v3 }
 0x276   :  { %v5566_v48 = vrot.slane %v5538_v62, %v8044_v54  ;;  %7585 = vpow2.f32 %v1172_v58  ;;  %v1991_v43 = vrot.slane %v8380_v14, %v8014_v36  ;;  %v1995_v51 = vrot.slane %v8380_v14, %v8017_v60 }
 0x277   :  { %v5567_v26 = vcombine.low %v5545_v56, %v5552_v17  ;;  %v8751_v55 = vpop.eup %7575  ;;  %v963_v63 = vadd.f32 %v7994_v50, %v865_v20  ;;  %v1026_v49 = vsub.f32 0.0, %v962_v13  ;;  %v1999_v0 = vrot.slane %v8380_v14, %v8022_v7 }
 0x278   :  { %v5568_v29 = vcombine.low %v5559_v27, %v5566_v48  ;;  %v2003_v2 = vrot.slane %v8380_v14, %v8025_v8  ;;  %v2007_v40 = vrot.slane %v8380_v14, %v8028_v42  ;;  %v2011_v6 = vrot.slane %v8380_v14, %v8033_v39 }
 0x279   :  { %v5575_v22 = vrot.slane %v5567_v26, %v8044_v54  ;;  %7587 = vrcp.f32 %v1247_v15  ;;  %v1213_v9 = vadd.f32 1.0, %v7574_v34  ;;  %v2015_v25 = vrot.slane %v8380_v14, %v8036_v1 }
 0x27a   :  { %v5582_v4 = vrot.slane %v5568_v29, %v8044_v54  ;;  %v7578_v58 = vpop.eup %7577  ;;  %v2019_v33 = vrot.slane %v8380_v14, %v8041_v45  ;;  %v4359_v18 = vcombine.low %v1991_v43, %v1995_v51  ;;  %v4360_v32 = vcombine.low %v1999_v0, %v2003_v2 }
 0x27b   :  { %v4361_v3 = vcombine.low %v2007_v40, %v2011_v6  ;;  %v1027_v62 = vsub.f32 0.0, %v963_v63  ;;  %v1831_v56 = vrot.slane %v8235_v57, %v8014_v36  ;;  %v1835_v34 = vrot.slane %v8235_v57, %v8017_v60 }
 0x27c   :  { %v5583_v10 = vcombine.low %v5575_v22, %v5582_v4  ;;  %v1120_v17 = vmul.f32 1.442695, %v1026_v49  ;;  %v4362_v27 = vcombine.low %v2015_v25, %v2019_v33  ;;  %v4369_v20 = vrot.slane %v4359_v18, %v8044_v54  ;;  %v927_v18 = vpop.xlane.xlu0 %926 }
 0x27d   :  { %v4376_v15 = vrot.slane %v4360_v32, %v8044_v54  ;;  %v4383_v14 = vrot.slane %v4361_v3, %v8044_v54  ;;  %v1839_v48 = vrot.slane %v8235_v57, %v8022_v7  ;;  %v1843_v13 = vrot.slane %v8235_v57, %v8025_v8 }
 0x27e   :  { %6694 = vperm.xlu1 %7335, %v5583_v10   ;;  %v1847_v26 = vrot.slane %v8235_v57, %v8028_v42  ;;  %v8781_v43 = vpop.eup %7579  ;;  %v4390_v51 = vrot.slane %v4362_v27, %v8044_v54  ;;  %v1851_v63 = vrot.slane %v8235_v57, %v8033_v39  ;;  %v1855_v49 = vrot.slane %v8235_v57, %v8036_v1 }
 0x27f   :  { %v4391_v29 = vcombine.low %v4369_v20, %v4376_v15  ;;  %v1212_v0 = vadd.f32 1.0, %v7578_v58  ;;  %v1859_v22 = vrot.slane %v8235_v57, %v8041_v45  ;;  %v4114_v2 = vcombine.low %v1831_v56, %v1835_v34 }
 0x280   :  { %v4115_v40 = vcombine.low %v1839_v48, %v1843_v13  ;;  %v8790_v6 = vpop.eup %7581  ;;  %7589 = vpow2.f32 %v1120_v17  ;;  %v4392_v4 = vcombine.low %v4383_v14, %v4390_v51  ;;  %v4116_v33 = vcombine.low %v1847_v26, %v1851_v63  ;;  %v929_v48 = vpop.xlane.xlu1 %928 }
 0x281   :  { %v4399_v25 = vrot.slane %v4391_v29, %v8044_v54  ;;  %v7584_v32 = vpop.eup %7583  ;;  %7591 = vrcp.f32 %v1246_v41  ;;  %v4117_v3 = vcombine.low %v1855_v49, %v1859_v22  ;;  %v4124_v10 = vrot.slane %v4114_v2, %v8044_v54 }
 0x282   :  { %v4131_v58 = vrot.slane %v4115_v40, %v8044_v54  ;;  %7593 = vrcp.f32 %v1213_v9  ;;  %v1122_v27 = vmul.f32 1.442695, %v1027_v62  ;;  %v4406_v57 = vrot.slane %v4392_v4, %v8044_v54 }
 0x283   :  { %v4138_v56 = vrot.slane %v4116_v33, %v8044_v54  ;;  %v7586_v34 = vpop.eup %7585  ;;  %7595 = vrcp.f32 %v1212_v0  ;;  %v4145_v17 = vrot.slane %v4117_v3, %v8044_v54  ;;  %v994_v15 = vadd.f32 %v7994_v50, %v927_v18 }
 0x284   :  { %v4146_v20 = vcombine.low %v4124_v10, %v4131_v58  ;;  %v1245_v14 = vadd.f32 1.0, %v7584_v32  ;;  %v4407_v41 = vcombine.low %v4399_v25, %v4406_v57  ;;  %v3015_v13 = vrot.slane %v8431_v35, %v8014_v36 }
 0x285   :  { %v3019_v9 = vrot.slane %v8431_v35, %v8017_v60  ;;  %v4147_v62 = vcombine.low %v4138_v56, %v4145_v17  ;;  %v1058_v51 = vsub.f32 0.0, %v994_v15  ;;  %v3023_v29 = vrot.slane %v8431_v35, %v8022_v7 }
 0x286   :  { %v4154_v26 = vrot.slane %v4146_v20, %v8044_v54  ;;  %v8806_v63 = vpop.eup %7587  ;;  %7597 = vpow2.f32 %v1122_v27  ;;  %6622 = vperm.xlu0 %7336, %v4407_v41   ;;  %v3027_v49 = vrot.slane %v8431_v35, %v8025_v8  ;;  %v3031_v0 = vrot.slane %v8431_v35, %v8028_v42 }
 0x287   :  { %v3035_v22 = vrot.slane %v8431_v35, %v8033_v39  ;;  %v4161_v2 = vrot.slane %v4147_v62, %v8044_v54  ;;  %v995_v40 = vadd.f32 %v7994_v50, %v929_v48  ;;  %v3039_v4 = vrot.slane %v8431_v35, %v8036_v1 }
 0x288   :  { %v3043_v25 = vrot.slane %v8431_v35, %v8041_v45  ;;  %v1244_v33 = vadd.f32 1.0, %v7586_v34  ;;  %v5927_v18 = vcombine.low %v3015_v13, %v3019_v9  ;;  %v5928_v32 = vcombine.low %v3023_v29, %v3027_v49  ;;  %v861_v9 = vpop.xlane.xlu1 %860 }
 0x289   :  { %v5929_v3 = vcombine.low %v3031_v0, %v3035_v22  ;;  %7599 = vrcp.f32 %v1245_v14  ;;  %v4162_v10 = vcombine.low %v4154_v26, %v4161_v2  ;;  %v1184_v58 = vmul.f32 1.442695, %v1058_v51 }
 0x28a   :  { %v5930_v27 = vcombine.low %v3039_v4, %v3043_v25  ;;  %v5937_v57 = vrot.slane %v5927_v18, %v8044_v54  ;;  %v5944_v56 = vrot.slane %v5928_v32, %v8044_v54  ;;  %v2855_v20 = vrot.slane %v8238_v61, %v8014_v36  ;;  %v859_v4 = vpop.xlane.xlu0 %858 }
 0x28b   :  { %v5951_v17 = vrot.slane %v5929_v3, %v8044_v54  ;;  %6607 = vperm.xlu1 %7335, %v4162_v10   ;;  %v1059_v15 = vsub.f32 0.0, %v995_v40  ;;  %v2859_v34 = vrot.slane %v8238_v61, %v8017_v60  ;;  %v2863_v14 = vrot.slane %v8238_v61, %v8022_v7 }
 0x28c   :  { %v5958_v35 = vrot.slane %v5930_v27, %v8044_v54  ;;  %7601 = vrcp.f32 %v1244_v33  ;;  %v5959_v41 = vcombine.low %v5937_v57, %v5944_v56  ;;  %v2867_v48 = vrot.slane %v8238_v61, %v8025_v8 }
 0x28d   :  { %v2871_v13 = vrot.slane %v8238_v61, %v8028_v42  ;;  %v7590_v62 = vpop.eup %7589  ;;  %v2875_v51 = vrot.slane %v8238_v61, %v8033_v39  ;;  %v2879_v29 = vrot.slane %v8238_v61, %v8036_v1  ;;  %v2883_v49 = vrot.slane %v8238_v61, %v8041_v45 }
 0x28e   :  { %v5960_v26 = vcombine.low %v5951_v17, %v5958_v35  ;;  %v8840_v0 = vpop.eup %7591  ;;  %7603 = vpow2.f32 %v1184_v58  ;;  %v5967_v22 = vrot.slane %v5959_v41, %v8044_v54  ;;  %v5682_v2 = vcombine.low %v2855_v20, %v2859_v34 }
 0x28f   :  { %v5683_v40 = vcombine.low %v2863_v14, %v2867_v48  ;;  %v8843_v25 = vpop.eup %7593  ;;  %v5684_v18 = vcombine.low %v2871_v13, %v2875_v51  ;;  %v5685_v32 = vcombine.low %v2879_v29, %v2883_v49  ;;  %v961_v3 = vadd.f32 %v7994_v50, %v861_v9 }
 0x290   :  { %v5974_v33 = vrot.slane %v5960_v26, %v8044_v54  ;;  %v8847_v10 = vpop.eup %7595  ;;  %v1218_v27 = vadd.f32 1.0, %v7590_v62  ;;  %v1186_v61 = vmul.f32 1.442695, %v1059_v15  ;;  %v5692_v57 = vrot.slane %v5682_v2, %v8044_v54 }
 0x291   :  { %v5699_v58 = vrot.slane %v5683_v40, %v8044_v54  ;;  %v5706_v17 = vrot.slane %v5684_v18, %v8044_v54  ;;  %v5713_v20 = vrot.slane %v5685_v32, %v8044_v54  ;;  %v960_v35 = vadd.f32 %v7994_v50, %v859_v4 }
 0x292   :  { %v5975_v56 = vcombine.low %v5967_v22, %v5974_v33  ;;  %v1927_v14 = vrot.slane %v8472_v16, %v8014_v36  ;;  %v1931_v41 = vrot.slane %v8472_v16, %v8017_v60  ;;  %v1935_v15 = vrot.slane %v8472_v16, %v8022_v7 }
 0x293   :  { %v5714_v34 = vcombine.low %v5692_v57, %v5699_v58  ;;  %v8860_v48 = vpop.eup %7597  ;;  %v5715_v13 = vcombine.low %v5706_v17, %v5713_v20  ;;  %v1025_v9 = vsub.f32 0.0, %v961_v3  ;;  %v1939_v62 = vrot.slane %v8472_v16, %v8025_v8 }
 0x294   :  { %6718 = vperm.xlu0 %7336, %v5975_v56   ;;  %v1943_v26 = vrot.slane %v8472_v16, %v8028_v42  ;;  %7605 = vpow2.f32 %v1186_v61  ;;  %v1947_v29 = vrot.slane %v8472_v16, %v8033_v39  ;;  %v1024_v22 = vsub.f32 0.0, %v960_v35 }
 0x295   :  { %v5722_v51 = vrot.slane %v5714_v34, %v8044_v54  ;;  %v5729_v49 = vrot.slane %v5715_v13, %v8044_v54  ;;  %v1951_v2 = vrot.slane %v8472_v16, %v8036_v1  ;;  %v1955_v40 = vrot.slane %v8472_v16, %v8041_v45 }
 0x296   :  { %v8874_v4 = vpop.eup %7599  ;;  %7607 = vrcp.f32 %v1218_v27  ;;  %v4261_v33 = vcombine.low %v1927_v14, %v1931_v41  ;;  %v4262_v18 = vcombine.low %v1935_v15, %v1939_v62  ;;  %v4263_v32 = vcombine.low %v1943_v26, %v1947_v29  ;;  %v923_v15 = vpop.xlane.xlu0 %922 }
 0x297   :  { %v5730_v3 = vcombine.low %v5722_v51, %v5729_v49  ;;  %v1118_v61 = vmul.f32 1.442695, %v1025_v9  ;;  %v4264_v57 = vcombine.low %v1951_v2, %v1955_v40  ;;  %v1767_v58 = vrot.slane %v8296_v21, %v8014_v36 }
 0x298   :  { %v4271_v56 = vrot.slane %v4261_v33, %v8044_v54  ;;  %v4278_v17 = vrot.slane %v4262_v18, %v8044_v54  ;;  %v4285_v20 = vrot.slane %v4263_v32, %v8044_v54  ;;  %v1771_v16 = vrot.slane %v8296_v21, %v8017_v60 }
 0x299   :  { %v8883_v35 = vpop.eup %7601  ;;  %6703 = vperm.xlu1 %7335, %v5730_v3   ;;  %v1116_v27 = vmul.f32 1.442695, %v1024_v22  ;;  %v4292_v34 = vrot.slane %v4264_v57, %v8044_v54  ;;  %v1775_v14 = vrot.slane %v8296_v21, %v8022_v7  ;;  %v1779_v41 = vrot.slane %v8296_v21, %v8025_v8 }
 0x29a   :  { %v4293_v13 = vcombine.low %v4271_v56, %v4278_v17  ;;  %v1783_v9 = vrot.slane %v8296_v21, %v8028_v42  ;;  %v1787_v62 = vrot.slane %v8296_v21, %v8033_v39  ;;  %v1791_v26 = vrot.slane %v8296_v21, %v8036_v1  ;;  %v925_v17 = vpop.xlane.xlu1 %924 }
 0x29b   :  { %v7604_v51 = vpop.eup %7603  ;;  %v4294_v29 = vcombine.low %v4285_v20, %v4292_v34  ;;  %v1795_v49 = vrot.slane %v8296_v21, %v8041_v45  ;;  %v4016_v22 = vcombine.low %v1767_v58, %v1771_v16  ;;  %v4017_v2 = vcombine.low %v1775_v14, %v1779_v41 }
 0x29c   :  { %7609 = vpow2.f32 %v1118_v61  ;;  %v4301_v40 = vrot.slane %v4293_v13, %v8044_v54  ;;  %v4018_v33 = vcombine.low %v1783_v9, %v1787_v62  ;;  %v992_v18 = vadd.f32 %v7994_v50, %v923_v15 }
 0x29d   :  { %v4308_v32 = vrot.slane %v4294_v29, %v8044_v54  ;;  %v4019_v3 = vcombine.low %v1791_v26, %v1795_v49  ;;  %v4026_v57 = vrot.slane %v4016_v22, %v8044_v54  ;;  %v4033_v56 = vrot.slane %v4017_v2, %v8044_v54 }
 0x29e   :  { %v1250_v20 = vadd.f32 1.0, %v7604_v51  ;;  %v4040_v34 = vrot.slane %v4018_v33, %v8044_v54  ;;  %v1056_v21 = vsub.f32 0.0, %v992_v18  ;;  %v2951_v61 = vrot.slane %v8536_v47, %v8014_v36 }
 0x29f   :  { %v4309_v58 = vcombine.low %v4301_v40, %v4308_v32  ;;  %v4047_v16 = vrot.slane %v4019_v3, %v8044_v54  ;;  %v4048_v14 = vcombine.low %v4026_v57, %v4033_v56  ;;  %v2955_v41 = vrot.slane %v8536_v47, %v8017_v60 }
 0x2a0   :  { %v993_v15 = vadd.f32 %v7994_v50, %v925_v17  ;;  %v1180_v13 = vmul.f32 1.442695, %v1056_v21  ;;  %v2959_v9 = vrot.slane %v8536_v47, %v8022_v7  ;;  %v2963_v62 = vrot.slane %v8536_v47, %v8025_v8 }
 0x2a1   :  { %v8914_v26 = vpop.eup %7605  ;;  %6616 = vperm.xlu0 %7336, %v4309_v58   ;;  %v4049_v51 = vcombine.low %v4040_v34, %v4047_v16  ;;  %v4056_v29 = vrot.slane %v4048_v14, %v8044_v54  ;;  %v2967_v49 = vrot.slane %v8536_v47, %v8028_v42  ;;  %v2971_v22 = vrot.slane %v8536_v47, %v8033_v39 }
 0x2a2   :  { %v8922_v50 = vadd.f32 1.0, %v8172_v28  ;;  %7611 = vpow2.f32 %v1116_v27  ;;  %v2975_v2 = vrot.slane %v8536_v47, %v8036_v1  ;;  %v2979_v40 = vrot.slane %v8536_v47, %v8041_v45 }
 0x2a3   :  { %v8928_v33 = vpop.eup %7607  ;;  %v8931_v18 = vadd.f32 1.0, %v8860_v48  ;;  %v4063_v32 = vrot.slane %v4049_v51, %v8044_v54  ;;  %7613 = vpow2.f32 %v1180_v13  ;;  %v5829_v3 = vcombine.low %v2951_v61, %v2955_v41 }
 0x2a4   :  { %7615 = vrcp.f32 %v1250_v20  ;;  %v5830_v57 = vcombine.low %v2959_v9, %v2963_v62  ;;  %v5831_v28 = vcombine.low %v2967_v49, %v2971_v22  ;;  %v5832_v56 = vcombine.low %v2975_v2, %v2979_v40 }
 0x2a5   :  { %v4064_v27 = vcombine.low %v4056_v29, %v4063_v32  ;;  %v1057_v17 = vsub.f32 0.0, %v993_v15  ;;  %v5839_v34 = vrot.slane %v5829_v3, %v8044_v54  ;;  %v2791_v47 = vrot.slane %v8338_v37, %v8014_v36 }
 0x2a6   :  { %v5846_v21 = vrot.slane %v5830_v57, %v8044_v54  ;;  %v5853_v48 = vrot.slane %v5831_v28, %v8044_v54  ;;  %v5860_v58 = vrot.slane %v5832_v56, %v8044_v54  ;;  %v2795_v61 = vrot.slane %v8338_v37, %v8017_v60 }
 0x2a7   :  { %6601 = vperm.xlu1 %7335, %v4064_v27   ;;  %v2799_v20 = vrot.slane %v8338_v37, %v8022_v7  ;;  %v2803_v16 = vrot.slane %v8338_v37, %v8025_v8  ;;  %v2807_v14 = vrot.slane %v8338_v37, %v8028_v42  ;;  %v2811_v41 = vrot.slane %v8338_v37, %v8033_v39 }
 0x2a8   :  { %v5861_v15 = vcombine.low %v5839_v34, %v5846_v21  ;;  %v5862_v13 = vcombine.low %v5853_v48, %v5860_v58  ;;  %v2815_v9 = vrot.slane %v8338_v37, %v8036_v1  ;;  %v2819_v62 = vrot.slane %v8338_v37, %v8041_v45 }
 0x2a9   :  { %v8954_v51 = vpop.eup %7609  ;;  %v5584_v29 = vcombine.low %v2791_v47, %v2795_v61  ;;  %v5585_v49 = vcombine.low %v2799_v20, %v2803_v16  ;;  %v5586_v22 = vcombine.low %v2807_v14, %v2811_v41  ;;  %v2119_v2 = vrot.slane %v8578_v59, %v8014_v36 }
 0x2aa   :  { %v5869_v40 = vrot.slane %v5861_v15, %v8044_v54  ;;  %v5876_v32 = vrot.slane %v5862_v13, %v8044_v54  ;;  %v5587_v3 = vcombine.low %v2815_v9, %v2819_v62  ;;  %v2123_v57 = vrot.slane %v8578_v59, %v8017_v60 }
 0x2ab   :  { %v5594_v28 = vrot.slane %v5584_v29, %v8044_v54  ;;  %v5601_v37 = vrot.slane %v5585_v49, %v8044_v54  ;;  %v5608_v56 = vrot.slane %v5586_v22, %v8044_v54  ;;  %v2127_v27 = vrot.slane %v8578_v59, %v8022_v7 }
 0x2ac   :  { %v5877_v34 = vcombine.low %v5869_v40, %v5876_v32  ;;  %v5615_v47 = vrot.slane %v5587_v3, %v8044_v54  ;;  %v2131_v21 = vrot.slane %v8578_v59, %v8025_v8  ;;  %v2135_v48 = vrot.slane %v8578_v59, %v8028_v42 }
 0x2ad   :  { %v5616_v58 = vcombine.low %v5594_v28, %v5601_v37  ;;  %v2139_v61 = vrot.slane %v8578_v59, %v8033_v39  ;;  %v2143_v20 = vrot.slane %v8578_v59, %v8036_v1  ;;  %v2147_v16 = vrot.slane %v8578_v59, %v8041_v45 }
 0x2ae   :  { %v1182_v14 = vmul.f32 1.442695, %v1057_v17  ;;  %6712 = vperm.xlu0 %7336, %v5877_v34   ;;  %v5617_v41 = vcombine.low %v5608_v56, %v5615_v47  ;;  %v4555_v15 = vcombine.low %v2119_v2, %v2123_v57  ;;  %v4556_v13 = vcombine.low %v2127_v27, %v2131_v21 }
 0x2af   :  { %v8978_v9 = vpop.eup %7611  ;;  %v5624_v62 = vrot.slane %v5616_v58, %v8044_v54  ;;  %v4557_v29 = vcombine.low %v2135_v48, %v2139_v61  ;;  %v4558_v49 = vcombine.low %v2143_v20, %v2147_v16  ;;  %v2823_v22 = vrot.slane %v8334_v11, %v8014_v36 }
 0x2b0   :  { %v7614_v40 = vpop.eup %7613  ;;  %v5631_v32 = vrot.slane %v5617_v41, %v8044_v54  ;;  %v4565_v3 = vrot.slane %v4555_v15, %v8044_v54  ;;  %v4572_v59 = vrot.slane %v4556_v13, %v8044_v54  ;;  %v2827_v17 = vrot.slane %v8334_v11, %v8017_v60 }
 0x2b1   :  { %v8988_v2 = vpop.eup %7615  ;;  %v1248_v57 = vadd.f32 1.0, %v7614_v40  ;;  %v4579_v28 = vrot.slane %v4557_v29, %v8044_v54  ;;  %v4586_v37 = vrot.slane %v4558_v49, %v8044_v54  ;;  %v2831_v56 = vrot.slane %v8334_v11, %v8022_v7 }
 0x2b2   :  { %7617 = vpow2.f32 %v1182_v14  ;;  %v5632_v27 = vcombine.low %v5624_v62, %v5631_v32  ;;  %v4587_v34 = vcombine.low %v4565_v3, %v4572_v59  ;;  %v2835_v47 = vrot.slane %v8334_v11, %v8025_v8 }
 0x2b3   :  { %7619 = vrcp.f32 %v1248_v57  ;;  %v4588_v21 = vcombine.low %v4579_v28, %v4586_v37  ;;  %v2839_v48 = vrot.slane %v8334_v11, %v8028_v42  ;;  %v2843_v58 = vrot.slane %v8334_v11, %v8033_v39 }
 0x2b4   :  { %6697 = vperm.xlu1 %7335, %v5632_v27   ;;  %v4595_v61 = vrot.slane %v4587_v34, %v8044_v54  ;;  %v2847_v20 = vrot.slane %v8334_v11, %v8036_v1  ;;  %v2851_v16 = vrot.slane %v8334_v11, %v8041_v45  ;;  %v5633_v14 = vcombine.low %v2823_v22, %v2827_v17 }
 0x2b5   :  { %v4602_v41 = vrot.slane %v4588_v21, %v8044_v54  ;;  %v5634_v15 = vcombine.low %v2831_v56, %v2835_v47  ;;  %v5635_v13 = vcombine.low %v2839_v48, %v2843_v58  ;;  %v3143_v62 = vrot.slane %v8615_v46, %v8014_v36 }
 0x2b6   :  { %v5636_v29 = vcombine.low %v2847_v20, %v2851_v16  ;;  %v5643_v49 = vrot.slane %v5633_v14, %v8044_v54  ;;  %v3147_v40 = vrot.slane %v8615_v46, %v8017_v60  ;;  %v3151_v32 = vrot.slane %v8615_v46, %v8022_v7 }
 0x2b7   :  { %v4603_v3 = vcombine.low %v4595_v61, %v4602_v41  ;;  %v5650_v11 = vrot.slane %v5634_v15, %v8044_v54  ;;  %v5657_v22 = vrot.slane %v5635_v13, %v8044_v54  ;;  %v3155_v59 = vrot.slane %v8615_v46, %v8025_v8 }
 0x2b8   :  { %v5664_v17 = vrot.slane %v5636_v29, %v8044_v54  ;;  %v3159_v57 = vrot.slane %v8615_v46, %v8028_v42  ;;  %v3163_v28 = vrot.slane %v8615_v46, %v8033_v39  ;;  %v3167_v37 = vrot.slane %v8615_v46, %v8036_v1 }
 0x2b9   :  { %6634 = vperm.xlu0 %7336, %v4603_v3   ;;  %v5665_v56 = vcombine.low %v5643_v49, %v5650_v11  ;;  %v3171_v27 = vrot.slane %v8615_v46, %v8041_v45  ;;  %v6123_v34 = vcombine.low %v3143_v62, %v3147_v40  ;;  %v6124_v47 = vcombine.low %v3151_v32, %v3155_v59 }
 0x2ba   :  { %v5666_v21 = vcombine.low %v5657_v22, %v5664_v17  ;;  %v6125_v48 = vcombine.low %v3159_v57, %v3163_v28  ;;  %v1959_v58 = vrot.slane %v8387_v30, %v8014_v36  ;;  %v1963_v61 = vrot.slane %v8387_v30, %v8017_v60 }
 0x2bb   :  { %v5673_v20 = vrot.slane %v5665_v56, %v8044_v54  ;;  %v6126_v16 = vcombine.low %v3167_v37, %v3171_v27  ;;  %v6133_v14 = vrot.slane %v6123_v34, %v8044_v54  ;;  %v6140_v41 = vrot.slane %v6124_v47, %v8044_v54 }
 0x2bc   :  { %v5680_v15 = vrot.slane %v5666_v21, %v8044_v54  ;;  %v6147_v46 = vrot.slane %v6125_v48, %v8044_v54  ;;  %v1967_v13 = vrot.slane %v8387_v30, %v8022_v7  ;;  %v1971_v62 = vrot.slane %v8387_v30, %v8025_v8 }
 0x2bd   :  { %v6154_v29 = vrot.slane %v6126_v16, %v8044_v54  ;;  %v6155_v49 = vcombine.low %v6133_v14, %v6140_v41  ;;  %v1975_v40 = vrot.slane %v8387_v30, %v8028_v42  ;;  %v1979_v32 = vrot.slane %v8387_v30, %v8033_v39 }
 0x2be   :  { %v5681_v3 = vcombine.low %v5673_v20, %v5680_v15  ;;  %v1983_v11 = vrot.slane %v8387_v30, %v8036_v1  ;;  %v1987_v22 = vrot.slane %v8387_v30, %v8041_v45  ;;  %v4310_v59 = vcombine.low %v1959_v58, %v1963_v61 }
 0x2bf   :  { %v9048_v17 = vpop.eup %7617  ;;  %v6156_v57 = vcombine.low %v6147_v46, %v6154_v29  ;;  %v6163_v28 = vrot.slane %v6155_v49, %v8044_v54  ;;  %v4311_v37 = vcombine.low %v1967_v13, %v1971_v62  ;;  %v4312_v56 = vcombine.low %v1975_v40, %v1979_v32 }
 0x2c0   :  { %v9051_v27 = vpop.eup %7619  ;;  %6700 = vperm.xlu1 %7335, %v5681_v3   ;;  %v4313_v34 = vcombine.low %v1983_v11, %v1987_v22  ;;  %v4320_v47 = vrot.slane %v4310_v59, %v8044_v54  ;;  %v2055_v21 = vrot.slane %v8665_v23, %v8014_v36  ;;  %v2059_v30 = vrot.slane %v8665_v23, %v8017_v60 }
 0x2c1   :  { %v6170_v48 = vrot.slane %v6156_v57, %v8044_v54  ;;  %v4327_v58 = vrot.slane %v4311_v37, %v8044_v54  ;;  %v4334_v61 = vrot.slane %v4312_v56, %v8044_v54  ;;  %v2063_v20 = vrot.slane %v8665_v23, %v8022_v7 }
 0x2c2   :  { %v4341_v16 = vrot.slane %v4313_v34, %v8044_v54  ;;  %v2067_v14 = vrot.slane %v8665_v23, %v8025_v8  ;;  %v2071_v41 = vrot.slane %v8665_v23, %v8028_v42  ;;  %v2075_v15 = vrot.slane %v8665_v23, %v8033_v39 }
 0x2c3   :  { %v6171_v46 = vcombine.low %v6163_v28, %v6170_v48  ;;  %v4342_v13 = vcombine.low %v4320_v47, %v4327_v58  ;;  %v2079_v62 = vrot.slane %v8665_v23, %v8036_v1  ;;  %v2083_v29 = vrot.slane %v8665_v23, %v8041_v45 }
 0x2c4   :  { %v4343_v49 = vcombine.low %v4334_v61, %v4341_v16  ;;  %v4457_v40 = vcombine.low %v2055_v21, %v2059_v30  ;;  %v4458_v32 = vcombine.low %v2063_v20, %v2067_v14  ;;  %v4459_v3 = vcombine.low %v2071_v41, %v2075_v15 }
 0x2c5   :  { %6730 = vperm.xlu0 %7336, %v6171_v46   ;;  %v4350_v11 = vrot.slane %v4342_v13, %v8044_v54  ;;  %v4460_v22 = vcombine.low %v2079_v62, %v2083_v29  ;;  %v2983_v59 = vrot.slane %v8461_v44, %v8014_v36  ;;  %v2987_v57 = vrot.slane %v8461_v44, %v8017_v60 }
 0x2c6   :  { %v4357_v28 = vrot.slane %v4343_v49, %v8044_v54  ;;  %v4467_v37 = vrot.slane %v4457_v40, %v8044_v54  ;;  %v4474_v23 = vrot.slane %v4458_v32, %v8044_v54  ;;  %v4481_v56 = vrot.slane %v4459_v3, %v8044_v54 }
 0x2c7   :  { %v4488_v34 = vrot.slane %v4460_v22, %v8044_v54  ;;  %v2991_v47 = vrot.slane %v8461_v44, %v8022_v7  ;;  %v2995_v21 = vrot.slane %v8461_v44, %v8025_v8  ;;  %v2999_v30 = vrot.slane %v8461_v44, %v8028_v42 }
 0x2c8   :  { %v4358_v48 = vcombine.low %v4350_v11, %v4357_v28  ;;  %v4489_v58 = vcombine.low %v4467_v37, %v4474_v23  ;;  %v3003_v61 = vrot.slane %v8461_v44, %v8033_v39  ;;  %v3007_v20 = vrot.slane %v8461_v44, %v8036_v1 }
 0x2c9   :  { %v4490_v16 = vcombine.low %v4481_v56, %v4488_v34  ;;  %v3011_v14 = vrot.slane %v8461_v44, %v8041_v45  ;;  %v5878_v41 = vcombine.low %v2983_v59, %v2987_v57  ;;  %v5879_v15 = vcombine.low %v2991_v47, %v2995_v21 }
 0x2ca   :  { %6619 = vperm.xlu1 %7335, %v4358_v48   ;;  %v4497_v46 = vrot.slane %v4489_v58, %v8044_v54  ;;  %v5880_v13 = vcombine.low %v2999_v30, %v3003_v61  ;;  %v3079_v62 = vrot.slane %v8714_v19, %v8014_v36  ;;  %v3083_v29 = vrot.slane %v8714_v19, %v8017_v60 }
 0x2cb   :  { %v4504_v49 = vrot.slane %v4490_v16, %v8044_v54  ;;  %v5881_v40 = vcombine.low %v3007_v20, %v3011_v14  ;;  %v5888_v32 = vrot.slane %v5878_v41, %v8044_v54  ;;  %v5895_v3 = vrot.slane %v5879_v15, %v8044_v54 }
 0x2cc   :  { %v5902_v44 = vrot.slane %v5880_v13, %v8044_v54  ;;  %v3087_v11 = vrot.slane %v8714_v19, %v8022_v7  ;;  %v3091_v22 = vrot.slane %v8714_v19, %v8025_v8  ;;  %v3095_v59 = vrot.slane %v8714_v19, %v8028_v42 }
 0x2cd   :  { %v4505_v57 = vcombine.low %v4497_v46, %v4504_v49  ;;  %v5909_v28 = vrot.slane %v5881_v40, %v8044_v54  ;;  %v5910_v37 = vcombine.low %v5888_v32, %v5895_v3  ;;  %v3099_v23 = vrot.slane %v8714_v19, %v8033_v39 }
 0x2ce   :  { %v3103_v56 = vrot.slane %v8714_v19, %v8036_v1  ;;  %v3107_v34 = vrot.slane %v8714_v19, %v8041_v45  ;;  %v6025_v47 = vcombine.low %v3079_v62, %v3083_v29  ;;  %v6026_v21 = vcombine.low %v3087_v11, %v3091_v22 }
 0x2cf   :  { %6628 = vperm.xlu0 %7336, %v4505_v57   ;;  %v5911_v30 = vcombine.low %v5902_v44, %v5909_v28  ;;  %v5918_v48 = vrot.slane %v5910_v37, %v8044_v54  ;;  %v6027_v58 = vcombine.low %v3095_v59, %v3099_v23  ;;  %v1895_v61 = vrot.slane %v8480_v31, %v8014_v36 }
 0x2d0   :  { %v6028_v20 = vcombine.low %v3103_v56, %v3107_v34  ;;  %v6035_v16 = vrot.slane %v6025_v47, %v8044_v54  ;;  %v6042_v14 = vrot.slane %v6026_v21, %v8044_v54  ;;  %v1899_v41 = vrot.slane %v8480_v31, %v8017_v60 }
 0x2d1   :  { %v5925_v19 = vrot.slane %v5911_v30, %v8044_v54  ;;  %v6049_v15 = vrot.slane %v6027_v58, %v8044_v54  ;;  %v1903_v46 = vrot.slane %v8480_v31, %v8022_v7  ;;  %v1907_v13 = vrot.slane %v8480_v31, %v8025_v8 }
 0x2d2   :  { %v6056_v62 = vrot.slane %v6028_v20, %v8044_v54  ;;  %v6057_v29 = vcombine.low %v6035_v16, %v6042_v14  ;;  %v1911_v49 = vrot.slane %v8480_v31, %v8028_v42  ;;  %v1915_v40 = vrot.slane %v8480_v31, %v8033_v39 }
 0x2d3   :  { %v5926_v32 = vcombine.low %v5918_v48, %v5925_v19  ;;  %v1919_v3 = vrot.slane %v8480_v31, %v8036_v1  ;;  %v1923_v44 = vrot.slane %v8480_v31, %v8041_v45  ;;  %v4212_v11 = vcombine.low %v1895_v61, %v1899_v41 }
 0x2d4   :  { %v6058_v22 = vcombine.low %v6049_v15, %v6056_v62  ;;  %v6065_v59 = vrot.slane %v6057_v29, %v8044_v54  ;;  %v4213_v57 = vcombine.low %v1903_v46, %v1907_v13  ;;  %v4214_v28 = vcombine.low %v1911_v49, %v1915_v40 }
 0x2d5   :  { %6715 = vperm.xlu1 %7335, %v5926_v32   ;;  %v4215_v37 = vcombine.low %v1919_v3, %v1923_v44  ;;  %v4222_v23 = vrot.slane %v4212_v11, %v8044_v54  ;;  %v2919_v56 = vrot.slane %v8538_v38, %v8014_v36  ;;  %v2923_v34 = vrot.slane %v8538_v38, %v8017_v60 }
 0x2d6   :  { %v6072_v47 = vrot.slane %v6058_v22, %v8044_v54  ;;  %v4229_v31 = vrot.slane %v4213_v57, %v8044_v54  ;;  %v4236_v21 = vrot.slane %v4214_v28, %v8044_v54  ;;  %v2927_v30 = vrot.slane %v8538_v38, %v8022_v7 }
 0x2d7   :  { %v4243_v48 = vrot.slane %v4215_v37, %v8044_v54  ;;  %v2931_v58 = vrot.slane %v8538_v38, %v8025_v8  ;;  %v2935_v61 = vrot.slane %v8538_v38, %v8028_v42  ;;  %v2939_v20 = vrot.slane %v8538_v38, %v8033_v39 }
 0x2d8   :  { %v6073_v16 = vcombine.low %v6065_v59, %v6072_v47  ;;  %v4244_v14 = vcombine.low %v4222_v23, %v4229_v31  ;;  %v2943_v41 = vrot.slane %v8538_v38, %v8036_v1  ;;  %v2947_v19 = vrot.slane %v8538_v38, %v8041_v45 }
 0x2d9   :  { %v4245_v15 = vcombine.low %v4236_v21, %v4243_v48  ;;  %v5780_v46 = vcombine.low %v2919_v56, %v2923_v34  ;;  %v5781_v13 = vcombine.low %v2927_v30, %v2931_v58  ;;  %v5782_v62 = vcombine.low %v2935_v61, %v2939_v20 }
 0x2da   :  { %6724 = vperm.xlu0 %7336, %v6073_v16   ;;  %v4252_v29 = vrot.slane %v4244_v14, %v8044_v54  ;;  %v5783_v49 = vcombine.low %v2943_v41, %v2947_v19  ;;  %v2087_v40 = vrot.slane %v8604_v52, %v8014_v36  ;;  %v2091_v32 = vrot.slane %v8604_v52, %v8017_v60 }
 0x2db   :  { %v4259_v3 = vrot.slane %v4245_v15, %v8044_v54  ;;  %v5790_v44 = vrot.slane %v5780_v46, %v8044_v54  ;;  %v5797_v38 = vrot.slane %v5781_v13, %v8044_v54  ;;  %v5804_v11 = vrot.slane %v5782_v62, %v8044_v54 }
 0x2dc   :  { %v5811_v22 = vrot.slane %v5783_v49, %v8044_v54  ;;  %v2095_v59 = vrot.slane %v8604_v52, %v8022_v7  ;;  %v2099_v57 = vrot.slane %v8604_v52, %v8025_v8  ;;  %v2103_v28 = vrot.slane %v8604_v52, %v8028_v42 }
 0x2dd   :  { %v4260_v37 = vcombine.low %v4252_v29, %v4259_v3  ;;  %v5812_v23 = vcombine.low %v5790_v44, %v5797_v38  ;;  %v2107_v56 = vrot.slane %v8604_v52, %v8033_v39  ;;  %v2111_v34 = vrot.slane %v8604_v52, %v8036_v1 }
 0x2de   :  { %v5813_v47 = vcombine.low %v5804_v11, %v5811_v22  ;;  %v2115_v31 = vrot.slane %v8604_v52, %v8041_v45  ;;  %v4506_v21 = vcombine.low %v2087_v40, %v2091_v32  ;;  %v4507_v30 = vcombine.low %v2095_v59, %v2099_v57 }
 0x2df   :  { %6613 = vperm.xlu1 %7335, %v4260_v37   ;;  %v5820_v48 = vrot.slane %v5812_v23, %v8044_v54  ;;  %v4508_v58 = vcombine.low %v2103_v28, %v2107_v56  ;;  %v3239_v61 = vrot.slane %v8840_v0, %v8014_v36  ;;  %v3243_v20 = vrot.slane %v8840_v0, %v8017_v60 }
 0x2e0   :  { %v5827_v16 = vrot.slane %v5813_v47, %v8044_v54  ;;  %v4509_v14 = vcombine.low %v2111_v34, %v2115_v31  ;;  %v4516_v41 = vrot.slane %v4506_v21, %v8044_v54  ;;  %v4523_v19 = vrot.slane %v4507_v30, %v8044_v54 }
 0x2e1   :  { %v4530_v52 = vrot.slane %v4508_v58, %v8044_v54  ;;  %v3247_v15 = vrot.slane %v8840_v0, %v8022_v7  ;;  %v3251_v46 = vrot.slane %v8840_v0, %v8025_v8  ;;  %v3255_v13 = vrot.slane %v8840_v0, %v8028_v42 }
 0x2e2   :  { %v5828_v62 = vcombine.low %v5820_v48, %v5827_v16  ;;  %v4537_v29 = vrot.slane %v4509_v14, %v8044_v54  ;;  %v4538_v49 = vcombine.low %v4516_v41, %v4523_v19  ;;  %v3259_v40 = vrot.slane %v8840_v0, %v8033_v39 }
 0x2e3   :  { %v3263_v32 = vrot.slane %v8840_v0, %v8036_v1  ;;  %v3267_v3 = vrot.slane %v8840_v0, %v8041_v45  ;;  %v6270_v44 = vcombine.low %v3239_v61, %v3243_v20  ;;  %v6271_v38 = vcombine.low %v3247_v15, %v3251_v46 }
 0x2e4   :  { %6709 = vperm.xlu1 %7335, %v5828_v62   ;;  %v4539_v11 = vcombine.low %v4530_v52, %v4537_v29  ;;  %v4546_v22 = vrot.slane %v4538_v49, %v8044_v54  ;;  %v6272_v59 = vcombine.low %v3255_v13, %v3259_v40  ;;  %v3111_v57 = vrot.slane %v8618_v12, %v8014_v36 }
 0x2e5   :  { %v6273_v28 = vcombine.low %v3263_v32, %v3267_v3  ;;  %v6280_v37 = vrot.slane %v6270_v44, %v8044_v54  ;;  %v6287_v23 = vrot.slane %v6271_v38, %v8044_v54  ;;  %v3115_v56 = vrot.slane %v8618_v12, %v8017_v60 }
 0x2e6   :  { %v4553_v0 = vrot.slane %v4539_v11, %v8044_v54  ;;  %v6294_v34 = vrot.slane %v6272_v59, %v8044_v54  ;;  %v3119_v47 = vrot.slane %v8618_v12, %v8022_v7  ;;  %v3123_v31 = vrot.slane %v8618_v12, %v8025_v8 }
 0x2e7   :  { %v6301_v21 = vrot.slane %v6273_v28, %v8044_v54  ;;  %v6302_v30 = vcombine.low %v6280_v37, %v6287_v23  ;;  %v3127_v48 = vrot.slane %v8618_v12, %v8028_v42  ;;  %v3131_v58 = vrot.slane %v8618_v12, %v8033_v39 }
 0x2e8   :  { %v4554_v61 = vcombine.low %v4546_v22, %v4553_v0  ;;  %v3135_v20 = vrot.slane %v8618_v12, %v8036_v1  ;;  %v3139_v16 = vrot.slane %v8618_v12, %v8041_v45  ;;  %v6074_v14 = vcombine.low %v3111_v57, %v3115_v56 }
 0x2e9   :  { %v6303_v41 = vcombine.low %v6294_v34, %v6301_v21  ;;  %v6310_v19 = vrot.slane %v6302_v30, %v8044_v54  ;;  %v6075_v52 = vcombine.low %v3119_v47, %v3123_v31  ;;  %v6076_v15 = vcombine.low %v3127_v48, %v3131_v58 }
 0x2ea   :  { %6631 = vperm.xlu1 %7335, %v4554_v61   ;;  %v6077_v46 = vcombine.low %v3135_v20, %v3139_v16  ;;  %v6084_v13 = vrot.slane %v6074_v14, %v8044_v54  ;;  %v2247_v62 = vrot.slane %v8781_v43, %v8014_v36  ;;  %v2251_v29 = vrot.slane %v8781_v43, %v8017_v60 }
 0x2eb   :  { %v6317_v49 = vrot.slane %v6303_v41, %v8044_v54  ;;  %v6091_v12 = vrot.slane %v6075_v52, %v8044_v54  ;;  %v6098_v40 = vrot.slane %v6076_v15, %v8044_v54  ;;  %v2255_v32 = vrot.slane %v8781_v43, %v8022_v7 }
 0x2ec   :  { %v6105_v3 = vrot.slane %v6077_v46, %v8044_v54  ;;  %v2259_v44 = vrot.slane %v8781_v43, %v8025_v8  ;;  %v2263_v38 = vrot.slane %v8781_v43, %v8028_v42  ;;  %v2267_v11 = vrot.slane %v8781_v43, %v8033_v39 }
 0x2ed   :  { %v6318_v22 = vcombine.low %v6310_v19, %v6317_v49  ;;  %v6106_v59 = vcombine.low %v6084_v13, %v6091_v12  ;;  %v2271_v57 = vrot.slane %v8781_v43, %v8036_v1  ;;  %v2275_v28 = vrot.slane %v8781_v43, %v8041_v45 }
 0x2ee   :  { %v6107_v37 = vcombine.low %v6098_v40, %v6105_v3  ;;  %v4751_v23 = vcombine.low %v2247_v62, %v2251_v29  ;;  %v4752_v56 = vcombine.low %v2255_v32, %v2259_v44  ;;  %v4753_v0 = vcombine.low %v2263_v38, %v2267_v11 }
 0x2ef   :  { %6739 = vperm.xlu0 %7336, %v6318_v22   ;;  %v6114_v34 = vrot.slane %v6106_v59, %v8044_v54  ;;  %v4754_v47 = vcombine.low %v2271_v57, %v2275_v28  ;;  %v2023_v31 = vrot.slane %v8669_v5, %v8014_v36  ;;  %v2027_v21 = vrot.slane %v8669_v5, %v8017_v60 }
 0x2f0   :  { %v6121_v30 = vrot.slane %v6107_v37, %v8044_v54  ;;  %v4761_v48 = vrot.slane %v4751_v23, %v8044_v54  ;;  %v4768_v43 = vrot.slane %v4752_v56, %v8044_v54  ;;  %v4775_v58 = vrot.slane %v4753_v0, %v8044_v54 }
 0x2f1   :  { %v4782_v61 = vrot.slane %v4754_v47, %v8044_v54  ;;  %v2031_v20 = vrot.slane %v8669_v5, %v8022_v7  ;;  %v2035_v16 = vrot.slane %v8669_v5, %v8025_v8  ;;  %v2039_v14 = vrot.slane %v8669_v5, %v8028_v42 }
 0x2f2   :  { %v6122_v41 = vcombine.low %v6114_v34, %v6121_v30  ;;  %v4783_v19 = vcombine.low %v4761_v48, %v4768_v43  ;;  %v2043_v52 = vrot.slane %v8669_v5, %v8033_v39  ;;  %v2047_v15 = vrot.slane %v8669_v5, %v8036_v1 }
 0x2f3   :  { %v4784_v46 = vcombine.low %v4775_v58, %v4782_v61  ;;  %v2051_v13 = vrot.slane %v8669_v5, %v8041_v45  ;;  %v4408_v62 = vcombine.low %v2023_v31, %v2027_v21  ;;  %v4409_v29 = vcombine.low %v2031_v20, %v2035_v16 }
 0x2f4   :  { %6727 = vperm.xlu1 %7335, %v6122_v41   ;;  %v4791_v49 = vrot.slane %v4783_v19, %v8044_v54  ;;  %v4410_v12 = vcombine.low %v2039_v14, %v2043_v52  ;;  %v3271_v40 = vrot.slane %v8806_v63, %v8014_v36  ;;  %v3275_v32 = vrot.slane %v8806_v63, %v8017_v60 }
 0x2f5   :  { %v4798_v3 = vrot.slane %v4784_v46, %v8044_v54  ;;  %v4411_v44 = vcombine.low %v2047_v15, %v2051_v13  ;;  %v4418_v38 = vrot.slane %v4408_v62, %v8044_v54  ;;  %v4425_v11 = vrot.slane %v4409_v29, %v8044_v54  ;;  %v9312_v62 = vpop.permute.xlu1 %6571 }
 0x2f6   :  { %v4432_v5 = vrot.slane %v4410_v12, %v8044_v54  ;;  %v3279_v22 = vrot.slane %v8806_v63, %v8022_v7  ;;  %v3283_v59 = vrot.slane %v8806_v63, %v8025_v8  ;;  %v3287_v57 = vrot.slane %v8806_v63, %v8028_v42 }
 0x2f7   :  { %v4799_v28 = vcombine.low %v4791_v49, %v4798_v3  ;;  %v4439_v37 = vrot.slane %v4411_v44, %v8044_v54  ;;  %v4440_v23 = vcombine.low %v4418_v38, %v4425_v11  ;;  %v3291_v56 = vrot.slane %v8806_v63, %v8033_v39 }
 0x2f8   :  { %v3295_v0 = vrot.slane %v8806_v63, %v8036_v1  ;;  %v3299_v34 = vrot.slane %v8806_v63, %v8041_v45  ;;  %v6319_v47 = vcombine.low %v3271_v40, %v3275_v32  ;;  %v6320_v31 = vcombine.low %v3279_v22, %v3283_v59 }
 0x2f9   :  { %6646 = vperm.xlu0 %7336, %v4799_v28   ;;  %v4441_v21 = vcombine.low %v4432_v5, %v4439_v37  ;;  %v4448_v30 = vrot.slane %v4440_v23, %v8044_v54  ;;  %v6321_v48 = vcombine.low %v3287_v57, %v3291_v56  ;;  %v3047_v43 = vrot.slane %v8751_v55, %v8014_v36 }
 0x2fa   :  { %v6322_v58 = vcombine.low %v3295_v0, %v3299_v34  ;;  %v6329_v61 = vrot.slane %v6319_v47, %v8044_v54  ;;  %v6336_v20 = vrot.slane %v6320_v31, %v8044_v54  ;;  %v3051_v16 = vrot.slane %v8751_v55, %v8017_v60 }
 0x2fb   :  { %v4455_v63 = vrot.slane %v4441_v21, %v8044_v54  ;;  %v6343_v14 = vrot.slane %v6321_v48, %v8044_v54  ;;  %v3055_v41 = vrot.slane %v8751_v55, %v8022_v7  ;;  %v3059_v19 = vrot.slane %v8751_v55, %v8025_v8  ;;  %v9340_v48 = vpop.permute.xlu1 %6667 }
 0x2fc   :  { %v6350_v52 = vrot.slane %v6322_v58, %v8044_v54  ;;  %v6351_v15 = vcombine.low %v6329_v61, %v6336_v20  ;;  %v3063_v46 = vrot.slane %v8751_v55, %v8028_v42  ;;  %v3067_v13 = vrot.slane %v8751_v55, %v8033_v39 }
 0x2fd   :  { %v4456_v29 = vcombine.low %v4448_v30, %v4455_v63  ;;  %v3071_v49 = vrot.slane %v8751_v55, %v8036_v1  ;;  %v3075_v12 = vrot.slane %v8751_v55, %v8041_v45  ;;  %v5976_v40 = vcombine.low %v3047_v43, %v3051_v16 }
 0x2fe   :  { %v6352_v32 = vcombine.low %v6343_v14, %v6350_v52  ;;  %v6359_v3 = vrot.slane %v6351_v15, %v8044_v54  ;;  %v5977_v44 = vcombine.low %v3055_v41, %v3059_v19  ;;  %v5978_v38 = vcombine.low %v3063_v46, %v3067_v13 }
 0x2ff   :  { %6625 = vperm.xlu1 %7335, %v4456_v29   ;;  %v5979_v11 = vcombine.low %v3071_v49, %v3075_v12  ;;  %v5986_v5 = vrot.slane %v5976_v40, %v8044_v54  ;;  %v2183_v22 = vrot.slane %v8843_v25, %v8014_v36  ;;  %v2187_v59 = vrot.slane %v8843_v25, %v8017_v60 }
 0x300   :  { %v6366_v57 = vrot.slane %v6352_v32, %v8044_v54  ;;  %v5993_v55 = vrot.slane %v5977_v44, %v8044_v54  ;;  %v6000_v28 = vrot.slane %v5978_v38, %v8044_v54  ;;  %v2191_v37 = vrot.slane %v8843_v25, %v8022_v7 }
 0x301   :  { %v6007_v23 = vrot.slane %v5979_v11, %v8044_v54  ;;  %v2195_v56 = vrot.slane %v8843_v25, %v8025_v8  ;;  %v2199_v0 = vrot.slane %v8843_v25, %v8028_v42  ;;  %v2203_v34 = vrot.slane %v8843_v25, %v8033_v39 }
 0x302   :  { %v6367_v47 = vcombine.low %v6359_v3, %v6366_v57  ;;  %v6008_v31 = vcombine.low %v5986_v5, %v5993_v55  ;;  %v2207_v21 = vrot.slane %v8843_v25, %v8036_v1  ;;  %v2211_v30 = vrot.slane %v8843_v25, %v8041_v45 }
 0x303   :  { %v6009_v43 = vcombine.low %v6000_v28, %v6007_v23  ;;  %v4653_v58 = vcombine.low %v2183_v22, %v2187_v59  ;;  %v4654_v61 = vcombine.low %v2191_v37, %v2195_v56  ;;  %v4655_v20 = vcombine.low %v2199_v0, %v2203_v34  ;;  %v9364_v22 = vpop.permute.xlu1 %6661 }
 0x304   :  { %6742 = vperm.xlu0 %7336, %v6367_v47   ;;  %v6016_v16 = vrot.slane %v6008_v31, %v8044_v54  ;;  %v4656_v63 = vcombine.low %v2207_v21, %v2211_v30  ;;  %v2215_v14 = vrot.slane %v8790_v6, %v8014_v36  ;;  %v2219_v41 = vrot.slane %v8790_v6, %v8017_v60 }
 0x305   :  { %v6023_v19 = vrot.slane %v6009_v43, %v8044_v54  ;;  %v4663_v25 = vrot.slane %v4653_v58, %v8044_v54  ;;  %v4670_v52 = vrot.slane %v4654_v61, %v8044_v54  ;;  %v4677_v15 = vrot.slane %v4655_v20, %v8044_v54 }
 0x306   :  { %v4684_v46 = vrot.slane %v4656_v63, %v8044_v54  ;;  %v2223_v13 = vrot.slane %v8790_v6, %v8022_v7  ;;  %v2227_v29 = vrot.slane %v8790_v6, %v8025_v8  ;;  %v2231_v49 = vrot.slane %v8790_v6, %v8028_v42 }
 0x307   :  { %v6024_v12 = vcombine.low %v6016_v16, %v6023_v19  ;;  %v4685_v40 = vcombine.low %v4663_v25, %v4670_v52  ;;  %v2235_v32 = vrot.slane %v8790_v6, %v8033_v39  ;;  %v2239_v3 = vrot.slane %v8790_v6, %v8036_v1  ;;  %v9391_v52 = vpop.permute.xlu1 %6574 }
 0x308   :  { %v4686_v44 = vcombine.low %v4677_v15, %v4684_v46  ;;  %v2243_v38 = vrot.slane %v8790_v6, %v8041_v45  ;;  %v4702_v11 = vcombine.low %v2215_v14, %v2219_v41  ;;  %v4703_v5 = vcombine.low %v2223_v13, %v2227_v29 }
 0x309   :  { %6721 = vperm.xlu1 %7335, %v6024_v12   ;;  %v4693_v59 = vrot.slane %v4685_v40, %v8044_v54  ;;  %v4704_v57 = vcombine.low %v2231_v49, %v2235_v32  ;;  %v3207_v55 = vrot.slane %v8874_v4, %v8014_v36  ;;  %v3211_v28 = vrot.slane %v8874_v4, %v8017_v60 }
 0x30a   :  { %v4700_v37 = vrot.slane %v4686_v44, %v8044_v54  ;;  %v4705_v23 = vcombine.low %v2239_v3, %v2243_v38  ;;  %v4712_v56 = vrot.slane %v4702_v11, %v8044_v54  ;;  %v4719_v6 = vrot.slane %v4703_v5, %v8044_v54 }
 0x30b   :  { %v4726_v0 = vrot.slane %v4704_v57, %v8044_v54  ;;  %v3215_v34 = vrot.slane %v8874_v4, %v8022_v7  ;;  %v3219_v47 = vrot.slane %v8874_v4, %v8025_v8  ;;  %v3223_v31 = vrot.slane %v8874_v4, %v8028_v42 }
 0x30c   :  { %v4701_v21 = vcombine.low %v4693_v59, %v4700_v37  ;;  %v4733_v30 = vrot.slane %v4705_v23, %v8044_v54  ;;  %v4734_v43 = vcombine.low %v4712_v56, %v4719_v6  ;;  %v3227_v58 = vrot.slane %v8874_v4, %v8033_v39 }
 0x30d   :  { %v3231_v61 = vrot.slane %v8874_v4, %v8036_v1  ;;  %v3235_v20 = vrot.slane %v8874_v4, %v8041_v45  ;;  %v6221_v16 = vcombine.low %v3207_v55, %v3211_v28  ;;  %v6222_v63 = vcombine.low %v3215_v34, %v3219_v47  ;;  %v9418_v47 = vpop.permute.xlu1 %6568 }
 0x30e   :  { %6640 = vperm.xlu0 %7336, %v4701_v21   ;;  %v4735_v14 = vcombine.low %v4726_v0, %v4733_v30  ;;  %v4742_v41 = vrot.slane %v4734_v43, %v8044_v54  ;;  %v6223_v19 = vcombine.low %v3223_v31, %v3227_v58  ;;  %v2151_v25 = vrot.slane %v8847_v10, %v8014_v36 }
 0x30f   :  { %v6224_v15 = vcombine.low %v3231_v61, %v3235_v20  ;;  %v6231_v46 = vrot.slane %v6221_v16, %v8044_v54  ;;  %v6238_v13 = vrot.slane %v6222_v63, %v8044_v54  ;;  %v2155_v4 = vrot.slane %v8847_v10, %v8017_v60 }
 0x310   :  { %v4749_v29 = vrot.slane %v4735_v14, %v8044_v54  ;;  %v6245_v49 = vrot.slane %v6223_v19, %v8044_v54  ;;  %v2159_v12 = vrot.slane %v8847_v10, %v8022_v7  ;;  %v2163_v40 = vrot.slane %v8847_v10, %v8025_v8 }
 0x311   :  { %v6252_v32 = vrot.slane %v6224_v15, %v8044_v54  ;;  %v6253_v3 = vcombine.low %v6231_v46, %v6238_v13  ;;  %v2167_v44 = vrot.slane %v8847_v10, %v8028_v42  ;;  %v2171_v38 = vrot.slane %v8847_v10, %v8033_v39 }
 0x312   :  { %v4750_v11 = vcombine.low %v4742_v41, %v4749_v29  ;;  %v2175_v5 = vrot.slane %v8847_v10, %v8036_v1  ;;  %v2179_v59 = vrot.slane %v8847_v10, %v8041_v45  ;;  %v4604_v57 = vcombine.low %v2151_v25, %v2155_v4 }
 0x313   :  { %v6254_v55 = vcombine.low %v6245_v49, %v6252_v32  ;;  %v6261_v28 = vrot.slane %v6253_v3, %v8044_v54  ;;  %v4605_v37 = vcombine.low %v2159_v12, %v2163_v40  ;;  %v4606_v23 = vcombine.low %v2167_v44, %v2171_v38  ;;  %v9444_v32 = vpop.permute.xlu1 %6583 }
 0x314   :  { %6643 = vperm.xlu1 %7335, %v4750_v11   ;;  %v4607_v56 = vcombine.low %v2175_v5, %v2179_v59  ;;  %v4614_v6 = vrot.slane %v4604_v57, %v8044_v54  ;;  %v3367_v0 = vrot.slane %v8988_v2, %v8014_v36  ;;  %v3371_v34 = vrot.slane %v8988_v2, %v8017_v60 }
 0x315   :  { %v6268_v10 = vrot.slane %v6254_v55, %v8044_v54  ;;  %v4621_v31 = vrot.slane %v4605_v37, %v8044_v54  ;;  %v4628_v21 = vrot.slane %v4606_v23, %v8044_v54  ;;  %v3375_v30 = vrot.slane %v8988_v2, %v8022_v7 }
 0x316   :  { %v4635_v43 = vrot.slane %v4607_v56, %v8044_v54  ;;  %v3379_v58 = vrot.slane %v8988_v2, %v8025_v8  ;;  %v3383_v61 = vrot.slane %v8988_v2, %v8028_v42  ;;  %v3387_v20 = vrot.slane %v8988_v2, %v8033_v39 }
 0x317   :  { %v6269_v16 = vcombine.low %v6261_v28, %v6268_v10  ;;  %v4636_v63 = vcombine.low %v4614_v6, %v4621_v31  ;;  %v3391_v14 = vrot.slane %v8988_v2, %v8036_v1  ;;  %v3395_v41 = vrot.slane %v8988_v2, %v8041_v45 }
 0x318   :  { %v4637_v19 = vcombine.low %v4628_v21, %v4635_v43  ;;  %v6466_v25 = vcombine.low %v3367_v0, %v3371_v34  ;;  %v6467_v15 = vcombine.low %v3375_v30, %v3379_v58  ;;  %v6468_v46 = vcombine.low %v3383_v61, %v3387_v20  ;;  %v9471_v58 = vpop.permute.xlu1 %6679 }
 0x319   :  { %7621 = vrcp.f32 %v8931_v18  ;;  %6736 = vperm.xlu0 %7336, %v6269_v16   ;;  %v4644_v13 = vrot.slane %v4636_v63, %v8044_v54  ;;  %v6469_v4 = vcombine.low %v3391_v14, %v3395_v41  ;;  %v3175_v29 = vrot.slane %v8883_v35, %v8014_v36 }
 0x31a   :  { %v4651_v49 = vrot.slane %v4637_v19, %v8044_v54  ;;  %v6476_v12 = vrot.slane %v6466_v25, %v8044_v54  ;;  %v6483_v40 = vrot.slane %v6467_v15, %v8044_v54  ;;  %v6490_v2 = vrot.slane %v6468_v46, %v8044_v54 }
 0x31b   :  { %v1216_v3 = vadd.f32 1.0, %v8978_v9  ;;  %v6497_v18 = vrot.slane %v6469_v4, %v8044_v54  ;;  %v3179_v44 = vrot.slane %v8883_v35, %v8017_v60  ;;  %v3183_v38 = vrot.slane %v8883_v35, %v8022_v7 }
 0x31c   :  { %v4652_v11 = vcombine.low %v4644_v13, %v4651_v49  ;;  %v6498_v5 = vcombine.low %v6476_v12, %v6483_v40  ;;  %v3187_v59 = vrot.slane %v8883_v35, %v8025_v8  ;;  %v3191_v57 = vrot.slane %v8883_v35, %v8028_v42 }
 0x31d   :  { %v1217_v55 = vadd.f32 1.0, %v8954_v51  ;;  %v6499_v28 = vcombine.low %v6490_v2, %v6497_v18  ;;  %v3195_v9 = vrot.slane %v8883_v35, %v8033_v39  ;;  %v3199_v37 = vrot.slane %v8883_v35, %v8036_v1 }
 0x31e   :  { %6637 = vperm.xlu1 %7335, %v4652_v11   ;;  %v6506_v23 = vrot.slane %v6498_v5, %v8044_v54  ;;  %v3203_v56 = vrot.slane %v8883_v35, %v8041_v45  ;;  %v6172_v6 = vcombine.low %v3175_v29, %v3179_v44  ;;  %v6173_v0 = vcombine.low %v3183_v38, %v3187_v59  ;;  %v9497_v38 = vpop.permute.xlu1 %6577 }
 0x31f   :  { %7623 = vrcp.f32 %v1216_v3  ;;  %v6513_v34 = vrot.slane %v6499_v28, %v8044_v54  ;;  %v6174_v10 = vcombine.low %v3191_v57, %v3195_v9  ;;  %v3303_v51 = vrot.slane %v9051_v27, %v8014_v36 }
 0x320   :  { %v6175_v31 = vcombine.low %v3199_v37, %v3203_v56  ;;  %v6182_v21 = vrot.slane %v6172_v6, %v8044_v54  ;;  %v6189_v30 = vrot.slane %v6173_v0, %v8044_v54  ;;  %v3307_v43 = vrot.slane %v9051_v27, %v8017_v60 }
 0x321   :  { %v6514_v35 = vcombine.low %v6506_v23, %v6513_v34  ;;  %v6196_v61 = vrot.slane %v6174_v10, %v8044_v54  ;;  %v3311_v20 = vrot.slane %v9051_v27, %v8022_v7  ;;  %v3315_v16 = vrot.slane %v9051_v27, %v8025_v8 }
 0x322   :  { %v6203_v63 = vrot.slane %v6175_v31, %v8044_v54  ;;  %v6204_v14 = vcombine.low %v6182_v21, %v6189_v30  ;;  %v3319_v41 = vrot.slane %v9051_v27, %v8028_v42  ;;  %v3323_v19 = vrot.slane %v9051_v27, %v8033_v39 }
 0x323   :  { %6751 = vperm.xlu0 %7336, %v6514_v35   ;;  %v3327_v25 = vrot.slane %v9051_v27, %v8036_v1  ;;  %v3331_v15 = vrot.slane %v9051_v27, %v8041_v45  ;;  %v6368_v46 = vcombine.low %v3303_v51, %v3307_v43  ;;  %v6369_v13 = vcombine.low %v3311_v20, %v3315_v16 }
 0x324   :  { %7625 = vrcp.f32 %v8922_v50  ;;  %v6205_v4 = vcombine.low %v6196_v61, %v6203_v63  ;;  %v6212_v29 = vrot.slane %v6204_v14, %v8044_v54  ;;  %v6370_v49 = vcombine.low %v3319_v41, %v3323_v19  ;;  %v9522_v63 = vpop.permute.xlu1 %6673 }
 0x325   :  { %7627 = vrcp.f32 %v1217_v55  ;;  %v6371_v12 = vcombine.low %v3327_v25, %v3331_v15  ;;  %v6378_v40 = vrot.slane %v6368_v46, %v8044_v54  ;;  %v6385_v2 = vrot.slane %v6369_v13, %v8044_v54 }
 0x326   :  { %v7622_v3 = vpop.eup %7621  ;;  %v6219_v18 = vrot.slane %v6205_v4, %v8044_v54  ;;  %v6392_v44 = vrot.slane %v6370_v49, %v8044_v54  ;;  %v2343_v27 = vrot.slane %v8928_v33, %v8014_v36  ;;  %v2347_v50 = vrot.slane %v8928_v33, %v8017_v60 }
 0x327   :  { %v1249_v11 = vadd.f32 1.0, %v9048_v17  ;;  %v6399_v5 = vrot.slane %v6371_v12, %v8044_v54  ;;  %v6400_v59 = vcombine.low %v6378_v40, %v6385_v2  ;;  %v2351_v57 = vrot.slane %v8928_v33, %v8022_v7 }
 0x328   :  { %v6220_v55 = vcombine.low %v6212_v29, %v6219_v18  ;;  %v2355_v28 = vrot.slane %v8928_v33, %v8025_v8  ;;  %v2359_v9 = vrot.slane %v8928_v33, %v8028_v42  ;;  %v2363_v37 = vrot.slane %v8928_v33, %v8033_v39 }
 0x329   :  { %v6401_v23 = vcombine.low %v6392_v44, %v6399_v5  ;;  %v6408_v56 = vrot.slane %v6400_v59, %v8044_v54  ;;  %v2367_v17 = vrot.slane %v8928_v33, %v8036_v1  ;;  %v2371_v6 = vrot.slane %v8928_v33, %v8041_v45 }
 0x32a   :  { %6733 = vperm.xlu1 %7335, %v6220_v55   ;;  %v4898_v0 = vcombine.low %v2343_v27, %v2347_v50  ;;  %v4899_v34 = vcombine.low %v2351_v57, %v2355_v28  ;;  %v4900_v10 = vcombine.low %v2359_v9, %v2363_v37  ;;  %v2375_v51 = vrot.slane %v7622_v3, %v8014_v36  ;;  %v9541_v9 = vpop.permute.xlu1 %6586 }
 0x32b   :  { %v6415_v31 = vrot.slane %v6401_v23, %v8044_v54  ;;  %v4901_v21 = vcombine.low %v2367_v17, %v2371_v6  ;;  %v2379_v30 = vrot.slane %v7622_v3, %v8017_v60  ;;  %v2383_v43 = vrot.slane %v7622_v3, %v8022_v7 }
 0x32c   :  { %v7624_v35 = vpop.eup %7623  ;;  %v4908_v61 = vrot.slane %v4898_v0, %v8044_v54  ;;  %v4915_v20 = vrot.slane %v4899_v34, %v8044_v54  ;;  %v4922_v33 = vrot.slane %v4900_v10, %v8044_v54  ;;  %v2387_v16 = vrot.slane %v7622_v3, %v8025_v8  ;;  %v9547_v34 = vpop.permute.xlu0 %6565 }
 0x32d   :  { %v6416_v14 = vcombine.low %v6408_v56, %v6415_v31  ;;  %v4929_v41 = vrot.slane %v4901_v21, %v8044_v54  ;;  %v2391_v19 = vrot.slane %v7622_v3, %v8028_v42  ;;  %v2395_v25 = vrot.slane %v7622_v3, %v8033_v39 }
 0x32e   :  { %v4930_v15 = vcombine.low %v4908_v61, %v4915_v20  ;;  %v2399_v46 = vrot.slane %v7622_v3, %v8036_v1  ;;  %v2403_v13 = vrot.slane %v7622_v3, %v8041_v45  ;;  %v4947_v4 = vcombine.low %v2375_v51, %v2379_v30 }
 0x32f   :  { %6745 = vperm.xlu0 %7336, %v6416_v14   ;;  %v4931_v29 = vcombine.low %v4922_v33, %v4929_v41  ;;  %v4948_v49 = vcombine.low %v2383_v43, %v2387_v16  ;;  %v4949_v12 = vcombine.low %v2391_v19, %v2395_v25  ;;  %v1251_v40 = vadd.f32 1.0, %v8914_v26 }
 0x330   :  { %v4938_v2 = vrot.slane %v4930_v15, %v8044_v54  ;;  %v4950_v18 = vcombine.low %v2399_v46, %v2403_v13  ;;  %v4957_v44 = vrot.slane %v4947_v4, %v8044_v54  ;;  %v2279_v59 = vrot.slane %v7624_v35, %v8014_v36  ;;  %v9560_v46 = vpop.permute.xlu1 %6580 }
 0x331   :  { %v9532_v27 = vpop.eup %7625  ;;  %v4945_v50 = vrot.slane %v4931_v29, %v8044_v54  ;;  %v4964_v5 = vrot.slane %v4948_v49, %v8044_v54  ;;  %v4971_v3 = vrot.slane %v4949_v12, %v8044_v54  ;;  %7629 = vrcp.f32 %v1249_v11 }
 0x332   :  { %v7628_v57 = vpop.eup %7627  ;;  %v4978_v55 = vrot.slane %v4950_v18, %v8044_v54  ;;  %v2283_v26 = vrot.slane %v7624_v35, %v8017_v60  ;;  %v2287_v28 = vrot.slane %v7624_v35, %v8022_v7  ;;  %v2291_v56 = vrot.slane %v7624_v35, %v8025_v8  ;;  %v9566_v18 = vpop.permute.xlu0 %6670 }
 0x333   :  { %v4946_v37 = vcombine.low %v4938_v2, %v4945_v50  ;;  %v4979_v23 = vcombine.low %v4957_v44, %v4964_v5  ;;  %v2295_v17 = vrot.slane %v7624_v35, %v8028_v42  ;;  %7631 = vrcp.f32 %v1251_v40 }
 0x334   :  { %v4980_v6 = vcombine.low %v4971_v3, %v4978_v55  ;;  %v2299_v0 = vrot.slane %v7624_v35, %v8033_v39  ;;  %v2303_v11 = vrot.slane %v7624_v35, %v8036_v1  ;;  %v2307_v51 = vrot.slane %v7624_v35, %v8041_v45 }
 0x335   :  { %6655 = vperm.xlu1 %7335, %v4946_v37   ;;  %v4987_v10 = vrot.slane %v4979_v23, %v8044_v54  ;;  %v4800_v31 = vcombine.low %v2279_v59, %v2283_v26  ;;  %v4801_v21 = vcombine.low %v2287_v28, %v2291_v56  ;;  %v2311_v61 = vrot.slane %v7628_v57, %v8014_v36 }
 0x336   :  { %v4994_v30 = vrot.slane %v4980_v6, %v8044_v54  ;;  %v4802_v43 = vcombine.low %v2295_v17, %v2299_v0  ;;  %v2315_v20 = vrot.slane %v7628_v57, %v8017_v60  ;;  %v4803_v33 = vcombine.low %v2303_v11, %v2307_v51  ;;  %v9578_v17 = vpop.permute.xlu1 %6595 }
 0x337   :  { %v4810_v16 = vrot.slane %v4800_v31, %v8044_v54  ;;  %v4817_v14 = vrot.slane %v4801_v21, %v8044_v54  ;;  %v2319_v41 = vrot.slane %v7628_v57, %v8022_v7  ;;  %v2323_v35 = vrot.slane %v7628_v57, %v8025_v8 }
 0x338   :  { %v4995_v19 = vcombine.low %v4987_v10, %v4994_v30  ;;  %v4824_v25 = vrot.slane %v4802_v43, %v8044_v54  ;;  %v2327_v15 = vrot.slane %v7628_v57, %v8028_v42  ;;  %v4831_v13 = vrot.slane %v4803_v33, %v8044_v54 }
 0x339   :  { %v4832_v4 = vcombine.low %v4810_v16, %v4817_v14  ;;  %v2331_v29 = vrot.slane %v7628_v57, %v8033_v39  ;;  %v2335_v49 = vrot.slane %v7628_v57, %v8036_v1  ;;  %v2339_v12 = vrot.slane %v7628_v57, %v8041_v45 }
 0x33a   :  { %6658 = vperm.xlu0 %7336, %v4995_v19   ;;  %v4849_v40 = vcombine.low %v2311_v61, %v2315_v20  ;;  %v4850_v2 = vcombine.low %v2319_v41, %v2323_v35  ;;  %v4833_v44 = vcombine.low %v4824_v25, %v4831_v13  ;;  %v2887_v23 = vrot.slane %v9532_v27, %v8014_v36  ;;  %v9589_v61 = vpop.permute.xlu0 %6664 }
 0x33b   :  { %v4840_v50 = vrot.slane %v4832_v4, %v8044_v54  ;;  %v4851_v5 = vcombine.low %v2327_v15, %v2331_v29  ;;  %v4852_v3 = vcombine.low %v2335_v49, %v2339_v12  ;;  %v2891_v56 = vrot.slane %v9532_v27, %v8017_v60 }
 0x33c   :  { %v4859_v59 = vrot.slane %v4849_v40, %v8044_v54  ;;  %v4866_v55 = vrot.slane %v4850_v2, %v8044_v54  ;;  %v4847_v26 = vrot.slane %v4833_v44, %v8044_v54  ;;  %v2895_v11 = vrot.slane %v9532_v27, %v8022_v7 }
 0x33d   :  { %v4873_v28 = vrot.slane %v4851_v5, %v8044_v54  ;;  %v4880_v37 = vrot.slane %v4852_v3, %v8044_v54  ;;  %v2899_v10 = vrot.slane %v9532_v27, %v8025_v8  ;;  %v2903_v21 = vrot.slane %v9532_v27, %v8028_v42 }
 0x33e   :  { %v4881_v57 = vcombine.low %v4859_v59, %v4866_v55  ;;  %v7630_v6 = vpop.eup %7629  ;;  %v4848_v0 = vcombine.low %v4840_v50, %v4847_v26  ;;  %v2907_v30 = vrot.slane %v9532_v27, %v8033_v39  ;;  %v2911_v20 = vrot.slane %v9532_v27, %v8036_v1  ;;  %v9608_v5 = vpop.permute.xlu0 %6682 }
 0x33f   :  { %v4882_v51 = vcombine.low %v4873_v28, %v4880_v37  ;;  %v2915_v33 = vrot.slane %v9532_v27, %v8041_v45  ;;  %v5731_v16 = vcombine.low %v2887_v23, %v2891_v56  ;;  %v5732_v41 = vcombine.low %v2895_v11, %v2899_v10  ;;  %v9602_v27 = vpop.permute.xlu1 %6691 }
 0x340   :  { %v4889_v31 = vrot.slane %v4881_v57, %v8044_v54  ;;  %v7632_v43 = vpop.eup %7631  ;;  %6649 = vperm.xlu1 %7335, %v4848_v0   ;;  %v5733_v19 = vcombine.low %v2903_v21, %v2907_v30  ;;  %v3335_v15 = vrot.slane %v7630_v6, %v8014_v36  ;;  %v3339_v13 = vrot.slane %v7630_v6, %v8017_v60 }
 0x341   :  { %v4896_v14 = vrot.slane %v4882_v51, %v8044_v54  ;;  %v5734_v25 = vcombine.low %v2911_v20, %v2915_v33  ;;  %v5741_v35 = vrot.slane %v5731_v16, %v8044_v54  ;;  %v5748_v29 = vrot.slane %v5732_v41, %v8044_v54 }
 0x342   :  { %v5755_v49 = vrot.slane %v5733_v19, %v8044_v54  ;;  %v3343_v12 = vrot.slane %v7630_v6, %v8022_v7  ;;  %v3347_v2 = vrot.slane %v7630_v6, %v8025_v8  ;;  %v3351_v44 = vrot.slane %v7630_v6, %v8028_v42  ;;  %v9618_v21 = vpop.permute.xlu0 %6676 }
 0x343   :  { %v4897_v4 = vcombine.low %v4889_v31, %v4896_v14  ;;  %v5762_v40 = vrot.slane %v5734_v25, %v8044_v54  ;;  %v3355_v50 = vrot.slane %v7630_v6, %v8033_v39  ;;  %v5763_v3 = vcombine.low %v5741_v35, %v5748_v29  ;;  %v9623_v33 = vpop.permute.xlu1 %6589 }
 0x344   :  { %v3359_v59 = vrot.slane %v7630_v6, %v8036_v1  ;;  %v3363_v55 = vrot.slane %v7630_v6, %v8041_v45  ;;  %v6417_v26 = vcombine.low %v3335_v15, %v3339_v13  ;;  %v6418_v37 = vcombine.low %v3343_v12, %v3347_v2 }
 0x345   :  { %6652 = vperm.xlu0 %7336, %v4897_v4   ;;  %v5764_v28 = vcombine.low %v5755_v49, %v5762_v40  ;;  %v6419_v57 = vcombine.low %v3351_v44, %v3355_v50  ;;  %v5771_v23 = vrot.slane %v5763_v3, %v8044_v54  ;;  %v3399_v31 = vrot.slane %v7632_v43, %v8014_v36 }
 0x346   :  { %v6420_v56 = vcombine.low %v3359_v59, %v3363_v55  ;;  %v6427_v0 = vrot.slane %v6417_v26, %v8044_v54  ;;  %v6434_v10 = vrot.slane %v6418_v37, %v8044_v54  ;;  %v3403_v30 = vrot.slane %v7632_v43, %v8017_v60  ;;  %v9634_v12 = vpop.permute.xlu0 %6598 }
 0x347   :  { %v5778_v11 = vrot.slane %v5764_v28, %v8044_v54  ;;  %v6441_v51 = vrot.slane %v6419_v57, %v8044_v54  ;;  %v3407_v20 = vrot.slane %v7632_v43, %v8022_v7  ;;  %v3411_v41 = vrot.slane %v7632_v43, %v8025_v8 }
 0x348   :  { %v6448_v6 = vrot.slane %v6420_v56, %v8044_v54  ;;  %v6449_v14 = vcombine.low %v6427_v0, %v6434_v10  ;;  %v3415_v19 = vrot.slane %v7632_v43, %v8028_v42  ;;  %v3419_v35 = vrot.slane %v7632_v43, %v8033_v39 }
 0x349   :  { %v5779_v16 = vcombine.low %v5771_v23, %v5778_v11  ;;  %v3423_v36 = vrot.slane %v7632_v43, %v8036_v1  ;;  %v3427_v15 = vrot.slane %v7632_v43, %v8041_v45  ;;  %v6515_v13 = vcombine.low %v3399_v31, %v3403_v30  ;;  %v9638_v43 = vpop.permute.xlu1 %6685 }
 0x34a   :  { %v6450_v25 = vcombine.low %v6441_v51, %v6448_v6  ;;  %v6457_v60 = vrot.slane %v6449_v14, %v8044_v54  ;;  %v6516_v7 = vcombine.low %v3407_v20, %v3411_v41  ;;  %v6517_v29 = vcombine.low %v3415_v19, %v3419_v35  ;;  %v9641_v50 = vpop.permute.xlu0 %6592 }
 0x34b   :  { %6706 = vperm.xlu1 %7335, %v5779_v16   ;;  %v6518_v49 = vcombine.low %v3423_v36, %v3427_v15  ;;  %v6525_v8 = vrot.slane %v6515_v13, %v8044_v54 }
 0x34c   :  { %v6464_v4 = vrot.slane %v6450_v25, %v8044_v54  ;;  %v6532_v42 = vrot.slane %v6516_v7, %v8044_v54  ;;  %v6539_v1 = vrot.slane %v6517_v29, %v8044_v54 }
 0x34d   :  { %v6546_v45 = vrot.slane %v6518_v49, %v8044_v54  ;;  %v9644_v55 = vpop.permute.xlu1 %6694 }
 0x34e   :  { %v6465_v39 = vcombine.low %v6457_v60, %v6464_v4  ;;  %v6547_v40 = vcombine.low %v6525_v8, %v6532_v42  ;;  %9900 = vst [vmem:[#allocation13_spill] sm:$0xff] %v9644_v55  ;;  %v9646_v26 = vpop.permute.xlu0 %6688  ;;  %v9687_v4 = vand.u32 127, %v9896_v53 }
 0x34f   :  { %v6548_v2 = vcombine.low %v6539_v1, %v6546_v45 }
 0x350   :  { %6748 = vperm.xlu0 %7336, %v6465_v39   ;;  %v6555_v44 = vrot.slane %v6547_v40, %v8044_v54  ;;  %v6762_v49 = vadd.s32 4294967288, %v9687_v4  ;;  %v6769_v42 = vadd.s32 4294967280, %v9687_v4  ;;  %v6760_v45 = vsub.s32 %v9687_v4, %v8009_v24 }
 0x351   :  { %v6562_v3 = vrot.slane %v6548_v2, %v8044_v54  ;;  %v9648_v28 = vpop.permute.xlu1 %6607  ;;  %v6776_v40 = vadd.s32 4294967272, %v9687_v4  ;;  %v6797_v54 = vadd.s32 4294967248, %v9687_v4 }
 0x352   :  { %9901 = vst [vmem:[#allocation14_spill] sm:$0xff] %v9648_v28  ;;  %v9650_v37 = vpop.permute.xlu0 %6610  ;;  %v6765_v39 = vsub.s32 %v6762_v49, %v8009_v24  ;;  %v6772_v2 = vsub.s32 %v6769_v42, %v8009_v24  ;;  %v6804_v49 = vadd.s32 4294967240, %v9687_v4  ;;  %v6949_v28 = vrot.slane %v9364_v22, %v6760_v45 }
 0x353   :  { %v6563_v59 = vcombine.low %v6555_v44, %v6562_v3  ;;  %9902 = vst [vmem:[#allocation15_spill] sm:$0xff] %v9650_v37  ;;  %v6761_v37 = vrot.slane %v9547_v34, %v6760_v45  ;;  %v6779_v42 = vsub.s32 %v6776_v40, %v8009_v24  ;;  %v9719_v55 = vsub.s32 %v6797_v54, %v8009_v24 }
 0x354   :  { %v6953_v44 = vrot.slane %v9589_v61, %v6765_v39  ;;  %v6766_v3 = vrot.slane %v9418_v47, %v6765_v39  ;;  %v6958_v61 = vrot.slane %v9340_v48, %v6772_v2  ;;  %v9722_v34 = vsub.s32 %v6804_v49, %v8009_v24 }
 0x355   :  { %6754 = vperm.xlu0 %7336, %v6563_v59   ;;  %v9652_v57 = vpop.permute.xlu1 %6703  ;;  %v6773_v48 = vrot.slane %v9312_v62, %v6772_v2  ;;  %v6963_v40 = vrot.slane %v9566_v18, %v6779_v42  ;;  %v6801_v18 = vrot.slane %v9444_v32, %v9719_v55  ;;  %v6811_v32 = vadd.s32 4294967232, %v9687_v4 }
 0x356   :  { %9903 = vst [vmem:[#allocation16_spill] sm:$0xff] %v9652_v57  ;;  %v9654_v23 = vpop.permute.xlu0 %6604  ;;  %v6783_v57 = vadd.s32 4294967264, %v9687_v4 }
 0x357   :  { %9904 = vst [vmem:[#allocation17_spill] sm:$0xff] %v9654_v23  ;;  %v6790_v23 = vadd.s32 4294967256, %v9687_v4 }
 0x358   :  { %v6786_v22 = vsub.s32 %v6783_v57, %v8009_v24 }
 0x359   :  { %v9658_v0 = vpop.permute.xlu1 %6601 }
 0x35a   :  { %v9656_v56 = vpop.permute.xlu0 %6622 }
 0x35b   :  { %v6884_v57 = vrot.slane %v9656_v56, %v6779_v42 }
 0x35d   :  { %v9662_v10 = vpop.permute.xlu1 %6697 }
 0x35e   :  { %v9660_v11 = vpop.permute.xlu0 %6718  ;;  %9905 = vst [vmem:[#allocation18_spill] sm:$0xff] %v9662_v10  ;;  %v6768_v10 = vsel %vm6767_vm0, %v6766_v3, %v6761_v37  ;;  %v6780_v37 = vrot.slane %v9391_v52, %v6779_v42  ;;  %v6978_v52 = vrot.slane %v9471_v58, %v9719_v55 }
 0x361   :  { %v9664_v31 = vpop.permute.xlu1 %6700 }
 0x362   :  { %v6617_v51 = vpop.permute.xlu0 %6616  ;;  %9906 = vst [vmem:[#allocation19_spill] sm:$0xff] %v9664_v31 }
 0x363   :  { %v6874_v31 = vrot.slane %v6617_v51, %v6765_v39 }
 0x365   :  { %v6620_v30 = vpop.permute.xlu1 %6619 }
 0x366   :  { %v9666_v6 = vpop.permute.xlu0 %6712  ;;  %v6879_v51 = vrot.slane %v6620_v30, %v6772_v2  ;;  %v6983_v30 = vrot.slane %v9608_v5, %v9722_v34  ;;  %v6853_v5 = vadd.s32 4294967184, %v9687_v4 }
 0x367   :  { %v7032_v62 = vrot.slane %v9666_v6, %v6765_v39 }
 0x369   :  { %v9670_v16 = vpop.permute.xlu1 %6715 }
 0x36a   :  { %v9668_v20 = vpop.permute.xlu0 %6634  ;;  %v7037_v39 = vrot.slane %v9670_v16, %v6772_v2  ;;  %v6968_v2 = vrot.slane %v9522_v63, %v6786_v22 }
 0x36d   :  { %v6614_v41 = vpop.permute.xlu1 %6613 }
 0x36e   :  { %v9672_v14 = vpop.permute.xlu0 %6730  ;;  %v6870_v59 = vrot.slane %v6614_v41, %v6760_v45  ;;  %v6954_v41 = vsel %vm6767_vm0, %v6953_v44, %v6949_v28 }
 0x36f   :  { %v6959_v54 = vsel %vm6774_vm1, %v6958_v61, %v6954_v41 }
 0x371   :  { %v6710_v25 = vpop.permute.xlu1 %6709 }
 0x372   :  { %v9674_v19 = vpop.permute.xlu0 %6628  ;;  %v7028_v28 = vrot.slane %v6710_v25, %v6760_v45 }
 0x374   :  { %v7033_v56 = vsel %vm6767_vm0, %v7032_v62, %v7028_v28  ;;  %v6818_v28 = vadd.s32 4294967224, %v9687_v4  ;;  %v6904_v62 = vrot.slane %v9668_v20, %v9722_v34 }
 0x375   :  { %v9678_v36 = vpop.permute.xlu1 %6631 }
 0x376   :  { %v9676_v35 = vpop.permute.xlu0 %6724 }
 0x379   :  { %v9682_v60 = vpop.permute.xlu1 %6727 }
 0x37a   :  { %v9680_v15 = vpop.permute.xlu0 %6739 }
 0x37d   :  { %v6626_v7 = vpop.permute.xlu1 %6625 }
 0x37e   :  { %v9684_v13 = vpop.permute.xlu0 %6646  ;;  %v6889_v3 = vrot.slane %v6626_v7, %v6786_v22  ;;  %v6793_v7 = vsub.s32 %v6790_v23, %v8009_v24 }
 0x380   :  { %v6794_v61 = vrot.slane %v9560_v46, %v6793_v7  ;;  %v6894_v23 = vrot.slane %v9674_v19, %v6793_v7 }
 0x382   :  { %v9689_v29 = vpop.permute.xlu0 %6742 }
 0x383   :  { %9907 = vst [vmem:[#allocation20_spill] sm:$0xff] %v9689_v29  ;;  %v6875_v29 = vsel %vm6767_vm0, %v6874_v31, %v6870_v59  ;;  %v6775_v59 = vsel %vm6774_vm1, %v6773_v48, %v6768_v10  ;;  %v6832_v10 = vadd.s32 4294967208, %v9687_v4  ;;  %v7038_v48 = vsel %vm6774_vm1, %v7037_v39, %v7033_v56 }
 0x384   :  { %v9692_v8 = vpop.permute.xlu1 %6721  ;;  %v6880_v31 = vsel %vm6774_vm1, %v6879_v51, %v6875_v29  ;;  %v6787_v29 = vrot.slane %v9497_v38, %v6786_v22  ;;  %v6782_v49 = vsel %vm6781_vm2, %v6780_v37, %v6775_v59  ;;  %v6964_v51 = vsel %vm6781_vm2, %v6963_v40, %v6959_v54 }
 0x385   :  { %v6885_v6 = vsel %vm6781_vm2, %v6884_v57, %v6880_v31  ;;  %v6808_v38 = vrot.slane %v9541_v9, %v9722_v34  ;;  %v7047_v16 = vrot.slane %v9692_v8, %v6786_v22  ;;  %v7042_v37 = vrot.slane %v9660_v11, %v6779_v42 }
 0x386   :  { %v6890_v45 = vsel %vm6788_vm3, %v6889_v3, %v6885_v6  ;;  %v6789_v19 = vsel %vm6788_vm3, %v6787_v29, %v6782_v49  ;;  %v9768_v31 = vsub.s32 %v6832_v10, %v8009_v24  ;;  %v6814_v40 = vsub.s32 %v6811_v32, %v8009_v24 }
 0x387   :  { %v6895_v46 = vsel %vm6795_vm4, %v6894_v23, %v6890_v45  ;;  %v6899_v9 = vrot.slane %v9678_v36, %v9719_v55  ;;  %v6796_v63 = vsel %vm6795_vm4, %v6794_v61, %v6789_v19  ;;  %v6825_v8 = vadd.s32 4294967216, %v9687_v4 }
 0x388   :  { %v7043_v11 = vsel %vm6781_vm2, %v7042_v37, %v7038_v48  ;;  %v6973_v42 = vrot.slane %v9618_v21, %v6793_v7  ;;  %v6969_v57 = vsel %vm6788_vm3, %v6968_v2, %v6964_v51  ;;  %v6821_v36 = vsub.s32 %v6818_v28, %v8009_v24 }
 0x389   :  { %v9696_v1 = vpop.permute.xlu0 %6640  ;;  %v7048_v22 = vsel %vm6788_vm3, %v7047_v16, %v7043_v11  ;;  %v6900_v3 = vsel %vm6802_vm5, %v6899_v9, %v6895_v46  ;;  %v7052_v10 = vrot.slane %v9676_v35, %v6793_v7  ;;  %v6836_v21 = vrot.slane %v9634_v12, %v9768_v31 }
 0x38a   :  { %v6803_v6 = vsel %vm6802_vm5, %v6801_v18, %v6796_v63  ;;  %v6815_v29 = vrot.slane %v9623_v33, %v6814_v40  ;;  %v6905_v20 = vsel %vm6809_vm6, %v6904_v62, %v6900_v3  ;;  %v6974_v35 = vsel %vm6795_vm4, %v6973_v42, %v6969_v57  ;;  %v9909_v62 = vld [vmem:[#allocation13_spill] sm:$0xff] }
 0x38b   :  { %v7053_v32 = vsel %vm6795_vm4, %v7052_v10, %v7048_v22  ;;  %v6839_v7 = vadd.s32 4294967200, %v9687_v4  ;;  %v7057_v12 = vrot.slane %v9682_v60, %v9719_v55  ;;  %v6822_v33 = vrot.slane %v9641_v50, %v6821_v36 }
 0x38c   :  { %v6860_v45 = vadd.s32 4294967176, %v9687_v4  ;;  %v6810_v49 = vsel %vm6809_vm6, %v6808_v38, %v6803_v6  ;;  %v6914_v61 = vrot.slane %v9696_v1, %v6821_v36  ;;  %v6979_v60 = vsel %vm6802_vm5, %v6978_v52, %v6974_v35 }
 0x38d   :  { %v6817_v23 = vsel %vm6816_vm7, %v6815_v29, %v6810_v49  ;;  %v7058_v51 = vsel %vm6802_vm5, %v7057_v12, %v7053_v32  ;;  %v6846_v50 = vadd.s32 4294967192, %v9687_v4  ;;  %v7062_v16 = vrot.slane %v9672_v14, %v9722_v34 }
 0x38e   :  { %v6988_v28 = vrot.slane %v9638_v43, %v6814_v40  ;;  %v6993_v55 = vrot.slane %v9646_v26, %v6821_v36  ;;  %v6824_v52 = vsel %vm6823_vm8, %v6822_v33, %v6817_v23  ;;  %v6984_v37 = vsel %vm6809_vm6, %v6983_v30, %v6979_v60 }
 0x38f   :  { %v9704_v53 = vpop.permute.xlu1 %6643  ;;  %v7063_v14 = vsel %vm6809_vm6, %v7062_v16, %v7058_v51  ;;  %v6924_v26 = vrot.slane %v9684_v13, %v9768_v31  ;;  %v6863_v4 = vsub.s32 %v6860_v45, %v8009_v24  ;;  %v6856_v3 = vsub.s32 %v6853_v5, %v8009_v24  ;;  %v9913_v45 = vld [vmem:[#allocation14_spill] sm:$0xff]  ;;  %v9914_v51 = vld [vmem:[#allocation15_spill] sm:$0xff] }
 0x390   :  { %v6989_v9 = vsel %vm6816_vm7, %v6988_v28, %v6984_v37  ;;  %v7003_v10 = vrot.slane %v9909_v62, %v9768_v31 }
 0x391   :  { %v6994_v22 = vsel %vm6823_vm8, %v6993_v55, %v6989_v9  ;;  %v6857_v49 = vrot.slane %v9913_v45, %v6856_v3 }
 0x394   :  { %v9713_v47 = vpop.permute.xlu0 %6736 }
 0x399   :  { %v9728_v44 = vpop.permute.xlu1 %6637 }
 0x39a   :  { %v6909_v59 = vrot.slane %v9728_v44, %v6814_v40  ;;  %v9794_v44 = vsub.s32 %v6825_v8, %v8009_v24 }
 0x39c   :  { %v6910_v18 = vsel %vm6816_vm7, %v6909_v59, %v6905_v20  ;;  %v6829_v2 = vrot.slane %v9578_v17, %v9794_v44  ;;  %v6919_v58 = vrot.slane %v9704_v53, %v9794_v44  ;;  %v6849_v53 = vsub.s32 %v6846_v50, %v8009_v24 }
 0x39d   :  { %v6915_v38 = vsel %vm6823_vm8, %v6914_v61, %v6910_v18  ;;  %v7077_v42 = vrot.slane %v9680_v15, %v9794_v44 }
 0x39e   :  { %v9742_v25 = vpop.permute.xlu0 %6751  ;;  %v6920_v43 = vsel %vm6830_vm9, %v6919_v58, %v6915_v38  ;;  %v6831_v34 = vsel %vm6830_vm9, %v6829_v2, %v6824_v52 }
 0x39f   :  { %v6925_v8 = vsel %vm6837_vm10, %v6924_v26, %v6920_v43  ;;  %v7097_v55 = vrot.slane %v9742_v25, %v6856_v3  ;;  %v9916_v26 = vld [vmem:[#allocation12_spill] sm:$0xff] }
 0x3a5   :  { %v9755_v41 = vpop.permute.xlu1 %6733 }
 0x3a6   :  { %v7067_v48 = vrot.slane %v9755_v41, %v6814_v40  ;;  %v6842_v41 = vsub.s32 %v6839_v7, %v8009_v24  ;;  %v7072_v40 = vrot.slane %v9713_v47, %v6821_v36  ;;  %v6998_v47 = vrot.slane %v9602_v27, %v9794_v44  ;;  %v9908_v36 = vld [vmem:[#allocation17_spill] sm:$0xff]  ;;  %v9910_v27 = vld [vmem:[#allocation20_spill] sm:$0xff]  ;;  %v9912_v7 = vld [vmem:[#allocation19_spill] sm:$0xff] }
 0x3a7   :  { %v6850_v15 = vrot.slane %v9908_v36, %v6849_v53  ;;  %v7082_v6 = vrot.slane %v9910_v27, %v9768_v31  ;;  %v7013_v12 = vrot.slane %v9912_v7, %v6849_v53 }
 0x3a8   :  { %v7068_v17 = vsel %vm6816_vm7, %v7067_v48, %v7063_v14  ;;  %v6843_v30 = vrot.slane %v9658_v0, %v6842_v41  ;;  %v6838_v0 = vsel %vm6837_vm10, %v6836_v21, %v6831_v34  ;;  %v6999_v44 = vsel %vm6830_vm9, %v6998_v47, %v6994_v22  ;;  %v9911_v21 = vld [vmem:[#allocation18_spill] sm:$0xff] }
 0x3a9   :  { %v7073_v63 = vsel %vm6823_vm8, %v7072_v40, %v7068_v17  ;;  %v7008_v24 = vrot.slane %v9911_v21, %v6842_v41  ;;  %v6864_v48 = vrot.slane %v9914_v51, %v6863_v4  ;;  %v7004_v60 = vsel %vm6837_vm10, %v7003_v10, %v6999_v44 }
 0x3aa   :  { %v9773_v54 = vpop.permute.xlu0 %6745  ;;  %v6845_v59 = vsel %vm6844_vm11, %v6843_v30, %v6838_v0  ;;  %v7078_v57 = vsel %vm6830_vm9, %v7077_v42, %v7073_v63  ;;  %v9917_v34 = vlaneseq }
 0x3ab   :  { %v6852_v35 = vsel %vm6851_vm12, %v6850_v15, %v6845_v59  ;;  %v7083_v18 = vsel %vm6837_vm10, %v7082_v6, %v7078_v57  ;;  %v7087_v31 = vrot.slane %v9773_v54, %v6842_v41  ;;  %v7009_v16 = vsel %vm6844_vm11, %v7008_v24, %v7004_v60 }
 0x3ac   :  { %v6859_v50 = vsel %vm6858_vm13, %v6857_v49, %v6852_v35  ;;  %vm7131_vm15 = vcmp.lt.s32.totalorder %v9917_v34, 512 }
 0x3ad   :  { %v7088_v38 = vsel %vm6844_vm11, %v7087_v31, %v7083_v18  ;;  %v6866_v14 = vsel %vm6865_vm14, %v6864_v48, %v6859_v50 }
 0x3b0   :  { %v9787_v56 = vpop.permute.xlu1 %6655 }
 0x3b1   :  { %v6939_v32 = vrot.slane %v9787_v56, %v6856_v3 }
 0x3b5   :  { %v9803_v39 = vpop.permute.xlu0 %6658 }
 0x3b6   :  { %v6944_v56 = vrot.slane %v9803_v39, %v6863_v4 }
 0x3bb   :  { %v6650_v1 = vpop.permute.xlu1 %6649 }
 0x3bc   :  { %v6929_v46 = vrot.slane %v6650_v1, %v6842_v41  ;;  %v7014_v1 = vsel %vm6851_vm12, %v7013_v12, %v7009_v16  ;;  %v9915_v41 = vld [vmem:[#allocation16_spill] sm:$0xff] }
 0x3bd   :  { %v7018_v58 = vrot.slane %v9915_v41, %v6856_v3 }
 0x3be   :  { %v6930_v13 = vsel %vm6844_vm11, %v6929_v46, %v6925_v8 }
 0x3bf   :  { %v7019_v37 = vsel %vm6858_vm13, %v7018_v58, %v7014_v1 }
 0x3c0   :  { %v6653_v19 = vpop.permute.xlu0 %6652 }
 0x3c1   :  { %v6934_v11 = vrot.slane %v6653_v19, %v6849_v53 }
 0x3c3   :  { %v6935_v29 = vsel %vm6851_vm12, %v6934_v11, %v6930_v13 }
 0x3c4   :  { %v6940_v61 = vsel %vm6858_vm13, %v6939_v32, %v6935_v29 }
 0x3c5   :  { %v6945_v2 = vsel %vm6865_vm14, %v6944_v56, %v6940_v61 }
 0x3c6   :  { %v6707_v23 = vpop.permute.xlu1 %6706  ;;  %v7104_v43 = vcombine.low %v6866_v14, %v6945_v2 }
 0x3c7   :  { %v7023_v54 = vrot.slane %v6707_v23, %v6863_v4 }
 0x3c8   :  { %v7112_v9 = vrot.slane %v7104_v43, %v9916_v26 }
 0x3c9   :  { %v7024_v46 = vsel %vm6865_vm14, %v7023_v54, %v7019_v37 }
 0x3cb   :  { %v6749_v20 = vpop.permute.xlu0 %6748 }
 0x3cc   :  { %v7092_v33 = vrot.slane %v6749_v20, %v6849_v53 }
 0x3ce   :  { %v7093_v28 = vsel %vm6851_vm12, %v7092_v33, %v7088_v38 }
 0x3cf   :  { %v7098_v17 = vsel %vm6858_vm13, %v7097_v55, %v7093_v28 }
 0x3d0   :  { %v6755_v52 = vpop.permute.xlu0 %6754 }
 0x3d1   :  { %v7102_v39 = vrot.slane %v6755_v52, %v6863_v4 }
 0x3d3   :  { %v7103_v19 = vsel %vm6865_vm14, %v7102_v39, %v7098_v17 }
 0x3d4   :  { %v7105_v53 = vcombine.low %v7024_v46, %v7103_v19 }
 0x3d6   :  { %v7119_v40 = vrot.slane %v7105_v53, %v9916_v26 }
 0x3d8   :  { %v7120_v5 = vcombine.low %v7112_v9, %v7119_v40 }
 0x3da   :  { %v7127_v25 = vrot.slane %v7120_v5, %v9916_v26 }
 0x3dc   :  { %7133 = vst.msk [vmem:[#allocation8] sm:$0xf] %vm7131_vm15, %v7127_v25 }
 0x3dd   :  { %7684 = shalt.err (!%p7681_p0)
}
 0x3de   :  { %7143 = dma.vmem_to_hbm [thread:$0]  %s7141_s7, 64, %s9895_s5, [#allocation5]  }
 0x3df   :  { %7697 = dma.done.wait [#allocation5], 64  }
 0x3e0   :  { %7698 = vsyncadd [#allocation5], 4294967232 }
 0x3e1   :  { %7147 = vsyncpa [#allocation4], 1 }
 0x3e2   :  { %7148 = vsyncpa [#allocation7], 1 }
 0x3e3   :  { %7149 = vsyncpa [#allocation5], 1 }

</bundles_post_ra>
